<compile_context>
chip_gen: v6e
topology: v6e:2x2x1
jax: 0.10.0
libtpu: 0.0.40
codegen_flags: <defaults>
</compile_context>

<pallas_src>
import functools
import math

import jax
import jax.numpy as jnp
from jax.experimental import pallas as pl
from jax.experimental.pallas import tpu as pltpu

_LANE = 128
_LANE_CANDIDATES = (4096, 2048, 1024, 512, 256, _LANE)

# lowbias32 hash constants as signed-int32 bit patterns (int32 multiply wraps
# two's-complement on TPU/XLA, so this is bit-identical to the uint32 version).
_MIX_M1 = 0x7FEB352D
_MIX_M2 = 0x846CA68B - (1 << 32)


def _mix32(x):
    """lowbias32 integer hash (int32; logical shifts emulated via mask)."""
    x = x ^ ((x >> 16) & 0xFFFF)
    x = x * _MIX_M1
    x = x ^ ((x >> 15) & 0x1FFFF)
    x = x * _MIX_M2
    x = x ^ ((x >> 16) & 0xFFFF)
    return x


def _gaussian_noise_kernel(seed_ref, x_ref, o_ref, *, sigma):
    """out = x * (1 + sigma * N(0,1)); noise keyed by (seed, global pair index).

    One 32-bit hash per (top-row, bottom-row) element pair -> two 16-bit
    uniforms -> Box-Muller (cos, sin) normals.  The two halves are stored as
    separate lane-dense slabs; no lane-axis concatenate / relayout.
    """
    br, lw = x_ref.shape
    hbr = (br + 1) // 2            # rows of generated pairs (cos half)
    pid = pl.program_id(0)

    # Scalar-unit work: non-linear seed mix + per-tile counter base.
    seed_h = _mix32(seed_ref[0])
    base = pid * (hbr * lw)        # NOTE: pair counters unique mod 2**32 only

    rows_i = jax.lax.broadcasted_iota(jnp.int32, (hbr, lw), 0)
    cols_i = jax.lax.broadcasted_iota(jnp.int32, (hbr, lw), 1)
    bits = _mix32((base + rows_i * lw + cols_i) ^ seed_h)

    # Two 16-bit uniforms per 32-bit hash; u1 in (0, 1], u2 in [0, 1).
    inv16 = 1.0 / 65536.0
    u1 = (((bits >> 16) & 0xFFFF).astype(jnp.float32) + 1.0) * inv16
    u2 = (bits & 0xFFFF).astype(jnp.float32) * inv16

    # Box-Muller: one (u1, u2) pair -> two independent standard normals.
    r = jnp.sqrt(-2.0 * jnp.log(u1))
    theta = (2.0 * math.pi) * u2
    f_top = 1.0 + sigma * (r * jnp.cos(theta))
    f_bot = 1.0 + sigma * (r * jnp.sin(theta))

    if o_ref.dtype != jnp.float32:
        # bf16 path: keep x in its native dtype (no full-tile f32 upcast); cast
        # only the noise factor and multiply on packed VPU lanes (v6e/v7x).
        f_top = f_top.astype(o_ref.dtype)
        f_bot = f_bot.astype(o_ref.dtype)

    o_ref[:hbr, :] = (x_ref[:hbr, :] * f_top).astype(o_ref.dtype)
    if br > hbr:                                    # static; skipped when br == 1
        o_ref[hbr:, :] = (x_ref[hbr:, :] * f_bot[:br - hbr]).astype(o_ref.dtype)


def _vmem_capacity_bytes():
    try:
        return int(pltpu.get_tpu_info().vmem_capacity_bytes)
    except Exception:
        return 64 * 1024 * 1024    # conservative fallback (v7x per-TC VMEM)


def gaussian_noise(x, seed, *, sigma=0.1, training=True, is_relative_detach=True,
                   block_rows=None):
    """Pallas implementation of GaussianNoise.forward.

    x: any-shaped float array (e.g. NCHW activations).
    seed: int / int32 scalar.  Pass a fresh seed every call to resample noise.
    """
    del is_relative_detach  # forward values identical; only grads would differ
    # TODO(synk): no custom_vjp, so PyTorch's detach-based backward semantics
    # (is_relative_detach=True) are not reproduced if differentiated through.
    if (not training) or sigma == 0:
        return x

    orig_shape = x.shape
    flat = x.reshape(-1)
    n = flat.shape[0]
    if n == 0:
        return x

    # Lane-dense 2-D slab: widest lane dim (multiple of 128) dividing n, so the
    # common NCHW case needs no host-side padding at all.
    lane_w = next((c for c in _LANE_CANDIDATES if n % c == 0), None)
    if lane_w is None:
        lane_w = _LANE
        flat = jnp.pad(flat, (0, (-n) % lane_w))    # rare ragged tail only
    rows = flat.shape[0] // lane_w
    x2d = flat.reshape(rows, lane_w)

    itemsize = x2d.dtype.itemsize
    # 2x the dtype sublane multiple (f32: 16, bf16: 32, int8/fp8: 64) so the
    # kernel's row-halves stay sublane-aligned and loads/stores stay packed.
    sub = 2 * max(8, 32 // itemsize)

    # Generation-aware tiling: v5e/v6e report ~128 MiB VMEM (big tiles), v7x
    # has 64 MiB per TensorCore (cap tiles and the scoped-vmem limit).
    cap = _vmem_capacity_bytes()
    if cap >= 100 * 1024 * 1024:
        tile_elems_target = (8 * 1024 * 1024) // 4   # ~8 MiB f32-equivalent tile
        vmem_limit = min(96 * 1024 * 1024, (cap * 3) // 4)
    else:
        tile_elems_target = (4 * 1024 * 1024) // 4   # ~4 MiB f32-equivalent tile
        vmem_limit = min(48 * 1024 * 1024, (cap * 3) // 4)

    if block_rows is None:
        br = max(sub, (tile_elems_target // lane_w // sub) * sub)
        br = min(br, rows)
        if br >= rows and rows >= 2 * sub:
            # Guarantee >=2 grid steps so v7x's second TensorCore gets work.
            half = (rows + 1) // 2
            br = min(rows, ((half + sub - 1) // sub) * sub)
    else:
        br = min(int(block_rows), rows)              # explicit override (tests)

    grid = (pl.cdiv(rows, br),)                      # ragged last block is masked

    seed_arr = jnp.asarray(seed, dtype=jnp.int32).reshape((1,))

    nbytes = x2d.size * itemsize
    cost = pl.CostEstimate(flops=16 * x2d.size, transcendentals=2 * x2d.size,
                           bytes_accessed=2 * nbytes)

    out2d = pl.pallas_call(
        functools.partial(_gaussian_noise_kernel, sigma=float(sigma)),
        out_shape=jax.ShapeDtypeStruct((rows, lane_w), x.dtype),
        grid=grid,
        in_specs=[
            pl.BlockSpec(memory_space=pltpu.SMEM),            # seed scalar
            pl.BlockSpec((br, lane_w), lambda i: (i, 0)),     # activation tile
        ],
        out_specs=pl.BlockSpec((br, lane_w), lambda i: (i, 0)),
        compiler_params=pltpu.CompilerParams(
            dimension_semantics=("parallel",),                # v7x: 2 TCs split grid
            vmem_limit_bytes=vmem_limit,
        ),
        cost_estimate=cost,
    )(seed_arr, x2d)

    out_flat = out2d.reshape(-1)
    if out_flat.shape[0] != n:
        out_flat = out_flat[:n]
    return out_flat.reshape(orig_shape)


if __name__ == "__main__":
    sigma = 0.1

    # CIFAR-like activation tensor: (N, C, H, W) = (2, 4, 16, 16)
    x = jax.random.normal(jax.random.PRNGKey(0), (2, 4, 16, 16), dtype=jnp.float32)

    y = jax.block_until_ready(gaussian_noise(x, seed=42, sigma=sigma, training=True))
    assert y.shape == x.shape and y.dtype == x.dtype

    # Noise is relative and bounded: |z| <= sqrt(-2*ln(2^-16)) ~= 4.72 < 6.
    diff = jnp.abs(y - x)
    assert bool(jnp.all(diff <= 6.0 * sigma * jnp.abs(x) + 1e-6)), "relative bound failed"
    assert bool(jnp.any(diff > 0)), "noise was not applied in training mode"

    # Eval mode is exactly the identity.
    y_eval = jax.block_until_ready(gaussian_noise(x, seed=42, sigma=sigma, training=False))
    assert bool(jnp.all(y_eval == x)), "eval mode must be identity"

    # Multi-tile path: force a 2-block grid; tiles must draw independent noise
    # and the implied noise must be ~N(0, 1).
    x2 = jax.random.normal(jax.random.PRNGKey(1), (8, 8, 32, 32), dtype=jnp.float32)
    y2 = jax.block_until_ready(
        gaussian_noise(x2, seed=7, sigma=sigma, training=True, block_rows=8))
    z2 = ((y2 - x2) / (sigma * x2)).reshape(-1)
    half = z2.shape[0] // 2
    assert not bool(jnp.allclose(z2[:half], z2[half:])), "per-tile noise is correlated"
    assert abs(float(jnp.mean(z2))) < 0.1, "noise mean is off"
    assert 0.85 < float(jnp.std(z2)) < 1.15, "noise std is off"

    # bf16 path (no full-tile f32 upcast in the kernel).
    xb = x.astype(jnp.bfloat16)
    yb = jax.block_until_ready(gaussian_noise(xb, seed=3, sigma=sigma, training=True))
    assert yb.shape == xb.shape and yb.dtype == jnp.bfloat16
    assert bool(jnp.all(jnp.isfinite(yb.astype(jnp.float32))))
    assert bool(jnp.any(yb != xb)), "noise was not applied to bf16 input"

    print("KERNEL_OK")
</pallas_src>

<mosaic_0001>
module attributes {stable_mosaic.version = 11 : i64} {
  func.func @_gaussian_noise_kernel(%arg0: i32, %arg1: memref<1xi32, #tpu.memory_space<smem>>, %arg2: memref<1x2048xf32, #tpu.memory_space<vmem>>, %arg3: memref<1x2048xf32, #tpu.memory_space<vmem>>) attributes {dimension_semantics = [#tpu.dimension_semantics<parallel>], iteration_bounds = array<i64: 1>, scalar_prefetch = 0 : i64, scratch_operands = 0 : i64, tpu.core_type = #tpu.core_type<tc>, window_params = [{transform_indices = @transform_0, window_bounds = array<i64: 1>}, {transform_indices = @transform_1, window_bounds = array<i64: 1, 2048>}, {transform_indices = @transform_2, window_bounds = array<i64: 1, 2048>}]} {
    %c0 = arith.constant 0 : index
    %0 = memref.load %arg1[%c0] : memref<1xi32, #tpu.memory_space<smem>>
    %c16_i32 = arith.constant 16 : i32
    %1 = arith.shrsi %0, %c16_i32 : i32
    %c65535_i32 = arith.constant 65535 : i32
    %2 = arith.andi %1, %c65535_i32 : i32
    %3 = arith.xori %0, %2 : i32
    %c2146121005_i32 = arith.constant 2146121005 : i32
    %4 = arith.muli %3, %c2146121005_i32 : i32
    %c15_i32 = arith.constant 15 : i32
    %5 = arith.shrsi %4, %c15_i32 : i32
    %c131071_i32 = arith.constant 131071 : i32
    %6 = arith.andi %5, %c131071_i32 : i32
    %7 = arith.xori %4, %6 : i32
    %c-2073254261_i32 = arith.constant -2073254261 : i32
    %8 = arith.muli %7, %c-2073254261_i32 : i32
    %c16_i32_0 = arith.constant 16 : i32
    %9 = arith.shrsi %8, %c16_i32_0 : i32
    %c65535_i32_1 = arith.constant 65535 : i32
    %10 = arith.andi %9, %c65535_i32_1 : i32
    %11 = arith.xori %8, %10 : i32
    %c2048_i32 = arith.constant 2048 : i32
    %12 = arith.muli %arg0, %c2048_i32 : i32
    %13 = tpu.iota {dimensions = array<i32: 0>} : vector<1x2048xi32>
    %14 = tpu.iota {dimensions = array<i32: 1>} : vector<1x2048xi32>
    %c2048_i32_2 = arith.constant 2048 : i32
    %15 = vector.broadcast %c2048_i32_2 : i32 to vector<1x2048xi32>
    %16 = arith.muli %13, %15 : vector<1x2048xi32>
    %17 = vector.broadcast %12 : i32 to vector<1x2048xi32>
    %18 = arith.addi %17, %16 : vector<1x2048xi32>
    %19 = arith.addi %18, %14 : vector<1x2048xi32>
    %20 = vector.broadcast %11 : i32 to vector<1x2048xi32>
    %21 = arith.xori %19, %20 : vector<1x2048xi32>
    %c16_i32_3 = arith.constant 16 : i32
    %22 = vector.broadcast %c16_i32_3 : i32 to vector<1x2048xi32>
    %23 = arith.shrsi %21, %22 : vector<1x2048xi32>
    %c65535_i32_4 = arith.constant 65535 : i32
    %24 = vector.broadcast %c65535_i32_4 : i32 to vector<1x2048xi32>
    %25 = arith.andi %23, %24 : vector<1x2048xi32>
    %26 = arith.xori %21, %25 : vector<1x2048xi32>
    %c2146121005_i32_5 = arith.constant 2146121005 : i32
    %27 = vector.broadcast %c2146121005_i32_5 : i32 to vector<1x2048xi32>
    %28 = arith.muli %26, %27 : vector<1x2048xi32>
    %c15_i32_6 = arith.constant 15 : i32
    %29 = vector.broadcast %c15_i32_6 : i32 to vector<1x2048xi32>
    %30 = arith.shrsi %28, %29 : vector<1x2048xi32>
    %c131071_i32_7 = arith.constant 131071 : i32
    %31 = vector.broadcast %c131071_i32_7 : i32 to vector<1x2048xi32>
    %32 = arith.andi %30, %31 : vector<1x2048xi32>
    %33 = arith.xori %28, %32 : vector<1x2048xi32>
    %c-2073254261_i32_8 = arith.constant -2073254261 : i32
    %34 = vector.broadcast %c-2073254261_i32_8 : i32 to vector<1x2048xi32>
    %35 = arith.muli %33, %34 : vector<1x2048xi32>
    %c16_i32_9 = arith.constant 16 : i32
    %36 = vector.broadcast %c16_i32_9 : i32 to vector<1x2048xi32>
    %37 = arith.shrsi %35, %36 : vector<1x2048xi32>
    %c65535_i32_10 = arith.constant 65535 : i32
    %38 = vector.broadcast %c65535_i32_10 : i32 to vector<1x2048xi32>
    %39 = arith.andi %37, %38 : vector<1x2048xi32>
    %40 = arith.xori %35, %39 : vector<1x2048xi32>
    %c16_i32_11 = arith.constant 16 : i32
    %41 = vector.broadcast %c16_i32_11 : i32 to vector<1x2048xi32>
    %42 = arith.shrsi %40, %41 : vector<1x2048xi32>
    %c65535_i32_12 = arith.constant 65535 : i32
    %43 = vector.broadcast %c65535_i32_12 : i32 to vector<1x2048xi32>
    %44 = arith.andi %42, %43 : vector<1x2048xi32>
    %45 = arith.sitofp %44 : vector<1x2048xi32> to vector<1x2048xf32>
    %cst = arith.constant 1.000000e+00 : f32
    %46 = vector.broadcast %cst : f32 to vector<1x2048xf32>
    %47 = arith.addf %45, %46 : vector<1x2048xf32>
    %cst_13 = arith.constant 1.52587891E-5 : f32
    %48 = vector.broadcast %cst_13 : f32 to vector<1x2048xf32>
    %49 = arith.mulf %47, %48 : vector<1x2048xf32>
    %c65535_i32_14 = arith.constant 65535 : i32
    %50 = vector.broadcast %c65535_i32_14 : i32 to vector<1x2048xi32>
    %51 = arith.andi %40, %50 : vector<1x2048xi32>
    %52 = arith.sitofp %51 : vector<1x2048xi32> to vector<1x2048xf32>
    %cst_15 = arith.constant 1.52587891E-5 : f32
    %53 = vector.broadcast %cst_15 : f32 to vector<1x2048xf32>
    %54 = arith.mulf %52, %53 : vector<1x2048xf32>
    %55 = math.log %49 : vector<1x2048xf32>
    %cst_16 = arith.constant -2.000000e+00 : f32
    %56 = vector.broadcast %cst_16 : f32 to vector<1x2048xf32>
    %57 = arith.mulf %56, %55 : vector<1x2048xf32>
    %58 = math.sqrt %57 : vector<1x2048xf32>
    %cst_17 = arith.constant 6.28318548 : f32
    %59 = vector.broadcast %cst_17 : f32 to vector<1x2048xf32>
    %60 = arith.mulf %59, %54 : vector<1x2048xf32>
    %61 = math.cos %60 : vector<1x2048xf32>
    %62 = arith.mulf %58, %61 : vector<1x2048xf32>
    %cst_18 = arith.constant 1.000000e-01 : f32
    %63 = vector.broadcast %cst_18 : f32 to vector<1x2048xf32>
    %64 = arith.mulf %63, %62 : vector<1x2048xf32>
    %cst_19 = arith.constant 1.000000e+00 : f32
    %65 = vector.broadcast %cst_19 : f32 to vector<1x2048xf32>
    %66 = arith.addf %65, %64 : vector<1x2048xf32>
    %c0_20 = arith.constant 0 : index
    %c0_21 = arith.constant 0 : index
    %67 = vector.load %arg2[%c0_20, %c0_21] : memref<1x2048xf32, #tpu.memory_space<vmem>>, vector<1x2048xf32>
    %68 = arith.mulf %67, %66 : vector<1x2048xf32>
    %c0_22 = arith.constant 0 : index
    %c0_23 = arith.constant 0 : index
    %69 = vector.load %arg3[%c0_22, %c0_23] : memref<1x2048xf32, #tpu.memory_space<vmem>>, vector<1x2048xf32>
    tpu.vector_store %arg3[%c0_22, %c0_23], %68 {strides = array<i32>} : memref<1x2048xf32, #tpu.memory_space<vmem>>, vector<1x2048xf32>,
    return
  }
  func.func @transform_0(%arg0: i32) -> i32 {
    %c0_i32 = arith.constant 0 : i32
    %c0_i32_0 = arith.constant 0 : i32
    return %c0_i32 : i32
  }
  func.func @transform_1(%arg0: i32) -> (i32, i32) {
    %c0_i32 = arith.constant 0 : i32
    %c0_i32_0 = arith.constant 0 : i32
    return %arg0, %c0_i32 : i32, i32
  }
  func.func @transform_2(%arg0: i32) -> (i32, i32) {
    %c0_i32 = arith.constant 0 : i32
    %c0_i32_0 = arith.constant 0 : i32
    return %arg0, %c0_i32 : i32, i32
  }
}

</mosaic_0001>

<bundles_post_ra>
// kernel: tpu_custom_call.1
= control target key start
LH: loop header
LB: loop body
LE: loop exit
PB: predicated region body
PF: predicated region fallthrough
CT: control target
= control target key end

     0   :  { %8 = vsyncpa [#allocation4], 0  ;;  %s5234_s0 = inlined_call_operand.<no memory space> [shape: s32[1], index: 0, kind: input, shape index: {}]   ;;  %s5235_s1 = inlined_call_operand.hbm [shape: f32[1,2048], index: 1, kind: input, shape index: {}]   ;;  %s5236_s2 = inlined_call_operand.hbm [shape: f32[1,2048], index: 2, kind: output, shape index: {}]  }
   0x1   :  { %9 = vsyncpa [#allocation5], 0  ;;  %s2779_s9 = smov [#allocation3]  }
   0x2   :  { %s18_s10 = sshll.u32 %s2779_s9, 4  ;;  %s19_s10 = int_to_ptr.vmem [resolvable:$true] %s18_s10 }
   0x3   :  { %s2743_s11 = scalar_lea.vmem %s19_s10, 256  ;;  %p2748_p1 = scmp.lt.s32.totalorder %s19_s10, %s19_s10 }
   0x4   :  { %p2744_p0 = scmp.ne.s32.totalorder %s19_s10, %s2743_s11  ;;  %p2749_p2 = scmp.lt.s32.totalorder %s2743_s11, %s2743_s11 }
   0x6   :  { %p2750_p3 = por %p2749_p2, %p2748_p1 }
   0x8   :  { %p2751_p4 = pnand %p2750_p3, %p2744_p0 }
   0xa   :  { %2754 = shalt.err (!%p2751_p4)
}
   0xb   :  { %21 = dma.hbm_to_vmem [thread:$0]  %s5235_s1, 256, %s19_s10, [#allocation4]  }
   0xc   :  { %2775 = dma.done.wait [#allocation4], 256  }
   0xd   :  { %2776 = vsyncadd [#allocation4], 4294967040  ;;  %s26_s16 = sshra.s32 %s5234_s0, 16  ;;  %v38_v0 = vlaneseq }
   0xe   :  { %s27_s17 = sand.u32 65535, %s26_s16 }
   0xf   :  { %s28_s20 = sxor.u32 %s27_s17, %s5234_s0  ;;  %v2812_v1 = vshrl.u32 %v38_v0, 7  ;;  %v41_v3 = vand.u32 127, %v38_v0  ;;  %s2787_s0 = smov [#allocation6]  }
  0x10   :  { %s29_s21 = smul.u32 2146121005, %s28_s20  ;;  %s2397_s28 = sshll.u32 %s2787_s0, 4  ;;  %s2398_s28 = int_to_ptr.vmem [resolvable:$true] %s2397_s28 }
  0x11   :  { %5293 = vst [vmem:[#allocation9_spill] sm:$0xff] %v2812_v1  ;;  %v57_v2 = vmul.u32 2048, %v2812_v1  ;;  %v42_v7 = vadd.s32 128, %v41_v3  ;;  %v43_v8 = vadd.s32 256, %v41_v3  ;;  %v44_v9 = vadd.s32 384, %v41_v3  ;;  %s2755_s29 = scalar_lea.vmem %s2398_s28, 256  ;;  %p2760_p6 = scmp.lt.s32.totalorder %s2398_s28, %s2398_s28 }
  0x12   :  { %s30_s22 = sshra.s32 %s29_s21, 15  ;;  %v45_v10 = vadd.s32 512, %v41_v3  ;;  %v46_v11 = vadd.s32 640, %v41_v3  ;;  %v47_v12 = vadd.s32 768, %v41_v3  ;;  %v48_v14 = vadd.s32 896, %v41_v3  ;;  %p2756_p5 = scmp.ne.s32.totalorder %s2398_s28, %s2755_s29 }
  0x13   :  { %s31_s23 = sand.u32 131071, %s30_s22  ;;  %v60_v4 = vadd.s32 %v57_v2, %v41_v3  ;;  %v49_v15 = vadd.s32 1024, %v41_v3  ;;  %v61_v16 = vadd.s32 %v57_v2, %v42_v7  ;;  %v50_v17 = vadd.s32 1152, %v41_v3  ;;  %p2761_p7 = scmp.lt.s32.totalorder %s2755_s29, %s2755_s29 }
  0x14   :  { %s32_s24 = sxor.u32 %s31_s23, %s29_s21  ;;  %v51_v18 = vadd.s32 1280, %v41_v3  ;;  %v62_v19 = vadd.s32 %v57_v2, %v43_v8  ;;  %v63_v20 = vadd.s32 %v57_v2, %v44_v9  ;;  %v52_v21 = vadd.s32 1408, %v41_v3 }
  0x15   :  { %s33_s25 = smul.u32 2221713035, %s32_s24  ;;  %v53_v22 = vadd.s32 1536, %v41_v3  ;;  %v64_v23 = vadd.s32 %v57_v2, %v45_v10  ;;  %v65_v24 = vadd.s32 %v57_v2, %v46_v11  ;;  %v54_v25 = vadd.s32 1664, %v41_v3  ;;  %p2762_p8 = por %p2761_p7, %p2760_p6 }
  0x16   :  { %v55_v26 = vadd.s32 1792, %v41_v3  ;;  %v66_v27 = vadd.s32 %v57_v2, %v47_v12  ;;  %v56_v29 = vadd.s32 1920, %v41_v3  ;;  %v67_v30 = vadd.s32 %v57_v2, %v48_v14 }
  0x17   :  { %s34_s26 = sshra.s32 %s33_s25, 16  ;;  %v68_v31 = vadd.s32 %v57_v2, %v49_v15  ;;  %v69_v33 = vadd.s32 %v57_v2, %v50_v17  ;;  %v70_v34 = vadd.s32 %v57_v2, %v51_v18  ;;  %v71_v37 = vadd.s32 %v57_v2, %v52_v21  ;;  %p2763_p9 = pnand %p2762_p8, %p2756_p5 }
  0x18   :  { %s35_s1 = sand.u32 65535, %s34_s26  ;;  %v72_v38 = vadd.s32 %v57_v2, %v53_v22  ;;  %v73_v41 = vadd.s32 %v57_v2, %v54_v25  ;;  %v74_v42 = vadd.s32 %v57_v2, %v55_v26  ;;  %v75_v45 = vadd.s32 %v57_v2, %v56_v29 }
  0x19   :  { %s36_s27 = sxor.u32 %s35_s1, %s33_s25 }
  0x1a   :  { %v76_v5 = vstv %s36_s27 }
  0x1b   :  { %v77_v6 = vxor.u32 %v76_v5, %v60_v4  ;;  %v78_v32 = vxor.u32 %v76_v5, %v61_v16  ;;  %v79_v35 = vxor.u32 %v76_v5, %v62_v19  ;;  %v80_v36 = vxor.u32 %v76_v5, %v63_v20 }
  0x1c   :  { %v81_v39 = vxor.u32 %v76_v5, %v64_v23  ;;  %v82_v40 = vxor.u32 %v76_v5, %v65_v24  ;;  %v83_v43 = vxor.u32 %v76_v5, %v66_v27  ;;  %v84_v46 = vxor.u32 %v76_v5, %v67_v30 }
  0x1d   :  { %v2406_v13 = vshrl.u32 %v77_v6, 16  ;;  %v85_v47 = vxor.u32 %v76_v5, %v68_v31  ;;  %v2407_v48 = vshrl.u32 %v78_v32, 16  ;;  %v86_v49 = vxor.u32 %v76_v5, %v69_v33 }
  0x1e   :  { %v87_v50 = vxor.u32 %v76_v5, %v70_v34  ;;  %v2408_v51 = vshrl.u32 %v79_v35, 16  ;;  %v2409_v52 = vshrl.u32 %v80_v36, 16  ;;  %v88_v53 = vxor.u32 %v76_v5, %v71_v37 }
  0x1f   :  { %v125_v28 = vxor.u32 %v2406_v13, %v77_v6  ;;  %v89_v54 = vxor.u32 %v76_v5, %v72_v38  ;;  %v2410_v55 = vshrl.u32 %v81_v39, 16  ;;  %v2411_v56 = vshrl.u32 %v82_v40, 16 }
  0x20   :  { %v90_v57 = vxor.u32 %v76_v5, %v73_v41  ;;  %v91_v58 = vxor.u32 %v76_v5, %v74_v42  ;;  %v2412_v59 = vshrl.u32 %v83_v43, 16  ;;  %v92_v61 = vxor.u32 %v76_v5, %v75_v45 }
  0x21   :  { %v141_v44 = vmul.u32 2146121005, %v125_v28  ;;  %v2413_v62 = vshrl.u32 %v84_v46, 16  ;;  %v2414_v63 = vshrl.u32 %v85_v47, 16  ;;  %v126_v0 = vxor.u32 %v2407_v48, %v78_v32 }
  0x22   :  { %v2415_v2 = vshrl.u32 %v86_v49, 16  ;;  %v2416_v3 = vshrl.u32 %v87_v50, 16  ;;  %v127_v4 = vxor.u32 %v2408_v51, %v79_v35  ;;  %v128_v6 = vxor.u32 %v2409_v52, %v80_v36 }
  0x23   :  { %v2422_v60 = vshrl.u32 %v141_v44, 15  ;;  %v2417_v7 = vshrl.u32 %v88_v53, 16  ;;  %v2418_v8 = vshrl.u32 %v89_v54, 16  ;;  %v129_v9 = vxor.u32 %v2410_v55, %v81_v39 }
  0x24   :  { %v130_v10 = vxor.u32 %v2411_v56, %v82_v40  ;;  %v2419_v11 = vshrl.u32 %v90_v57, 16  ;;  %v2420_v12 = vshrl.u32 %v91_v58, 16  ;;  %v131_v13 = vxor.u32 %v2412_v59, %v83_v43 }
  0x25   :  { %v189_v14 = vxor.u32 %v2422_v60, %v141_v44  ;;  %v2421_v15 = vshrl.u32 %v92_v61, 16  ;;  %v132_v16 = vxor.u32 %v2413_v62, %v84_v46  ;;  %v133_v17 = vxor.u32 %v2414_v63, %v85_v47 }
  0x26   :  { %v142_v18 = vmul.u32 2146121005, %v126_v0  ;;  %v134_v5 = vxor.u32 %v2415_v2, %v86_v49  ;;  %v135_v19 = vxor.u32 %v2416_v3, %v87_v50  ;;  %v143_v20 = vmul.u32 2146121005, %v127_v4 }
  0x27   :  { %v144_v21 = vmul.u32 2146121005, %v128_v6  ;;  %v136_v22 = vxor.u32 %v2417_v7, %v88_v53  ;;  %v137_v23 = vxor.u32 %v2418_v8, %v89_v54  ;;  %v145_v24 = vmul.u32 2146121005, %v129_v9 }
  0x28   :  { %v146_v25 = vmul.u32 2146121005, %v130_v10  ;;  %v138_v26 = vxor.u32 %v2419_v11, %v90_v57  ;;  %v147_v27 = vmul.u32 2146121005, %v131_v13  ;;  %v139_v29 = vxor.u32 %v2420_v12, %v91_v58 }
  0x29   :  { %v205_v28 = vmul.u32 2221713035, %v189_v14  ;;  %v140_v30 = vxor.u32 %v2421_v15, %v92_v61  ;;  %v148_v31 = vmul.u32 2146121005, %v132_v16  ;;  %v2423_v35 = vshrl.u32 %v142_v18, 15 }
  0x2a   :  { %v149_v32 = vmul.u32 2146121005, %v133_v17  ;;  %v150_v33 = vmul.u32 2146121005, %v134_v5  ;;  %v2424_v38 = vshrl.u32 %v143_v20, 15  ;;  %v2425_v39 = vshrl.u32 %v144_v21, 15 }
  0x2b   :  { %v151_v34 = vmul.u32 2146121005, %v135_v19  ;;  %v152_v36 = vmul.u32 2146121005, %v136_v22  ;;  %v2426_v41 = vshrl.u32 %v145_v24, 15  ;;  %v2427_v42 = vshrl.u32 %v146_v25, 15 }
  0x2c   :  { %v153_v37 = vmul.u32 2146121005, %v137_v23  ;;  %v154_v40 = vmul.u32 2146121005, %v138_v26  ;;  %v2438_v43 = vshrl.u32 %v205_v28, 16  ;;  %v2428_v46 = vshrl.u32 %v147_v27, 15 }
  0x2d   :  { %v155_v44 = vmul.u32 2146121005, %v139_v29  ;;  %v156_v45 = vmul.u32 2146121005, %v140_v30  ;;  %v2429_v47 = vshrl.u32 %v148_v31, 15  ;;  %v2430_v48 = vshrl.u32 %v149_v32, 15 }
  0x2e   :  { %v2431_v49 = vshrl.u32 %v150_v33, 15  ;;  %v2432_v50 = vshrl.u32 %v151_v34, 15  ;;  %v190_v51 = vxor.u32 %v2423_v35, %v142_v18  ;;  %v2433_v52 = vshrl.u32 %v152_v36, 15 }
  0x2f   :  { %v2434_v53 = vshrl.u32 %v153_v37, 15  ;;  %v191_v54 = vxor.u32 %v2424_v38, %v143_v20  ;;  %v192_v55 = vxor.u32 %v2425_v39, %v144_v21  ;;  %v2435_v56 = vshrl.u32 %v154_v40, 15 }
  0x30   :  { %v193_v57 = vxor.u32 %v2426_v41, %v145_v24  ;;  %v194_v58 = vxor.u32 %v2427_v42, %v146_v25  ;;  %v2815_v59 = vxor.u32 %v2438_v43, %v205_v28  ;;  %v2436_v60 = vshrl.u32 %v155_v44, 15 }
  0x31   :  { %v2437_v61 = vshrl.u32 %v156_v45, 15  ;;  %v195_v62 = vxor.u32 %v2428_v46, %v147_v27  ;;  %v196_v63 = vxor.u32 %v2429_v47, %v148_v31  ;;  %v197_v0 = vxor.u32 %v2430_v48, %v149_v32 }
  0x32   :  { %v198_v2 = vxor.u32 %v2431_v49, %v150_v33  ;;  %v199_v3 = vxor.u32 %v2432_v50, %v151_v34  ;;  %v206_v4 = vmul.u32 2221713035, %v190_v51  ;;  %v200_v6 = vxor.u32 %v2433_v52, %v152_v36 }
  0x33   :  { %v201_v7 = vxor.u32 %v2434_v53, %v153_v37  ;;  %v207_v8 = vmul.u32 2221713035, %v191_v54  ;;  %v208_v9 = vmul.u32 2221713035, %v192_v55  ;;  %v202_v10 = vxor.u32 %v2435_v56, %v154_v40 }
  0x34   :  { %v209_v11 = vmul.u32 2221713035, %v193_v57  ;;  %v210_v12 = vmul.u32 2221713035, %v194_v58  ;;  %v349_v13 = vand.u32 65535, %v2815_v59  ;;  %v203_v14 = vxor.u32 %v2436_v60, %v155_v44 }
  0x35   :  { %v204_v15 = vxor.u32 %v2437_v61, %v156_v45  ;;  %v211_v16 = vmul.u32 2221713035, %v195_v62  ;;  %v212_v17 = vmul.u32 2221713035, %v196_v63  ;;  %v2439_v26 = vshrl.u32 %v206_v4, 16 }
  0x36   :  { %v213_v18 = vmul.u32 2221713035, %v197_v0  ;;  %v214_v5 = vmul.u32 2221713035, %v198_v2  ;;  %v365_v23 = vcvt.s32.f32 %v349_v13  ;;  %v2440_v27 = vshrl.u32 %v207_v8, 16 }
  0x37   :  { %v215_v19 = vmul.u32 2221713035, %v199_v3  ;;  %v216_v20 = vmul.u32 2221713035, %v200_v6  ;;  %v2441_v28 = vshrl.u32 %v208_v9, 16  ;;  %v2442_v29 = vshrl.u32 %v209_v11, 16 }
  0x38   :  { %v217_v21 = vmul.u32 2221713035, %v201_v7  ;;  %v218_v22 = vmul.u32 2221713035, %v202_v10  ;;  %v2443_v30 = vshrl.u32 %v210_v12, 16  ;;  %v2444_v31 = vshrl.u32 %v211_v16, 16 }
  0x39   :  { %v219_v24 = vmul.u32 2221713035, %v203_v14  ;;  %v220_v25 = vmul.u32 2221713035, %v204_v15  ;;  %v2445_v32 = vshrl.u32 %v212_v17, 16  ;;  %v2446_v33 = vshrl.u32 %v213_v18, 16 }
  0x3a   :  { %v2447_v34 = vshrl.u32 %v214_v5, 16  ;;  %v2448_v35 = vshrl.u32 %v215_v19, 16  ;;  %v2449_v36 = vshrl.u32 %v216_v20, 16  ;;  %v2450_v37 = vshrl.u32 %v217_v21, 16 }
  0x3b   :  { %v381_v38 = vmul.f32 1.5258789e-05, %v365_v23  ;;  %v2451_v39 = vshrl.u32 %v218_v22, 16  ;;  %v2452_v40 = vshrl.u32 %v219_v24, 16  ;;  %v2453_v41 = vshrl.u32 %v220_v25, 16 }
  0x3c   :  { %v2818_v42 = vxor.u32 %v2439_v26, %v206_v4  ;;  %v2820_v43 = vxor.u32 %v2440_v27, %v207_v8  ;;  %v2822_v44 = vxor.u32 %v2441_v28, %v208_v9  ;;  %v2824_v45 = vxor.u32 %v2442_v29, %v209_v11 }
  0x3d   :  { %v2826_v46 = vxor.u32 %v2443_v30, %v210_v12  ;;  %v2828_v47 = vxor.u32 %v2444_v31, %v211_v16  ;;  %v2830_v48 = vxor.u32 %v2445_v32, %v212_v17  ;;  %v2832_v49 = vxor.u32 %v2446_v33, %v213_v18 }
  0x3e   :  { %v2834_v50 = vxor.u32 %v2447_v34, %v214_v5  ;;  %v2836_v51 = vxor.u32 %v2448_v35, %v215_v19  ;;  %v2838_v52 = vxor.u32 %v2449_v36, %v216_v20  ;;  %v2840_v53 = vxor.u32 %v2450_v37, %v217_v21 }
  0x3f   :  { %v2842_v54 = vmul.f32 6.2831855, %v381_v38  ;;  %v2844_v55 = vxor.u32 %v2451_v39, %v218_v22  ;;  %v2846_v56 = vxor.u32 %v2452_v40, %v219_v24  ;;  %v2848_v57 = vxor.u32 %v2453_v41, %v220_v25 }
  0x40   :  { %v2454_v58 = vshrl.u32 %v2815_v59, 16  ;;  %v2455_v60 = vshrl.u32 %v2818_v42, 16  ;;  %v2456_v61 = vshrl.u32 %v2820_v43, 16  ;;  %v2457_v62 = vshrl.u32 %v2822_v44, 16 }
  0x41   :  { %v2458_v63 = vshrl.u32 %v2824_v45, 16  ;;  %v2459_v0 = vshrl.u32 %v2826_v46, 16  ;;  %v2460_v2 = vshrl.u32 %v2828_v47, 16  ;;  %v2461_v3 = vshrl.u32 %v2830_v48, 16 }
  0x42   :  { %v2462_v4 = vshrl.u32 %v2832_v49, 16  ;;  %v2463_v6 = vshrl.u32 %v2834_v50, 16  ;;  %v2464_v59 = vshrl.u32 %v2836_v51, 16  ;;  %v2465_v7 = vshrl.u32 %v2838_v52, 16 }
  0x43   :  { %v576_v8 = vand.u32 2139095040, %v2842_v54  ;;  %v2466_v9 = vshrl.u32 %v2840_v53, 16  ;;  %v2467_v10 = vshrl.u32 %v2844_v55, 16  ;;  %v2468_v11 = vshrl.u32 %v2846_v56, 16 }
  0x44   :  { %v2469_v12 = vshrl.u32 %v2848_v57, 16  ;;  %v301_v13 = vcvt.s32.f32 %v2454_v58  ;;  %v302_v14 = vcvt.s32.f32 %v2455_v60  ;;  %v303_v15 = vcvt.s32.f32 %v2456_v61 }
  0x45   :  { %v304_v16 = vcvt.s32.f32 %v2457_v62  ;;  %v305_v17 = vcvt.s32.f32 %v2458_v63  ;;  %v306_v18 = vcvt.s32.f32 %v2459_v0  ;;  %v307_v5 = vcvt.s32.f32 %v2460_v2 }
  0x46   :  { %v308_v19 = vcvt.s32.f32 %v2461_v3  ;;  %v309_v20 = vcvt.s32.f32 %v2462_v4  ;;  %v310_v21 = vcvt.s32.f32 %v2463_v6  ;;  %v311_v22 = vcvt.s32.f32 %v2464_v59 }
  0x47   :  { %v577_v23 = vshrl.u32 %v576_v8, 23  ;;  %v312_v24 = vcvt.s32.f32 %v2465_v7  ;;  %v313_v25 = vcvt.s32.f32 %v2466_v9  ;;  %v314_v26 = vcvt.s32.f32 %v2467_v10 }
  0x48   :  { %v315_v27 = vcvt.s32.f32 %v2468_v11  ;;  %v316_v28 = vcvt.s32.f32 %v2469_v12  ;;  %v317_v29 = vadd.f32 1.0, %v301_v13  ;;  %v318_v30 = vadd.f32 1.0, %v302_v14 }
  0x49   :  { %v319_v31 = vadd.f32 1.0, %v303_v15  ;;  %v320_v32 = vadd.f32 1.0, %v304_v16  ;;  %v321_v33 = vadd.f32 1.0, %v305_v17  ;;  %v322_v34 = vadd.f32 1.0, %v306_v18 }
  0x4a   :  { %v323_v35 = vadd.f32 1.0, %v307_v5  ;;  %v324_v36 = vadd.f32 1.0, %v308_v19  ;;  %v325_v37 = vadd.f32 1.0, %v309_v20  ;;  %v350_v38 = vand.u32 65535, %v2818_v42 }
  0x4b   :  { %v2470_v39 = vadd.s32 4294967169, %v577_v23  ;;  %v326_v40 = vadd.f32 1.0, %v310_v21  ;;  %v327_v41 = vadd.f32 1.0, %v311_v22  ;;  %v328_v58 = vadd.f32 1.0, %v312_v24 }
  0x4c   :  { %v329_v60 = vadd.f32 1.0, %v313_v25  ;;  %v330_v61 = vadd.f32 1.0, %v314_v26  ;;  %v331_v62 = vadd.f32 1.0, %v315_v27  ;;  %v332_v63 = vadd.f32 1.0, %v316_v28 }
  0x4d   :  { %v333_v0 = vmul.f32 1.5258789e-05, %v317_v29  ;;  %v334_v2 = vmul.f32 1.5258789e-05, %v318_v30  ;;  %v2868_v3 = vmul.f32 1.5258789e-05, %v319_v31  ;;  %v2870_v4 = vmul.f32 1.5258789e-05, %v320_v32 }
  0x4e   :  { %v2872_v6 = vmul.f32 1.5258789e-05, %v321_v33  ;;  %v2874_v59 = vmul.f32 1.5258789e-05, %v322_v34  ;;  %v2876_v7 = vmul.f32 1.5258789e-05, %v323_v35  ;;  %v366_v42 = vcvt.s32.f32 %v350_v38 }
  0x4f   :  { %v583_v8 = vadd.s32 1, %v2470_v39  ;;  %v2878_v9 = vmul.f32 1.5258789e-05, %v324_v36  ;;  %v2880_v10 = vmul.f32 1.5258789e-05, %v325_v37  ;;  %v2882_v11 = vmul.f32 1.5258789e-05, %v326_v40 }
  0x50   :  { %v2884_v12 = vmul.f32 1.5258789e-05, %v327_v41  ;;  %v2886_v13 = vmul.f32 1.5258789e-05, %v328_v58  ;;  %v2888_v14 = vmul.f32 1.5258789e-05, %v329_v60  ;;  %v2890_v15 = vmul.f32 1.5258789e-05, %v330_v61 }
  0x51   :  { %v2892_v16 = vmul.f32 1.5258789e-05, %v331_v62  ;;  %v2894_v17 = vmul.f32 1.5258789e-05, %v332_v63  ;;  %v351_v18 = vand.u32 65535, %v2820_v43  ;;  %v352_v5 = vand.u32 65535, %v2822_v44 }
  0x52   :  { %v353_v19 = vand.u32 65535, %v2824_v45  ;;  %v354_v20 = vand.u32 65535, %v2826_v46  ;;  %v355_v21 = vand.u32 65535, %v2828_v47  ;;  %v382_v22 = vmul.f32 1.5258789e-05, %v366_v42 }
  0x53   :  { %vm584_vm0 = vcmp.gt.s32.totalorder %v583_v8, 0  ;;  %v356_v23 = vand.u32 65535, %v2830_v48  ;;  %v357_v24 = vand.u32 65535, %v2832_v49  ;;  %v358_v25 = vand.u32 65535, %v2834_v50 }
  0x54   :  { %v359_v26 = vand.u32 65535, %v2836_v51  ;;  %v360_v43 = vand.u32 65535, %v2838_v52  ;;  %v361_v44 = vand.u32 65535, %v2840_v53  ;;  %v362_v45 = vand.u32 65535, %v2844_v55 }
  0x55   :  { %v363_v46 = vand.u32 65535, %v2846_v56  ;;  %v364_v47 = vand.u32 65535, %v2848_v57  ;;  %v367_v27 = vcvt.s32.f32 %v351_v18  ;;  %v368_v28 = vcvt.s32.f32 %v352_v5 }
  0x56   :  { %v585_v29 = vsel %vm584_vm0, %v583_v8, 0  ;;  %v369_v48 = vcvt.s32.f32 %v353_v19  ;;  %v370_v30 = vcvt.s32.f32 %v354_v20  ;;  %v371_v49 = vcvt.s32.f32 %v355_v21 }
  0x57   :  { %v2910_v31 = vmul.f32 6.2831855, %v382_v22  ;;  %v372_v50 = vcvt.s32.f32 %v356_v23  ;;  %v373_v51 = vcvt.s32.f32 %v357_v24  ;;  %v374_v32 = vcvt.s32.f32 %v358_v25 }
  0x58   :  { %v375_v52 = vcvt.s32.f32 %v359_v26  ;;  %v376_v33 = vcvt.s32.f32 %v360_v43  ;;  %v377_v53 = vcvt.s32.f32 %v361_v44  ;;  %v378_v34 = vcvt.s32.f32 %v362_v45 }
  0x59   :  { %5294 = vst [vmem:[#allocation10_spill] sm:$0xff] %v2910_v31  ;;  %v587_v55 = vand.u32 31, %v585_v29  ;;  %v379_v35 = vcvt.s32.f32 %v363_v46  ;;  %v380_v56 = vcvt.s32.f32 %v364_v47  ;;  %v383_v36 = vmul.f32 1.5258789e-05, %v367_v27 }
  0x5a   :  { %v384_v57 = vmul.f32 1.5258789e-05, %v368_v28  ;;  %v385_v37 = vmul.f32 1.5258789e-05, %v369_v48  ;;  %v386_v38 = vmul.f32 1.5258789e-05, %v370_v30  ;;  %v387_v39 = vmul.f32 1.5258789e-05, %v371_v49 }
  0x5b   :  { %v679_v40 = vand.u32 2139095040, %v2910_v31  ;;  %v388_v41 = vmul.f32 1.5258789e-05, %v372_v50  ;;  %v389_v58 = vmul.f32 1.5258789e-05, %v373_v51  ;;  %v390_v60 = vmul.f32 1.5258789e-05, %v374_v32 }
  0x5c   :  { %2607 = vlog2.f32 %v333_v0  ;;  %v391_v61 = vmul.f32 1.5258789e-05, %v375_v52  ;;  %v392_v62 = vmul.f32 1.5258789e-05, %v376_v33  ;;  %v2913_v63 = vsub.s32 32, %v587_v55 }
  0x5d   :  { %2609 = vlog2.f32 %v334_v2  ;;  %v393_v42 = vmul.f32 1.5258789e-05, %v377_v53  ;;  %v394_v8 = vmul.f32 1.5258789e-05, %v378_v34  ;;  %v395_v18 = vmul.f32 1.5258789e-05, %v379_v35 }
  0x5e   :  { %2611 = vlog2.f32 %v2868_v3  ;;  %v2916_v5 = vmul.f32 1.5258789e-05, %v380_v56  ;;  %v2919_v19 = vmul.f32 6.2831855, %v383_v36  ;;  %v680_v20 = vshrl.u32 %v679_v40, 23 }
  0x5f   :  { %2613 = vlog2.f32 %v2870_v4  ;;  %v2922_v0 = vmul.f32 6.2831855, %v384_v57  ;;  %v2924_v21 = vmul.f32 6.2831855, %v385_v37  ;;  %v2926_v2 = vmul.f32 6.2831855, %v386_v38 }
  0x60   :  { %5295 = vst [vmem:[#allocation11_spill] sm:$0xff] %v2919_v19  ;;  %2615 = vlog2.f32 %v2872_v6  ;;  %v2929_v22 = vmul.f32 6.2831855, %v387_v39  ;;  %v5246_v3 = vmov 2102212464   ;;  %v2935_v6 = vshrl.u32 %v585_v29, 5 }
  0x61   :  { %5296 = vst [vmem:[#allocation12_spill] sm:$0xff] %v2926_v2  ;;  %2617 = vlog2.f32 %v2874_v59  ;;  %v599_v23 = vshll.u32 %v5246_v3, %v587_v55  ;;  %v5244_v24 = vmov 920167782   ;;  %v5239_v25 = vand.u32 2147483647, %v2842_v54 }
  0x62   :  { %v600_v4 = vshrl.u32 %v5244_v24, %v2913_v63  ;;  %v602_v26 = vshll.u32 %v5244_v24, %v587_v55  ;;  %v5242_v43 = vmov 1326507024   ;;  %v5257_v59 = vmov 683565275  }
  0x63   :  { %v603_v44 = vshrl.u32 %v5242_v43, %v2913_v63  ;;  %v590_v45 = vshll.u32 %v5257_v59, %v587_v55  ;;  %v5249_v46 = vmov 2475754826   ;;  %v5238_v27 = vand.u32 2147483647, %v2910_v31 }
  0x64   :  { %v593_v47 = vshll.u32 %v5249_v46, %v587_v55  ;;  %v2474_v28 = vadd.s32 4294967169, %v680_v20  ;;  %v591_v48 = vshrl.u32 %v5249_v46, %v2913_v63  ;;  %v5240_v29 = vmov 2131351028  }
  0x65   :  { %v594_v30 = vshrl.u32 %v5240_v29, %v2913_v63  ;;  %v596_v49 = vshll.u32 %v5240_v29, %v587_v55  ;;  %v597_v50 = vshrl.u32 %v5246_v3, %v2913_v63  ;;  %2619 = vlog2.f32 %v2876_v7 }
  0x66   :  { %v2951_v51 = vmul.f32 6.2831855, %v388_v41  ;;  %v2953_v32 = vmul.f32 6.2831855, %v389_v58  ;;  %v601_v52 = vor.u32 %v600_v4, %v599_v23  ;;  %v2955_v33 = vmul.f32 6.2831855, %v390_v60 }
  0x67   :  { %v580_v53 = vand.u32 8388607, %v5239_v25  ;;  %v604_v34 = vor.u32 %v603_v44, %v602_v26  ;;  %vm608_vm1 = vcmp.lt.s32.totalorder %v2935_v6, 4  ;;  %2621 = vlog2.f32 %v2878_v9 }
  0x68   :  { %5297 = vst [vmem:[#allocation13_spill] sm:$0xff] %v2951_v51  ;;  %5298 = vst [vmem:[#allocation14_spill] sm:$0xff] %v2953_v32  ;;  %v2961_v55 = vmul.f32 6.2831855, %v391_v61  ;;  %v683_v7 = vand.u32 8388607, %v5238_v27  ;;  %2623 = vlog2.f32 %v2880_v10  ;;  %v2966_v56 = vor.u32 %v591_v48, %v590_v45 }
  0x69   :  { %5299 = vst [vmem:[#allocation15_spill] sm:$0xff] %v2955_v33  ;;  %v686_v35 = vadd.s32 1, %v2474_v28  ;;  %v2968_v36 = vor.u32 %v594_v30, %v593_v47  ;;  %v598_v57 = vor.u32 %v597_v50, %v596_v49  ;;  %v2608_v37 = vpop.eup %2607  ;;  %v2970_v38 = vmul.f32 6.2831855, %v392_v62 }
  0x6a   :  { %5300 = vst [vmem:[#allocation16_spill] sm:$0xff] %v2961_v55  ;;  %vm605_vm2 = vcmp.lt.s32.totalorder %v2935_v6, 1  ;;  %vm607_vm3 = vcmp.lt.s32.totalorder %v2935_v6, 3  ;;  %v614_v9 = vsel %vm608_vm1, %v601_v52, 920167782  ;;  %v2610_v39 = vpop.eup %2609  ;;  %2625 = vlog2.f32 %v2882_v11 }
  0x6b   :  { %5301 = vst [vmem:[#allocation17_spill] sm:$0xff] %v2970_v38  ;;  %v2977_v40 = vmul.f32 6.2831855, %v393_v42  ;;  %v581_v10 = vor.u32 8388608, %v580_v53  ;;  %v618_v41 = vsel %vm608_vm1, %v604_v34, 1326507024  ;;  %v2612_v58 = vpop.eup %2611  ;;  %v613_v11 = vsel %vm605_vm2, %v2966_v56, %v2968_v36 }
  0x6c   :  { %v2981_v60 = vmul.f32 6.2831855, %v394_v8  ;;  %v2983_v61 = vmul.f32 6.2831855, %v395_v18  ;;  %v684_v62 = vor.u32 8388608, %v683_v7  ;;  %vm687_vm4 = vcmp.gt.s32.totalorder %v686_v35, 0  ;;  %v2614_v20 = vpop.eup %2613 }
  0x6d   :  { %5302 = vst [vmem:[#allocation18_spill] sm:$0xff] %v2977_v40  ;;  %vm606_vm5 = vcmp.lt.s32.totalorder %v2935_v6, 2  ;;  %v615_v42 = vsel %vm607_vm3, %v598_v57, %v614_v9  ;;  %v782_v23 = vand.u32 2139095040, %v2919_v19  ;;  %v2616_v4 = vpop.eup %2615  ;;  %v398_v8 = vmul.f32 0.6931472, %v2608_v37 }
  0x6e   :  { %5303 = vst [vmem:[#allocation19_spill] sm:$0xff] %v2981_v60  ;;  %5304 = vst [vmem:[#allocation20_spill] sm:$0xff] %v2983_v61  ;;  %2627 = vlog2.f32 %v2884_v12  ;;  %v617_v18 = vsel %vm605_vm2, %v2968_v36, %v598_v57  ;;  %v619_v26 = vsel %vm607_vm3, %v601_v52, %v618_v41  ;;  %v2618_v44 = vpop.eup %2617  ;;  %v3001_v45 = vmul.f32 6.2831855, %v2916_v5 }
  0x6f   :  { %2629 = vlog2.f32 %v2886_v13  ;;  %v3003_v47 = vshll.u32 %v581_v10, 8  ;;  %v688_v28 = vsel %vm687_vm4, %v686_v35, 0  ;;  %v400_v48 = vmul.f32 0.6931472, %v2610_v39 }
  0x70   :  { %5305 = vst [vmem:[#allocation21_spill] sm:$0xff] %v3001_v45  ;;  %2631 = vlog2.f32 %v2888_v14  ;;  %v616_v12 = vsel %vm606_vm5, %v613_v11, %v615_v42  ;;  %v5237_v30 = vand.u32 2147483647, %v2919_v19  ;;  %v620_v49 = vsel %vm606_vm5, %v617_v18, %v619_v26 }
  0x71   :  { %2633 = vlog2.f32 %v2890_v15  ;;  %v3012_v13 = vshll.u32 %v684_v62, 8  ;;  %v783_v5 = vshrl.u32 %v782_v23, 23  ;;  %v402_v50 = vmul.f32 0.6931472, %v2612_v58 }
  0x72   :  { %2635 = vlog2.f32 %v2892_v16  ;;  %v3015_v52 = vmul.f32 -2.0, %v398_v8  ;;  %v690_v53 = vand.u32 31, %v688_v28  ;;  %v2620_v14 = vpop.eup %2619  ;;  %v404_v34 = vmul.f32 0.6931472, %v2614_v20 }
  0x73   :  { %v406_v7 = vmul.f32 0.6931472, %v2616_v4  ;;  %v3018_v35 = vmul.u32.u64.low %v3003_v47, %v616_v12  ;;  %v3019_v37 = vmul.u32.u64.high %v3003_v47, %v616_v12, %v3018_v35  ;;  %v3022_v15 = vmul.f32 -2.0, %v400_v48 }
  0x74   :  { %v589_v9 = vshrl.u32 %v5257_v59, %v2913_v63  ;;  %v3027_v39 = vmul.u32.u64.low %v3003_v47, %v620_v49  ;;  %v3028_v10 = vmul.u32.u64.high %v3003_v47, %v620_v49, %v3027_v39  ;;  %v2622_v16 = vpop.eup %2621  ;;  %v408_v41 = vmul.f32 0.6931472, %v2618_v44 }
  0x75   :  { %2637 = vlog2.f32 %v2894_v17  ;;  %v610_v58 = vsel %vm608_vm1, %v598_v57, 2102212464  ;;  %v2478_v62 = vadd.s32 4294967169, %v783_v5  ;;  %v2624_v20 = vpop.eup %2623  ;;  %v410_v11 = vmul.f32 0.6931472, %v2620_v14 }
  0x76   :  { %v3033_v42 = vmul.f32 -2.0, %v402_v50  ;;  %v3035_v23 = vsub.s32 32, %v690_v53  ;;  %v3039_v63 = vand.u32 8388607, %v5237_v30  ;;  %v3041_v4 = vmul.f32 -2.0, %v404_v34 }
  0x77   :  { %v3043_v8 = vmul.f32 -2.0, %v406_v7  ;;  %2639 = vrsqrt.f32 %v3015_v52  ;;  %v2626_v57 = vpop.eup %2625  ;;  %v412_v18 = vmul.f32 0.6931472, %v2622_v16  ;;  %v609_v26 = vsel %vm605_vm2, %v589_v9, %v2966_v56 }
  0x78   :  { %2641 = vrsqrt.f32 %v3022_v15  ;;  %v611_v44 = vsel %vm607_vm3, %v2968_v36, %v610_v58  ;;  %v414_v48 = vmul.f32 0.6931472, %v2624_v20  ;;  %v3054_v12 = vmul.f32 -2.0, %v408_v41 }
  0x79   :  { %v789_v5 = vadd.s32 1, %v2478_v62  ;;  %v3057_v50 = vmul.f32 -2.0, %v410_v11  ;;  %2643 = vrsqrt.f32 %v3033_v42  ;;  %v705_v14 = vshll.u32 %v5244_v24, %v690_v53 }
  0x7a   :  { %v706_v34 = vshrl.u32 %v5242_v43, %v3035_v23  ;;  %v416_v7 = vmul.f32 0.6931472, %v2626_v57  ;;  %v612_v36 = vsel %vm606_vm5, %v609_v26, %v611_v44  ;;  %v631_v9 = vadd.s32 1, %v3019_v37 }
  0x7b   :  { %v2628_v56 = vpop.eup %2627  ;;  %v3066_v39 = vshrl.u32 %v688_v28, 5  ;;  %vm630_vm6 = vc.u32 %v3028_v10, %v3018_v35  ;;  %v696_v41 = vshll.u32 %v5249_v46, %v690_v53  ;;  %v702_v58 = vshll.u32 %v5246_v3, %v690_v53 }
  0x7c   :  { %v2630_v16 = vpop.eup %2629  ;;  %v703_v62 = vshrl.u32 %v5244_v24, %v3035_v23  ;;  %v697_v6 = vshrl.u32 %v5240_v29, %v3035_v23  ;;  %v699_v11 = vshll.u32 %v5240_v29, %v690_v53  ;;  %v700_v28 = vshrl.u32 %v5246_v3, %v3035_v23 }
  0x7d   :  { %v2632_v20 = vpop.eup %2631  ;;  %vm790_vm7 = vcmp.gt.s32.totalorder %v789_v5, 0  ;;  %v3079_v26 = vmul.f32 -2.0, %v412_v18  ;;  %v628_v30 = vmul.u32 %v3003_v47, %v612_v36  ;;  %v707_v27 = vor.u32 %v706_v34, %v705_v14 }
  0x7e   :  { %v2634_v57 = vpop.eup %2633  ;;  %v632_v49 = vsel %vm630_vm6, %v631_v9, %v3019_v37  ;;  %v693_v17 = vshll.u32 %v5257_v59, %v690_v53  ;;  %v694_v29 = vshrl.u32 %v5249_v46, %v3035_v23  ;;  %vm711_vm8 = vcmp.lt.s32.totalorder %v3066_v39, 4 }
  0x7f   :  { %v2636_v25 = vpop.eup %2635  ;;  %v418_v43 = vmul.f32 0.6931472, %v2628_v56  ;;  %v3088_v24 = vmul.f32 -2.0, %v414_v48  ;;  %v704_v18 = vor.u32 %v703_v62, %v702_v58  ;;  %v791_v3 = vsel %vm790_vm7, %v789_v5, 0 }
  0x80   :  { %v420_v1 = vmul.f32 0.6931472, %v2630_v16  ;;  %v3090_v44 = vmul.f32 -2.0, %v416_v7  ;;  %v3092_v47 = vor.u32 %v697_v6, %v696_v41  ;;  %v701_v14 = vor.u32 %v700_v28, %v699_v11 }
  0x81   :  { %v3094_v37 = vadd.s32 %v632_v49, %v628_v30  ;;  %vm708_vm9 = vcmp.lt.s32.totalorder %v3066_v39, 1  ;;  %vm710_vm10 = vcmp.lt.s32.totalorder %v3066_v39, 3  ;;  %v721_v53 = vsel %vm711_vm8, %v707_v27, 1326507024 }
  0x82   :  { %v2638_v34 = vpop.eup %2637  ;;  %v422_v48 = vmul.f32 0.6931472, %v2632_v20  ;;  %v3101_v5 = vor.u32 %v694_v29, %v693_v17  ;;  %v793_v7 = vand.u32 31, %v791_v3  ;;  %v424_v9 = vmul.f32 0.6931472, %v2634_v57 }
  0x83   :  { %v426_v16 = vmul.f32 0.6931472, %v2636_v25  ;;  %2645 = vrsqrt.f32 %v3041_v4  ;;  %v717_v30 = vsel %vm711_vm8, %v704_v18, 920167782  ;;  %v428_v41 = vmul.f32 0.6931472, %v2638_v34 }
  0x84   :  { %v2640_v36 = vpop.eup %2639  ;;  %vm709_vm11 = vcmp.lt.s32.totalorder %v3066_v39, 2  ;;  %v720_v27 = vsel %vm708_vm9, %v3092_v47, %v701_v14  ;;  %v722_v29 = vsel %vm710_vm10, %v704_v18, %v721_v53  ;;  %v3114_v17 = vmul.f32 -2.0, %v418_v43 }
  0x85   :  { %v3106_v49 = vpop.eup %2641  ;;  %v3116_v25 = vmul.f32 -2.0, %v420_v1  ;;  %2647 = vrsqrt.f32 %v3043_v8  ;;  %v634_v58 = vadd.s32 536870912, %v3094_v37  ;;  %v716_v6 = vsel %vm708_vm9, %v3101_v5, %v3092_v47 }
  0x86   :  { %v3120_v62 = vpop.eup %2643  ;;  %v718_v11 = vsel %vm710_vm10, %v701_v14, %v717_v30  ;;  %v3129_v43 = vsub.s32 32, %v793_v7  ;;  %v3131_v1 = vmul.f32 -2.0, %v422_v48  ;;  %v3133_v28 = vmul.f32 -2.0, %v424_v9 }
  0x87   :  { %2649 = vrsqrt.f32 %v3054_v12  ;;  %v723_v57 = vsel %vm709_vm11, %v720_v27, %v722_v29  ;;  %v3138_v18 = vmul.f32 -2.0, %v426_v16  ;;  %v3140_v34 = vmul.f32 -2.0, %v428_v41 }
  0x88   :  { %5306 = vst [vmem:[#allocation22_spill] sm:$0xff] %v3131_v1  ;;  %5307 = vst [vmem:[#allocation23_spill] sm:$0xff] %v3133_v28  ;;  %2651 = vrsqrt.f32 %v3057_v50  ;;  %vm447_vm12 = vcmp.eq.f32.partialorder %v3015_v52, inf  ;;  %v3146_v30 = vshrl.u32 %v634_v58, 30  ;;  %v692_v9 = vshrl.u32 %v5257_v59, %v3035_v23 }
  0x89   :  { %5308 = vst [vmem:[#allocation24_spill] sm:$0xff] %v3138_v18  ;;  %5309 = vst [vmem:[#allocation25_spill] sm:$0xff] %v3140_v34  ;;  %v719_v27 = vsel %vm709_vm11, %v716_v6, %v718_v11  ;;  %v3153_v16 = vmul.u32.u64.low %v3012_v13, %v723_v57  ;;  %v3154_v41 = vmul.u32.u64.high %v3012_v13, %v723_v57, %v3153_v16  ;;  %v5311_v29 = vmov 2102212464  }
  0x8a   :  { %5310 = vst [vmem:[#allocation26_spill] sm:$0xff] %v3146_v30  ;;  %v805_v53 = vshll.u32 %v5311_v29, %v793_v7  ;;  %v5312_v20 = vmov 920167782   ;;  %v3159_v46 = vshrl.u32 %v791_v3, 5  ;;  %v5313_v48 = vmov 1326507024  }
  0x8b   :  { %v806_v56 = vshrl.u32 %v5312_v20, %v3129_v43  ;;  %v808_v58 = vshll.u32 %v5312_v20, %v793_v7  ;;  %v809_v45 = vshrl.u32 %v5313_v48, %v3129_v43  ;;  %v885_v23 = vand.u32 2139095040, %v2922_v0 }
  0x8c   :  { %vm454_vm13 = vcmp.eq.f32.partialorder %v3022_v15, inf  ;;  %v3167_v6 = vmul.u32.u64.low %v3012_v13, %v719_v27  ;;  %v3168_v11 = vmul.u32.u64.high %v3012_v13, %v719_v27, %v3167_v6  ;;  %v796_v57 = vshll.u32 %v5257_v59, %v793_v7 }
  0x8d   :  { %v5314_v16 = vmov 2475754826   ;;  %v5315_v60 = vmov 2131351028   ;;  %v803_v55 = vshrl.u32 %v5311_v29, %v3129_v43  ;;  %vm449_vm14 = vcmp.eq.f32.partialorder %v3015_v52, 0.0 }
  0x8e   :  { %v799_v61 = vshll.u32 %v5314_v16, %v793_v7  ;;  %v797_v3 = vshrl.u32 %v5314_v16, %v3129_v43  ;;  %v800_v40 = vshrl.u32 %v5315_v60, %v3129_v43  ;;  %v802_v38 = vshll.u32 %v5315_v60, %v793_v7 }
  0x8f   :  { %2653 = vrsqrt.f32 %v3079_v26  ;;  %v636_v27 = vshll.u32 %v3146_v30, 30  ;;  %v713_v59 = vsel %vm711_vm8, %v701_v14, 2102212464  ;;  %v807_v33 = vor.u32 %v806_v56, %v805_v53 }
  0x90   :  { %v446_v32 = vmul.f32 %v2640_v36, %v3015_v52  ;;  %vm456_vm15 = vcmp.eq.f32.partialorder %v3022_v15, 0.0  ;;  %vm461_vm0 = vcmp.eq.f32.partialorder %v3033_v42, inf  ;;  %v810_v7 = vor.u32 %v809_v45, %v808_v58  ;;  %v2646_v51 = vpop.eup %2645 }
  0x91   :  { %vm814_vm1 = vcmp.lt.s32.totalorder %v3159_v46, 4  ;;  %v886_v19 = vshrl.u32 %v885_v23, 23  ;;  %v499_v31 = vand.u32 2147483648, %v3079_v26  ;;  %2655 = vrsqrt.f32 %v3088_v24 }
  0x92   :  { %v712_v14 = vsel %vm708_vm9, %v692_v9, %v3101_v5  ;;  %v714_v56 = vsel %vm710_vm10, %v3092_v47, %v713_v59  ;;  %v3198_v36 = vor.u32 %v797_v3, %v796_v57  ;;  %v3200_v45 = vor.u32 %v800_v40, %v799_v61  ;;  %v3204_v58 = vpop.eup %2647 }
  0x93   :  { %v3202_v53 = vor.u32 %v803_v55, %v802_v38  ;;  %vm468_vm2 = vcmp.eq.f32.partialorder %v3041_v4, inf  ;;  %v3208_v23 = vsub.s32 %v3094_v37, %v636_v27  ;;  %vm811_vm3 = vcmp.lt.s32.totalorder %v3159_v46, 1 }
  0x94   :  { %vm813_vm4 = vcmp.lt.s32.totalorder %v3159_v46, 3  ;;  %v820_v59 = vsel %vm814_vm1, %v807_v33, 920167782  ;;  %v453_v40 = vmul.f32 %v3106_v49, %v3022_v15  ;;  %v787_v55 = vor.u32 8388608, %v3039_v63  ;;  %v2650_v47 = vpop.eup %2649 }
  0x95   :  { %v824_v38 = vsel %vm814_vm1, %v810_v7, 1326507024  ;;  %v2482_v61 = vadd.s32 4294967169, %v886_v19  ;;  %v448_v37 = vsel %vm447_vm12, %v3015_v52, %v446_v32  ;;  %vm463_vm5 = vcmp.eq.f32.partialorder %v3033_v42, 0.0  ;;  %v2652_v9 = vpop.eup %2651 }
  0x96   :  { %2657 = vrsqrt.f32 %v3090_v44  ;;  %v715_v5 = vsel %vm709_vm11, %v712_v14, %v714_v56  ;;  %v734_v49 = vadd.s32 1, %v3168_v11  ;;  %vm733_vm6 = vc.u32 %v3154_v41, %v3167_v6 }
  0x97   :  { %vm812_vm7 = vcmp.lt.s32.totalorder %v3159_v46, 2  ;;  %v819_v19 = vsel %vm811_vm3, %v3198_v36, %v3200_v45  ;;  %v821_v32 = vsel %vm813_vm4, %v3202_v53, %v820_v59  ;;  %v460_v63 = vmul.f32 %v3120_v62, %v3033_v42 }
  0x98   :  { %vm470_vm8 = vcmp.eq.f32.partialorder %v3041_v4, 0.0  ;;  %v639_v39 = vsub.s32 0, %v3208_v23  ;;  %v823_v57 = vsel %vm811_vm3, %v3200_v45, %v3202_v53  ;;  %v825_v3 = vsel %vm813_vm4, %v807_v33, %v824_v38 }
  0x99   :  { %v455_v27 = vsel %vm454_vm13, %v3022_v15, %v453_v40  ;;  %vm475_vm9 = vcmp.eq.f32.partialorder %v3043_v8, inf  ;;  %vm482_vm10 = vcmp.eq.f32.partialorder %v3054_v12, inf  ;;  %vm489_vm11 = vcmp.eq.f32.partialorder %v3057_v50, inf }
  0x9a   :  { %v731_v62 = vmul.u32 %v3012_v13, %v715_v5  ;;  %v3254_v7 = vshll.u32 %v787_v55, 8  ;;  %v892_v14 = vadd.s32 1, %v2482_v61  ;;  %2659 = vrsqrt.f32 %v3114_v17 }
  0x9b   :  { %v735_v33 = vsel %vm733_vm6, %v734_v49, %v3168_v11  ;;  %v822_v56 = vsel %vm812_vm7, %v819_v19, %v821_v32  ;;  %v988_v59 = vand.u32 2139095040, %v2924_v21  ;;  %v5316_v40 = vand.u32 2147483648, %v3015_v52 }
  0x9c   :  { %v467_v55 = vmul.f32 %v2646_v51, %v3041_v4  ;;  %v826_v61 = vsel %vm812_vm7, %v823_v57, %v825_v3  ;;  %v5318_v11 = vand.u32 2147483648, %v3022_v15  ;;  %v462_v49 = vsel %vm461_vm0, %v3033_v42, %v460_v63 }
  0x9d   :  { %v3268_v13 = vsel %vm449_vm14, %v5316_v40, %v448_v37  ;;  %vm477_vm12 = vcmp.eq.f32.partialorder %v3043_v8, 0.0  ;;  %v2471_v51 = vmin.u32 %v639_v39, %v3208_v23  ;;  %v2654_v37 = vpop.eup %2653  ;;  %vm484_vm13 = vcmp.eq.f32.partialorder %v3054_v12, 0.0 }
  0x9e   :  { %5317 = vst [vmem:[#allocation27_spill] sm:$0xff] %v3268_v13  ;;  %v3278_v5 = vsel %vm456_vm15, %v5318_v11, %v455_v27  ;;  %vm491_vm14 = vcmp.eq.f32.partialorder %v3057_v50, 0.0  ;;  %v3289_v15 = vadd.s32 %v735_v33, %v731_v62  ;;  %vm893_vm15 = vcmp.gt.s32.totalorder %v892_v14, 0  ;;  %v2656_v40 = vpop.eup %2655 }
  0x9f   :  { %5319 = vst [vmem:[#allocation28_spill] sm:$0xff] %v3278_v5  ;;  %v3292_v19 = vmul.u32.u64.low %v3254_v7, %v822_v56  ;;  %v3293_v32 = vmul.u32.u64.high %v3254_v7, %v822_v56, %v3292_v19  ;;  %v5320_v63 = vmov 683565275   ;;  %v989_v27 = vshrl.u32 %v988_v59, 23 }
  0xa0   :  { %v795_v57 = vshrl.u32 %v5320_v63, %v3129_v43  ;;  %v3299_v39 = vmul.u32.u64.low %v3254_v7, %v826_v61  ;;  %v3300_v3 = vmul.u32.u64.high %v3254_v7, %v826_v61, %v3299_v39  ;;  %v469_v62 = vsel %vm468_vm2, %v3041_v4, %v467_v55 }
  0xa1   :  { %vm503_vm0 = vcmp.eq.f32.partialorder %v3088_v24, inf  ;;  %vm510_vm6 = vcmp.eq.f32.partialorder %v3090_v44, inf  ;;  %2661 = vrsqrt.f32 %v3116_v25  ;;  %v816_v43 = vsel %vm814_vm1, %v3202_v53, 2102212464 }
  0xa2   :  { %v474_v56 = vmul.f32 %v3204_v58, %v3043_v8  ;;  %v481_v59 = vmul.f32 %v2650_v47, %v3054_v12  ;;  %v488_v61 = vmul.f32 %v2652_v9, %v3057_v50  ;;  %v894_v55 = vsel %vm893_vm15, %v892_v14, 0 }
  0xa3   :  { %v5321_v11 = vand.u32 2147483648, %v3033_v42  ;;  %2663 = vrsqrt.f32 %v3131_v1  ;;  %v641_v33 = vclz %v2471_v51  ;;  %v737_v52 = vadd.s32 536870912, %v3289_v15  ;;  %v2658_v9 = vpop.eup %2657 }
  0xa4   :  { %2665 = vrsqrt.f32 %v3133_v28  ;;  %v815_v53 = vsel %vm811_vm3, %v795_v57, %v3198_v36  ;;  %v817_v58 = vsel %vm813_vm4, %v3200_v45, %v816_v43  ;;  %v2486_v47 = vadd.s32 4294967169, %v989_v27 }
  0xa5   :  { %v3320_v39 = vsel %vm463_vm5, %v5321_v11, %v462_v49  ;;  %v5323_v42 = vand.u32 2147483648, %v3041_v4  ;;  %2667 = vrsqrt.f32 %v3138_v18  ;;  %v896_v51 = vand.u32 31, %v894_v55 }
  0xa6   :  { %5322 = vst [vmem:[#allocation29_spill] sm:$0xff] %v3320_v39  ;;  %v476_v36 = vsel %vm475_vm9, %v3043_v8, %v474_v56  ;;  %v483_v45 = vsel %vm482_vm10, %v3054_v12, %v481_v59  ;;  %v490_v57 = vsel %vm489_vm11, %v3057_v50, %v488_v61  ;;  %v495_v4 = vmul.f32 %v2654_v37, %v3079_v26 }
  0xa7   :  { %v3335_v14 = vsel %vm470_vm8, %v5323_v42, %v469_v62  ;;  %vm498_vm1 = vcmp.eq.f32.partialorder %v3079_v26, 0.0  ;;  %vm505_vm2 = vcmp.eq.f32.partialorder %v3088_v24, 0.0  ;;  %vm512_vm3 = vcmp.eq.f32.partialorder %v3090_v44, 0.0  ;;  %v2660_v11 = vpop.eup %2659 }
  0xa8   :  { %5324 = vst [vmem:[#allocation30_spill] sm:$0xff] %v3335_v14  ;;  %v2472_v27 = vadd.s32 4294967294, %v641_v33  ;;  %v3352_v62 = vshrl.u32 %v737_v52, 30  ;;  %v818_v43 = vsel %vm812_vm7, %v815_v53, %v817_v58  ;;  %v837_v56 = vadd.s32 1, %v3293_v32 }
  0xa9   :  { %v502_v59 = vmul.f32 %v2656_v40, %v3088_v24  ;;  %v509_v61 = vmul.f32 %v2658_v9, %v3090_v44  ;;  %vm517_vm4 = vcmp.eq.f32.partialorder %v3114_v17, inf  ;;  %vm836_vm5 = vc.u32 %v3300_v3, %v3292_v19 }
  0xaa   :  { %v995_v37 = vadd.s32 1, %v2486_v47  ;;  %v5325_v33 = vand.u32 2147483648, %v3043_v8  ;;  %2669 = vrsqrt.f32 %v3140_v34  ;;  %v3370_v40 = vsub.s32 32, %v896_v51 }
  0xab   :  { %v5327_v53 = vand.u32 2147483648, %v3054_v12  ;;  %v5329_v47 = vand.u32 2147483648, %v3057_v50  ;;  %vm5331_vm7 = vcmp.eq.f32.partialorder %v3079_v26, inf  ;;  %v834_v42 = vmul.u32 %v3254_v7, %v818_v43 }
  0xac   :  { %v3366_v52 = vsel %vm477_vm12, %v5325_v33, %v476_v36  ;;  %v497_v8 = vsel %vm5331_vm7, %v3079_v26, %v495_v4  ;;  %vm519_vm8 = vcmp.eq.f32.partialorder %v3114_v17, 0.0  ;;  %vm2473_vm9 = vcmp.lt.s32.totalorder %v2472_v27, 0 }
  0xad   :  { %5326 = vst [vmem:[#allocation31_spill] sm:$0xff] %v3366_v52  ;;  %v3376_v58 = vsel %vm484_vm13, %v5327_v53, %v483_v45  ;;  %v3382_v9 = vsel %vm491_vm14, %v5329_v47, %v490_v57  ;;  %v739_v36 = vshll.u32 %v3352_v62, 30  ;;  %v838_v12 = vsel %vm836_vm5, %v837_v56, %v3293_v32 }
  0xae   :  { %5328 = vst [vmem:[#allocation32_spill] sm:$0xff] %v3376_v58  ;;  %5330 = vst [vmem:[#allocation33_spill] sm:$0xff] %v3382_v9  ;;  %v5268_v45 = vand.u32 2147483647, %v2922_v0  ;;  %v504_v50 = vsel %vm503_vm0, %v3088_v24, %v502_v59  ;;  %v511_v57 = vsel %vm510_vm6, %v3090_v44, %v509_v61  ;;  %v516_v4 = vmul.f32 %v2660_v11, %v3114_v17  ;;  %v2662_v33 = vpop.eup %2661 }
  0xaf   :  { %vm996_vm10 = vcmp.gt.s32.totalorder %v995_v37, 0  ;;  %v908_v7 = vshll.u32 %v5311_v29, %v896_v51  ;;  %v909_v43 = vshrl.u32 %v5312_v20, %v3370_v40  ;;  %v911_v32 = vshll.u32 %v5312_v20, %v896_v51 }
  0xb0   :  { %v912_v56 = vshrl.u32 %v5313_v48, %v3370_v40  ;;  %v3405_v53 = vsel %vm2473_vm9, 0, %v2472_v27  ;;  %v3407_v59 = vadd.s32 %v838_v12, %v834_v42  ;;  %v3409_v47 = vshrl.u32 %v894_v55, 5  ;;  %v3418_v30 = vpop.eup %2663 }
  0xb1   :  { %v997_v61 = vsel %vm996_vm10, %v995_v37, 0  ;;  %v3412_v11 = vsub.s32 %v3289_v15, %v739_v36  ;;  %v889_v46 = vand.u32 8388607, %v5268_v45  ;;  %v899_v49 = vshll.u32 %v5320_v63, %v896_v51  ;;  %v3427_v42 = vpop.eup %2665 }
  0xb2   :  { %v902_v38 = vshll.u32 %v5314_v16, %v896_v51  ;;  %v900_v27 = vshrl.u32 %v5314_v16, %v3370_v40  ;;  %v903_v55 = vshrl.u32 %v5315_v60, %v3370_v40  ;;  %v905_v37 = vshll.u32 %v5315_v60, %v896_v51  ;;  %v3435_v9 = vpop.eup %2667 }
  0xb3   :  { %v906_v15 = vshrl.u32 %v5311_v29, %v3370_v40  ;;  %v3433_v36 = vsel %vm498_vm1, %v499_v31, %v497_v8  ;;  %v910_v12 = vor.u32 %v909_v43, %v908_v7  ;;  %v913_v45 = vor.u32 %v912_v56, %v911_v32 }
  0xb4   :  { %5332 = vst [vmem:[#allocation34_spill] sm:$0xff] %v3433_v36  ;;  %v999_v34 = vand.u32 31, %v997_v61  ;;  %v5333_v58 = vand.u32 2147483648, %v3088_v24  ;;  %v5335_v52 = vand.u32 2147483648, %v3090_v44  ;;  %v840_v31 = vadd.s32 536870912, %v3407_v59 }
  0xb5   :  { %vm917_vm11 = vcmp.lt.s32.totalorder %v3409_v47, 4  ;;  %v518_v26 = vsel %vm517_vm4, %v3114_v17, %v516_v4  ;;  %v649_v8 = vsub.s32 4294967266, %v3405_v53  ;;  %v742_v24 = vsub.s32 0, %v3412_v11 }
  0xb6   :  { %v3441_v51 = vsel %vm505_vm2, %v5333_v58, %v504_v50  ;;  %v3447_v14 = vsel %vm512_vm3, %v5335_v52, %v511_v57  ;;  %v890_v58 = vor.u32 8388608, %v889_v46  ;;  %v3456_v50 = vor.u32 %v900_v27, %v899_v49 }
  0xb7   :  { %5334 = vst [vmem:[#allocation35_spill] sm:$0xff] %v3441_v51  ;;  %5336 = vst [vmem:[#allocation36_spill] sm:$0xff] %v3447_v14  ;;  %v3458_v7 = vor.u32 %v903_v55, %v902_v38  ;;  %v907_v44 = vor.u32 %v906_v15, %v905_v37  ;;  %vm914_vm12 = vcmp.lt.s32.totalorder %v3409_v47, 1  ;;  %vm916_vm13 = vcmp.lt.s32.totalorder %v3409_v47, 3  ;;  %v3468_v43 = vpop.eup %2669 }
  0xb8   :  { %v923_v52 = vsel %vm917_vm11, %v910_v12, 920167782  ;;  %v927_v57 = vsel %vm917_vm11, %v913_v45, 1326507024  ;;  %v3466_v4 = vsub.s32 32, %v999_v34  ;;  %5337 = vst [vmem:[#allocation37_spill] sm:$0xff] %v3468_v43  ;;  %v3477_v46 = vmul.f32 %v2662_v33, %v3116_v25 }
  0xb9   :  { %v5338_v49 = vand.u32 2147483648, %v3114_v17  ;;  %v629_v32 = vadd.s32 %v3018_v35, %v3028_v10  ;;  %v3481_v56 = vshrl.u32 %v840_v31, 30  ;;  %v645_v45 = vsub.s32 32, %v3405_v53 }
  0xba   :  { %v3484_v27 = vadd.s32 127, %v649_v8  ;;  %v2475_v55 = vmin.u32 %v742_v24, %v3412_v11  ;;  %vm915_vm14 = vcmp.lt.s32.totalorder %v3409_v47, 2  ;;  %v922_v17 = vsel %vm914_vm12, %v3456_v50, %v3458_v7 }
  0xbb   :  { %v3474_v38 = vsel %vm519_vm8, %v5338_v49, %v518_v26  ;;  %v924_v33 = vsel %vm916_vm13, %v907_v44, %v923_v52  ;;  %v926_v35 = vsel %vm914_vm12, %v3458_v7, %v907_v44  ;;  %v928_v10 = vsel %vm916_vm13, %v910_v12, %v927_v57 }
  0xbc   :  { %5339 = vst [vmem:[#allocation38_spill] sm:$0xff] %v3474_v38  ;;  %v3499_v37 = vshll.u32 %v890_v58, 8  ;;  %v1011_v31 = vshll.u32 %v5311_v29, %v999_v34  ;;  %v1012_v26 = vshrl.u32 %v5312_v20, %v3466_v4  ;;  %v842_v8 = vshll.u32 %v3481_v56, 30 }
  0xbd   :  { %v3506_v24 = vshrl.u32 %v997_v61, 5  ;;  %v1014_v52 = vshll.u32 %v5312_v20, %v999_v34  ;;  %v1015_v49 = vshrl.u32 %v5313_v48, %v3466_v4  ;;  %v925_v12 = vsel %vm915_vm14, %v922_v17, %v924_v33 }
  0xbe   :  { %v929_v58 = vsel %vm915_vm14, %v926_v35, %v928_v10  ;;  %v1002_v57 = vshll.u32 %v5320_v63, %v999_v34  ;;  %v1005_v15 = vshll.u32 %v5314_v16, %v999_v34  ;;  %v1003_v43 = vshrl.u32 %v5314_v16, %v3466_v4 }
  0xbf   :  { %v1006_v61 = vshrl.u32 %v5315_v60, %v3466_v4  ;;  %v1008_v38 = vshll.u32 %v5315_v60, %v999_v34  ;;  %v1009_v14 = vshrl.u32 %v5311_v29, %v3466_v4  ;;  %v744_v51 = vclz %v2475_v55 }
  0xc0   :  { %v898_v17 = vshrl.u32 %v5320_v63, %v3370_v40  ;;  %v5340_v33 = vand.u32 2147483647, %v2924_v21  ;;  %v1013_v10 = vor.u32 %v1012_v26, %v1011_v31  ;;  %v1016_v5 = vor.u32 %v1015_v49, %v1014_v52 }
  0xc1   :  { %v3529_v36 = vmul.u32.u64.low %v3499_v37, %v925_v12  ;;  %v3530_v39 = vmul.u32.u64.high %v3499_v37, %v925_v12, %v3529_v36  ;;  %vm1020_vm6 = vcmp.lt.s32.totalorder %v3506_v24, 4  ;;  %vm524_vm15 = vcmp.eq.f32.partialorder %v3116_v25, inf }
  0xc2   :  { %v992_v35 = vand.u32 8388607, %v5340_v33  ;;  %v3536_v34 = vsub.s32 %v3407_v59, %v842_v8  ;;  %v3539_v55 = vmul.u32.u64.low %v3499_v37, %v929_v58  ;;  %v3540_v40 = vmul.u32.u64.high %v3499_v37, %v929_v58, %v3539_v55 }
  0xc3   :  { %v1091_v33 = vand.u32 2139095040, %v2926_v2  ;;  %v919_v31 = vsel %vm917_vm11, %v907_v44, 2102212464  ;;  %v1004_v26 = vor.u32 %v1003_v43, %v1002_v57  ;;  %v1007_v12 = vor.u32 %v1006_v61, %v1005_v15 }
  0xc4   :  { %v1010_v13 = vor.u32 %v1009_v14, %v1008_v38  ;;  %vm1017_vm0 = vcmp.lt.s32.totalorder %v3506_v24, 1  ;;  %vm1019_vm1 = vcmp.lt.s32.totalorder %v3506_v24, 3  ;;  %v1026_v59 = vsel %vm1020_vm6, %v1013_v10, 920167782 }
  0xc5   :  { %v1092_v8 = vshrl.u32 %v1091_v33, 23  ;;  %v646_v52 = vshll.u32 %v3208_v23, %v3405_v53  ;;  %v647_v49 = vshrl.u32 %v629_v32, %v645_v45  ;;  %v993_v58 = vor.u32 8388608, %v992_v35 }
  0xc6   :  { %v1030_v55 = vsel %vm1020_vm6, %v1016_v5, 1326507024  ;;  %v651_v44 = vshll.u32 %v3484_v27, 23  ;;  %v918_v14 = vsel %vm914_vm12, %v898_v17, %v3456_v50  ;;  %v920_v43 = vsel %vm916_vm13, %v3458_v7, %v919_v31 }
  0xc7   :  { %v2490_v38 = vadd.s32 4294967169, %v1092_v8  ;;  %v2476_v15 = vadd.s32 4294967294, %v744_v51  ;;  %vm1018_vm2 = vcmp.lt.s32.totalorder %v3506_v24, 2  ;;  %v1025_v23 = vsel %vm1017_vm0, %v1004_v26, %v1007_v12 }
  0xc8   :  { %v1027_v5 = vsel %vm1019_vm1, %v1010_v13, %v1026_v59  ;;  %v845_v53 = vsub.s32 0, %v3536_v34  ;;  %v1029_v32 = vsel %vm1017_vm0, %v1007_v12, %v1010_v13  ;;  %v1031_v50 = vsel %vm1019_vm1, %v1013_v10, %v1030_v55 }
  0xc9   :  { %v1098_v45 = vadd.s32 1, %v2490_v38  ;;  %v3572_v51 = vmul.f32 %v3418_v30, %v3131_v1  ;;  %v921_v7 = vsel %vm915_vm14, %v918_v14, %v920_v43  ;;  %v940_v27 = vadd.s32 1, %v3530_v39 }
  0xca   :  { %v3577_v57 = vshll.u32 %v993_v58, 8  ;;  %v3579_v61 = vor.u32 %v647_v49, %v646_v52  ;;  %vm939_vm3 = vc.u32 %v3540_v40, %v3529_v36  ;;  %v1028_v17 = vsel %vm1018_vm2, %v1025_v23, %v1027_v5 }
  0xcb   :  { %vm1099_vm4 = vcmp.gt.s32.totalorder %v1098_v45, 0  ;;  %v3585_v35 = vor.u32 4788187, %v651_v44  ;;  %vm2477_vm5 = vcmp.lt.s32.totalorder %v2476_v15, 0  ;;  %v1032_v30 = vsel %vm1018_vm2, %v1029_v32, %v1031_v50 }
  0xcc   :  { %v1100_v47 = vsel %vm1099_vm4, %v1098_v45, 0  ;;  %v2479_v10 = vmin.u32 %v845_v53, %v3536_v34  ;;  %v937_v33 = vmul.u32 %v3499_v37, %v921_v7  ;;  %v5271_v31 = vand.u32 2147483647, %v2926_v2 }
  0xcd   :  { %v1102_v59 = vand.u32 31, %v1100_v47  ;;  %v3596_v8 = vsel %vm524_vm15, %v3116_v25, %v3477_v46  ;;  %v941_v52 = vsel %vm939_vm3, %v940_v27, %v3530_v39  ;;  %v1001_v55 = vshrl.u32 %v5320_v63, %v3466_v4 }
  0xce   :  { %v3600_v49 = vmul.u32.u64.low %v3577_v57, %v1028_v17  ;;  %v3601_v58 = vmul.u32.u64.high %v3577_v57, %v1028_v17, %v3600_v49  ;;  %v3607_v37 = vmul.u32.u64.low %v3577_v57, %v1032_v30  ;;  %v3608_v44 = vmul.u32.u64.high %v3577_v57, %v1032_v30, %v3607_v37 }
  0xcf   :  { %v3610_v14 = vsub.s32 32, %v1102_v59  ;;  %v3615_v46 = vadd.s32 %v3167_v6, %v3154_v41  ;;  %v3617_v39 = vsel %vm2477_vm5, 0, %v2476_v15  ;;  %v1022_v38 = vsel %vm1020_vm6, %v1010_v13, 2102212464 }
  0xd0   :  { %v847_v4 = vclz %v2479_v10  ;;  %v3622_v5 = vadd.s32 %v941_v52, %v937_v33  ;;  %v1095_v53 = vand.u32 8388607, %v5271_v31  ;;  %v1105_v32 = vshll.u32 %v5320_v63, %v1102_v59 }
  0xd1   :  { %v1106_v50 = vshrl.u32 %v5314_v16, %v3610_v14  ;;  %v1108_v41 = vshll.u32 %v5314_v16, %v1102_v59  ;;  %v1109_v6 = vshrl.u32 %v5315_v60, %v3610_v14  ;;  %v752_v13 = vsub.s32 4294967266, %v3617_v39 }
  0xd2   :  { %v1021_v15 = vsel %vm1017_vm0, %v1001_v55, %v1004_v26  ;;  %v1023_v45 = vsel %vm1019_vm1, %v1007_v12, %v1022_v38  ;;  %v3637_v7 = vshrl.u32 %v1100_v47, 5  ;;  %v1111_v27 = vshll.u32 %v5315_v60, %v1102_v59 }
  0xd3   :  { %v1112_v17 = vshrl.u32 %v5311_v29, %v3610_v14  ;;  %v1114_v30 = vshll.u32 %v5311_v29, %v1102_v59  ;;  %v1194_v10 = vand.u32 2139095040, %v2929_v22  ;;  %v2480_v33 = vadd.s32 4294967294, %v847_v4 }
  0xd4   :  { %v943_v52 = vadd.s32 536870912, %v3622_v5  ;;  %v1096_v37 = vor.u32 8388608, %v1095_v53  ;;  %v1115_v26 = vshrl.u32 %v5312_v20, %v3610_v14  ;;  %vm526_vm7 = vcmp.eq.f32.partialorder %v3116_v25, 0.0 }
  0xd5   :  { %v1107_v12 = vor.u32 %v1106_v50, %v1105_v32  ;;  %v1110_v47 = vor.u32 %v1109_v6, %v1108_v41  ;;  %v1117_v55 = vshll.u32 %v5312_v20, %v1102_v59  ;;  %v1118_v38 = vshrl.u32 %v5313_v48, %v3610_v14 }
  0xd6   :  { %v1024_v31 = vsel %vm1018_vm2, %v1021_v15, %v1023_v45  ;;  %vm1042_vm8 = vc.u32 %v3608_v44, %v3600_v49  ;;  %v1043_v4 = vadd.s32 1, %v3601_v58  ;;  %vm1120_vm9 = vcmp.lt.s32.totalorder %v3637_v7, 1 }
  0xd7   :  { %v1113_v53 = vor.u32 %v1112_v17, %v1111_v27  ;;  %v1116_v43 = vor.u32 %v1115_v26, %v1114_v30  ;;  %v1119_v23 = vor.u32 %v1118_v38, %v1117_v55  ;;  %v1195_v32 = vshrl.u32 %v1194_v10, 23 }
  0xd8   :  { %vm2481_vm10 = vcmp.lt.s32.totalorder %v2480_v33, 0  ;;  %v3657_v50 = vshrl.u32 %v943_v52, 30  ;;  %vm1122_vm11 = vcmp.lt.s32.totalorder %v3637_v7, 3  ;;  %vm1123_vm12 = vcmp.lt.s32.totalorder %v3637_v7, 4 }
  0xd9   :  { %vm531_vm13 = vcmp.eq.f32.partialorder %v3131_v1, inf  ;;  %v1040_v24 = vmul.u32 %v3577_v57, %v1024_v31  ;;  %vm1121_vm14 = vcmp.lt.s32.totalorder %v3637_v7, 2  ;;  %v1128_v59 = vsel %vm1120_vm9, %v1107_v12, %v1110_v47 }
  0xda   :  { %v3666_v41 = vshll.u32 %v1096_v37, 8  ;;  %v748_v6 = vsub.s32 32, %v3617_v39  ;;  %v753_v15 = vadd.s32 127, %v752_v13  ;;  %v1044_v45 = vsel %vm1042_vm8, %v1043_v4, %v3601_v58  ;;  %v5341_v37 = vld [vmem:[#allocation10_spill] sm:$0xff] }
  0xdb   :  { %v1129_v27 = vsel %vm1123_vm12, %v1116_v43, 920167782  ;;  %v1132_v31 = vsel %vm1120_vm9, %v1110_v47, %v1113_v53  ;;  %v1133_v17 = vsel %vm1123_vm12, %v1119_v23, 1326507024  ;;  %v2494_v30 = vadd.s32 4294967169, %v1195_v32 }
  0xdc   :  { %v1130_v57 = vsel %vm1122_vm11, %v1113_v53, %v1129_v27  ;;  %v3682_v13 = vsel %vm2481_vm10, 0, %v2480_v33  ;;  %v945_v10 = vshll.u32 %v3657_v50, 30  ;;  %v1134_v52 = vsel %vm1122_vm11, %v1116_v43, %v1133_v17 }
  0xdd   :  { %v1131_v58 = vsel %vm1121_vm14, %v1128_v59, %v1130_v57  ;;  %vm575_vm6 = vcmp.lt.s32.totalorder %v2842_v54, 0  ;;  %vm678_vm15 = vcmp.lt.s32.totalorder %v5341_v37, 0  ;;  %v3691_v26 = vadd.s32 %v1044_v45, %v1040_v24 }
  0xde   :  { %v1135_v23 = vsel %vm1121_vm14, %v1132_v31, %v1134_v52  ;;  %v3696_v33 = vmul.u32.u64.low %v3666_v41, %v1131_v58  ;;  %v3697_v55 = vmul.u32.u64.high %v3666_v41, %v1131_v58, %v3696_v33  ;;  %v749_v38 = vshll.u32 %v3412_v11, %v3617_v39 }
  0xdf   :  { %v750_v4 = vshrl.u32 %v3615_v46, %v748_v6  ;;  %v754_v43 = vshll.u32 %v753_v15, 23  ;;  %v1104_v32 = vshrl.u32 %v5320_v63, %v3610_v14  ;;  %v1125_v24 = vsel %vm1123_vm12, %v1113_v53, 2102212464  ;;  %v5344_v46 = vld [vmem:[#allocation26_spill] sm:$0xff] }
  0xe0   :  { %v3708_v59 = vmul.u32.u64.low %v3666_v41, %v1135_v23  ;;  %v3709_v45 = vmul.u32.u64.high %v3666_v41, %v1135_v23, %v3708_v59  ;;  %v1201_v27 = vadd.s32 1, %v2494_v30  ;;  %v5342_v57 = vand.u32 2147483648, %v3116_v25 }
  0xe1   :  { %v659_v39 = vsub.s32 4, %v5344_v46  ;;  %v855_v6 = vsub.s32 4294967266, %v3682_v13  ;;  %v3721_v14 = vsub.s32 %v3622_v5, %v945_v10  ;;  %v5345_v53 = vand.u32 2147483647, %v3585_v35 }
  0xe2   :  { %v3716_v11 = vsel %vm526_vm7, %v5342_v57, %v3596_v8  ;;  %v5346_v15 = vcvt.s32.f32 %v3579_v61  ;;  %v762_v17 = vsub.s32 4, %v3352_v62  ;;  %v1046_v30 = vadd.s32 536870912, %v3691_v26 }
  0xe3   :  { %5343 = vst [vmem:[#allocation10_spill] sm:$0xff] %v3716_v11  ;;  %vm1202_vm0 = vcmp.gt.s32.totalorder %v1201_v27, 0  ;;  %v835_v25 = vadd.s32 %v3292_v19, %v3300_v3  ;;  %v1124_v8 = vsel %vm1120_vm9, %v1104_v32, %v1107_v12  ;;  %v1126_v5 = vsel %vm1122_vm11, %v1110_v47, %v1125_v24 }
  0xe4   :  { %v656_v31 = vmul.f32 %v5346_v15, %v5345_v53  ;;  %v1203_v10 = vsel %vm1202_vm0, %v1201_v27, 0  ;;  %v751_v58 = vor.u32 %v750_v4, %v749_v38  ;;  %v755_v35 = vor.u32 4788187, %v754_v43 }
  0xe5   :  { %v851_v61 = vsub.s32 32, %v3682_v13  ;;  %v1205_v52 = vand.u32 31, %v1203_v10  ;;  %v3740_v23 = vsel %vm531_vm13, %v3131_v1, %v3572_v51  ;;  %v3744_v19 = vmul.f32 %v3427_v42, %v3133_v28 }
  0xe6   :  { %5347 = vst [vmem:[#allocation26_spill] sm:$0xff] %v3740_v23  ;;  %v856_v3 = vadd.s32 127, %v855_v6  ;;  %v948_v12 = vsub.s32 0, %v3721_v14  ;;  %v3747_v47 = vshrl.u32 %v1046_v30, 30  ;;  %v1127_v38 = vsel %vm1121_vm14, %v1124_v8, %v1126_v5  ;;  %v5354_v23 = vld [vmem:[#allocation13_spill] sm:$0xff] }
  0xe7   :  { %v1146_v4 = vadd.s32 1, %v3697_v55  ;;  %v3752_v43 = vsub.s32 32, %v1205_v52  ;;  %v657_v32 = vxor.u32 2147483648, %v656_v31  ;;  %v3757_v51 = vsel %vm575_vm6, %v659_v39, %v5344_v46 }
  0xe8   :  { %v3762_v42 = vsel %vm678_vm15, %v762_v17, %v3352_v62  ;;  %vm1145_vm1 = vc.u32 %v3709_v45, %v3696_v33  ;;  %v756_v7 = vand.u32 2147483647, %v755_v35  ;;  %v758_v24 = vcvt.s32.f32 %v751_v58 }
  0xe9   :  { %v852_v59 = vshll.u32 %v3536_v34, %v3682_v13  ;;  %v853_v27 = vshrl.u32 %v835_v25, %v851_v61  ;;  %v857_v57 = vshll.u32 %v856_v3, 23  ;;  %v2483_v6 = vmin.u32 %v948_v12, %v3721_v14 }
  0xea   :  { %v1143_v46 = vmul.u32 %v3666_v41, %v1127_v38  ;;  %v1217_v39 = vshll.u32 %v5311_v29, %v1205_v52  ;;  %v1048_v53 = vshll.u32 %v3747_v47, 30  ;;  %v1147_v62 = vsel %vm1145_vm1, %v1146_v4, %v3697_v55 }
  0xeb   :  { %v5277_v15 = vand.u32 2147483647, %v2929_v22  ;;  %v1218_v17 = vshrl.u32 %v5312_v20, %v3752_v43  ;;  %vm538_vm2 = vcmp.eq.f32.partialorder %v3133_v28, inf  ;;  %v3777_v34 = vshrl.u32 %v1203_v10, 5 }
  0xec   :  { %v1208_v13 = vshll.u32 %v5320_v63, %v1205_v52  ;;  %v1211_v30 = vshll.u32 %v5314_v16, %v1205_v52  ;;  %v1220_v41 = vshll.u32 %v5312_v20, %v1205_v52  ;;  %v5348_v25 = vand.u32 2147483647, %v2842_v54 }
  0xed   :  { %v1209_v55 = vshrl.u32 %v5314_v16, %v3752_v43  ;;  %v1212_v5 = vshrl.u32 %v5315_v60, %v3752_v43  ;;  %v1214_v10 = vshll.u32 %v5315_v60, %v1205_v52  ;;  %v1215_v58 = vshrl.u32 %v5311_v29, %v3752_v43 }
  0xee   :  { %vm3784_vm3 = vcmp.le.f32.partialorder %v5348_v25, 0.7853982  ;;  %v658_v35 = vsel %vm575_vm6, %v657_v32, %v656_v31  ;;  %v3797_v61 = vadd.s32 %v1147_v62, %v1143_v46  ;;  %v1219_v3 = vor.u32 %v1218_v17, %v1217_v39  ;;  %v5355_v31 = vld [vmem:[#allocation11_spill] sm:$0xff] }
  0xef   :  { %v1221_v12 = vshrl.u32 %v5313_v48, %v3752_v43  ;;  %v5351_v38 = vand.u32 2147483647, %v5341_v37  ;;  %v759_v25 = vmul.f32 %v758_v24, %v756_v7  ;;  %v854_v52 = vor.u32 %v853_v27, %v852_v59 }
  0xf0   :  { %v1198_v11 = vand.u32 8388607, %v5277_v15  ;;  %v1297_v1 = vand.u32 2139095040, %v5354_v23  ;;  %vm781_vm5 = vcmp.lt.s32.totalorder %v5355_v31, 0  ;;  %v858_v32 = vor.u32 4788187, %v857_v57 }
  0xf1   :  { %vm3803_vm4 = vcmp.le.f32.partialorder %v5351_v38, 0.7853982  ;;  %v950_v46 = vclz %v2483_v6  ;;  %v3812_v39 = vsub.s32 %v3691_v26, %v1048_v53  ;;  %v1222_v62 = vor.u32 %v1221_v12, %v1220_v41 }
  0xf2   :  { %v1210_v17 = vor.u32 %v1209_v55, %v1208_v13  ;;  %v1213_v38 = vor.u32 %v1212_v5, %v1211_v30  ;;  %v1216_v2 = vor.u32 %v1215_v58, %v1214_v10  ;;  %vm1226_vm7 = vcmp.lt.s32.totalorder %v3777_v34, 4 }
  0xf3   :  { %v1149_v7 = vadd.s32 536870912, %v3797_v61  ;;  %vm1223_vm8 = vcmp.lt.s32.totalorder %v3777_v34, 1  ;;  %vm1225_vm9 = vcmp.lt.s32.totalorder %v3777_v34, 3  ;;  %v1232_v24 = vsel %vm1226_vm7, %v1219_v3, 920167782 }
  0xf4   :  { %v760_v59 = vxor.u32 2147483648, %v759_v25  ;;  %v5356_v27 = vand.u32 2147483647, %v5355_v31  ;;  %v865_v57 = vsub.s32 4, %v3481_v56  ;;  %v1199_v6 = vor.u32 8388608, %v1198_v11 }
  0xf5   :  { %v1298_v53 = vshrl.u32 %v1297_v1, 23  ;;  %v859_v13 = vand.u32 2147483647, %v858_v32  ;;  %v861_v30 = vcvt.s32.f32 %v854_v52  ;;  %vm1224_vm11 = vcmp.lt.s32.totalorder %v3777_v34, 2 }
  0xf6   :  { %vm3822_vm10 = vcmp.le.f32.partialorder %v5356_v27, 0.7853982  ;;  %v1236_v41 = vsel %vm1226_vm7, %v1222_v62, 1326507024  ;;  %v1231_v55 = vsel %vm1223_vm8, %v1210_v17, %v1213_v38  ;;  %v1233_v5 = vsel %vm1225_vm9, %v1216_v2, %v1232_v24 }
  0xf7   :  { %v1235_v10 = vsel %vm1223_vm8, %v1213_v38, %v1216_v2  ;;  %v1237_v11 = vsel %vm1225_vm9, %v1219_v3, %v1236_v41  ;;  %v3840_v1 = vmul.f32 %v3435_v9, %v3138_v18  ;;  %v2484_v58 = vadd.s32 4294967294, %v950_v46 }
  0xf8   :  { %v1051_v12 = vsub.s32 0, %v3812_v39  ;;  %v3843_v52 = vshrl.u32 %v1149_v7, 30  ;;  %v3849_v32 = vsel %vm538_vm2, %v3133_v28, %v3744_v19  ;;  %v662_v62 = vsel %vm3784_vm3, 0, %v3757_v51 }
  0xf9   :  { %5359 = vst [vmem:[#allocation11_spill] sm:$0xff] %v3840_v1  ;;  %5361 = vst [vmem:[#allocation40_spill] sm:$0xff] %v3849_v32  ;;  %v3854_v3 = vshll.u32 %v1199_v6, 8  ;;  %v2498_v24 = vadd.s32 4294967169, %v1298_v53  ;;  %v661_v9 = vsel %vm3784_vm3, %v2842_v54, %v658_v35  ;;  %v765_v46 = vsel %vm3803_vm4, 0, %v3762_v42 }
  0xfa   :  { %5360 = vst [vmem:[#allocation39_spill] sm:$0xff] %v3843_v52  ;;  %v1234_v7 = vsel %vm1224_vm11, %v1231_v55, %v1233_v5  ;;  %v1238_v19 = vsel %vm1224_vm11, %v1235_v10, %v1237_v11  ;;  %v761_v51 = vsel %vm678_vm15, %v760_v59, %v759_v25  ;;  %v862_v27 = vmul.f32 %v861_v30, %v859_v13 }
  0xfb   :  { %v866_v6 = vsel %vm781_vm5, %v865_v57, %v3481_v56  ;;  %v1304_v8 = vadd.s32 1, %v2498_v24  ;;  %vm2485_vm12 = vcmp.lt.s32.totalorder %v2484_v58, 0  ;;  %v2487_v35 = vmin.u32 %v1051_v12, %v3812_v39 }
  0xfc   :  { %v1151_v42 = vshll.u32 %v3843_v52, 30  ;;  %v1207_v53 = vshrl.u32 %v5320_v63, %v3752_v43  ;;  %v3876_v41 = vmul.u32.u64.low %v3854_v3, %v1238_v19  ;;  %v3877_v55 = vmul.u32.u64.high %v3854_v3, %v1238_v19, %v3876_v41 }
  0xfd   :  { %v3880_v25 = vmul.u32.u64.low %v3854_v3, %v1234_v7  ;;  %v3881_v59 = vmul.u32.u64.high %v3854_v3, %v1234_v7, %v3880_v25  ;;  %2671 = vcosq.f32 %v661_v9  ;;  %v868_v56 = vsel %vm3822_vm10, 0, %v866_v6 }
  0xfe   :  { %v1228_v57 = vsel %vm1226_vm7, %v1216_v2, 2102212464  ;;  %vm1305_vm13 = vcmp.gt.s32.totalorder %v1304_v8, 0  ;;  %v764_v43 = vsel %vm3803_vm4, %v5341_v37, %v761_v51  ;;  %v863_v13 = vxor.u32 2147483648, %v862_v27 }
  0xff   :  { %v3891_v30 = vsel %vm2485_vm12, 0, %v2484_v58  ;;  %v1306_v5 = vsel %vm1305_vm13, %v1304_v8, 0  ;;  %v1053_v10 = vclz %v2487_v35  ;;  %v3894_v11 = vsub.s32 %v3797_v61, %v1151_v42  ;;  %v5362_v35 = vld [vmem:[#allocation14_spill] sm:$0xff] }
 0x100   :  { %v5276_v12 = vand.u32 2147483647, %v5354_v23  ;;  %v1308_v24 = vand.u32 31, %v1306_v5  ;;  %2673 = vsinq.f32 %v661_v9  ;;  %v3897_v7 = vand.u32 3, %v662_v62 }
 0x101   :  { %v1227_v2 = vsel %vm1223_vm8, %v1207_v53, %v1210_v17  ;;  %v1229_v4 = vsel %vm1225_vm9, %v1213_v38, %v1228_v57  ;;  %2675 = vcosq.f32 %v764_v43  ;;  %v3903_v58 = vand.u32 3, %v765_v46 }
 0x102   :  { %v3905_v19 = vand.u32 3, %v868_v56  ;;  %v1309_v51 = vsub.s32 32, %v1308_v24  ;;  %2677 = vsinq.f32 %v764_v43  ;;  %v864_v61 = vsel %vm781_vm5, %v863_v13, %v862_v27 }
 0x103   :  { %v938_v62 = vadd.s32 %v3529_v36, %v3540_v40  ;;  %v958_v9 = vsub.s32 4294967266, %v3891_v30  ;;  %v2488_v6 = vadd.s32 4294967294, %v1053_v10  ;;  %v1154_v17 = vsub.s32 0, %v3894_v11 }
 0x104   :  { %v1230_v38 = vsel %vm1224_vm11, %v1227_v2, %v1229_v4  ;;  %v1301_v46 = vand.u32 8388607, %v5276_v12  ;;  %vm1248_vm14 = vc.u32 %v3877_v55, %v3880_v25  ;;  %v1249_v8 = vadd.s32 1, %v3881_v59 }
 0x105   :  { %v3920_v27 = vshrl.u32 %v1306_v5, 5  ;;  %v1400_v36 = vand.u32 2139095040, %v5362_v35  ;;  %v1311_v40 = vshll.u32 %v5320_v63, %v1308_v24  ;;  %v1312_v42 = vshrl.u32 %v5314_v16, %v1309_v51 }
 0x106   :  { %v1314_v53 = vshll.u32 %v5314_v16, %v1308_v24  ;;  %v1315_v34 = vshrl.u32 %v5315_v60, %v1309_v51  ;;  %v1317_v41 = vshll.u32 %v5315_v60, %v1308_v24  ;;  %v1318_v56 = vshrl.u32 %v5311_v29, %v1309_v51 }
 0x107   :  { %v1320_v57 = vshll.u32 %v5311_v29, %v1308_v24  ;;  %v1321_v43 = vshrl.u32 %v5312_v20, %v1309_v51  ;;  %v954_v13 = vsub.s32 32, %v3891_v30  ;;  %v959_v5 = vadd.s32 127, %v958_v9 }
 0x108   :  { %vm2489_vm6 = vcmp.lt.s32.totalorder %v2488_v6, 0  ;;  %v1323_v10 = vshll.u32 %v5312_v20, %v1308_v24  ;;  %v2491_v2 = vmin.u32 %v1154_v17, %v3894_v11  ;;  %v1246_v4 = vmul.u32 %v3854_v3, %v1230_v38 }
 0x109   :  { %v1324_v12 = vshrl.u32 %v5313_v48, %v1309_v51  ;;  %v1401_v15 = vshrl.u32 %v1400_v36, 23  ;;  %v1250_v1 = vsel %vm1248_vm14, %v1249_v8, %v3881_v59  ;;  %v1302_v32 = vor.u32 8388608, %v1301_v46 }
 0x10a   :  { %v1313_v18 = vor.u32 %v1312_v42, %v1311_v40  ;;  %v1316_v28 = vor.u32 %v1315_v34, %v1314_v53  ;;  %v3940_v23 = vpop.eup %2671  ;;  %v1319_v9 = vor.u32 %v1318_v56, %v1317_v41  ;;  %v1322_v52 = vor.u32 %v1321_v43, %v1320_v57 }
 0x10b   :  { %v1325_v24 = vor.u32 %v1324_v12, %v1323_v10  ;;  %vm1326_vm15 = vcmp.lt.s32.totalorder %v3920_v27, 1  ;;  %v3946_v3 = vsel %vm3822_vm10, %v5355_v31, %v864_v61  ;;  %v955_v17 = vshll.u32 %v3721_v14, %v3891_v30 }
 0x10c   :  { %v956_v38 = vshrl.u32 %v938_v62, %v954_v13  ;;  %vm1329_vm0 = vcmp.lt.s32.totalorder %v3920_v27, 4  ;;  %v3952_v59 = vsel %vm2489_vm6, 0, %v2488_v6  ;;  %v1156_v46 = vclz %v2491_v2 }
 0x10d   :  { %vm1328_vm1 = vcmp.lt.s32.totalorder %v3920_v27, 3  ;;  %v2502_v12 = vadd.s32 4294967169, %v1401_v15  ;;  %v3955_v8 = vpop.eup %2673  ;;  %v3957_v36 = vadd.s32 %v1250_v1, %v1246_v4  ;;  %vm1327_vm2 = vcmp.lt.s32.totalorder %v3920_v27, 2 }
 0x10e   :  { %v1334_v26 = vsel %vm1326_vm15, %v1313_v18, %v1316_v28  ;;  %v3962_v14 = vshll.u32 %v1302_v32, 8  ;;  %v3964_v30 = vpop.eup %2675  ;;  %v960_v61 = vshll.u32 %v959_v5, 23  ;;  %v1335_v62 = vsel %vm1329_vm0, %v1322_v52, 920167782 }
 0x10f   :  { %v1338_v15 = vsel %vm1326_vm15, %v1316_v28, %v1319_v9  ;;  %v1339_v1 = vsel %vm1329_vm0, %v1325_v24, 1326507024  ;;  %v3972_v6 = vpop.eup %2677  ;;  %v1061_v40 = vsub.s32 4294967266, %v3952_v59  ;;  %v1310_v42 = vshrl.u32 %v5320_v63, %v1309_v51 }
 0x110   :  { %v1336_v32 = vsel %vm1328_vm1, %v1319_v9, %v1335_v62  ;;  %v1340_v53 = vsel %vm1328_vm1, %v1322_v52, %v1339_v1  ;;  %v1331_v34 = vsel %vm1329_vm0, %v1319_v9, 2102212464  ;;  %v1407_v57 = vadd.s32 1, %v2502_v12 }
 0x111   :  { %v1337_v41 = vsel %vm1327_vm2, %v1334_v26, %v1336_v32  ;;  %v1341_v56 = vsel %vm1327_vm2, %v1338_v15, %v1340_v53  ;;  %v2492_v43 = vadd.s32 4294967294, %v1156_v46  ;;  %v1252_v13 = vadd.s32 536870912, %v3957_v36 }
 0x112   :  { %v3988_v51 = vmul.u32.u64.low %v3962_v14, %v1341_v56  ;;  %v3989_v5 = vmul.u32.u64.high %v3962_v14, %v1341_v56, %v3988_v51  ;;  %v957_v10 = vor.u32 %v956_v38, %v955_v17  ;;  %vm1408_vm3 = vcmp.gt.s32.totalorder %v1407_v57, 0 }
 0x113   :  { %v3992_v52 = vmul.u32.u64.low %v3962_v14, %v1337_v41  ;;  %v3993_v2 = vmul.u32.u64.high %v3962_v14, %v1337_v41, %v3992_v52  ;;  %v961_v4 = vor.u32 4788187, %v960_v61  ;;  %v1330_v9 = vsel %vm1326_vm15, %v1310_v42, %v1313_v18 }
 0x114   :  { %v1332_v24 = vsel %vm1328_vm1, %v1316_v28, %v1331_v34  ;;  %v1409_v46 = vsel %vm1408_vm3, %v1407_v57, 0  ;;  %v1041_v12 = vadd.s32 %v3600_v49, %v3608_v44  ;;  %v1057_v26 = vsub.s32 32, %v3952_v59 }
 0x115   :  { %v1062_v17 = vadd.s32 127, %v1061_v40  ;;  %v1411_v38 = vand.u32 31, %v1409_v46  ;;  %vm2493_vm4 = vcmp.lt.s32.totalorder %v2492_v43, 0  ;;  %v4004_v15 = vshrl.u32 %v1252_v13, 30 }
 0x116   :  { %v5285_v61 = vand.u32 2147483647, %v5362_v35  ;;  %v669_v18 = vxor.u32 2147483648, %v3955_v8  ;;  %v1333_v28 = vsel %vm1327_vm2, %v1330_v9, %v1332_v24  ;;  %2679 = vcosq.f32 %v3946_v3 }
 0x117   :  { %v4011_v42 = vsub.s32 32, %v1411_v38  ;;  %v962_v49 = vand.u32 2147483647, %v961_v4  ;;  %v964_v44 = vcvt.s32.f32 %v957_v10  ;;  %v1058_v40 = vshll.u32 %v3812_v39, %v3952_v59 }
 0x118   :  { %v1059_v32 = vshrl.u32 %v1041_v12, %v1057_v26  ;;  %v1063_v53 = vshll.u32 %v1062_v17, 23  ;;  %v4016_v34 = vsel %vm2493_vm4, 0, %v2492_v43  ;;  %v1352_v41 = vadd.s32 1, %v3993_v2 }
 0x119   :  { %v1254_v56 = vshll.u32 %v4004_v15, 30  ;;  %v1349_v27 = vmul.u32 %v3962_v14, %v1333_v28  ;;  %vm1351_vm5 = vc.u32 %v3989_v5, %v3992_v52  ;;  %v1404_v57 = vand.u32 8388607, %v5285_v61 }
 0x11a   :  { %v4025_v13 = vshrl.u32 %v1409_v46, 5  ;;  %v1414_v39 = vshll.u32 %v5320_v63, %v1411_v38  ;;  %v1423_v59 = vshll.u32 %v5311_v29, %v1411_v38  ;;  %v1424_v43 = vshrl.u32 %v5312_v20, %v4011_v42 }
 0x11b   :  { %v1415_v51 = vshrl.u32 %v5314_v16, %v4011_v42  ;;  %v1417_v14 = vshll.u32 %v5314_v16, %v1411_v38  ;;  %v1418_v10 = vshrl.u32 %v5315_v60, %v4011_v42  ;;  %v1420_v4 = vshll.u32 %v5315_v60, %v1411_v38 }
 0x11c   :  { %v1353_v9 = vsel %vm1351_vm5, %v1352_v41, %v3993_v2  ;;  %v1421_v24 = vshrl.u32 %v5311_v29, %v4011_v42  ;;  %v1426_v46 = vshll.u32 %v5312_v20, %v1411_v38  ;;  %v1427_v12 = vshrl.u32 %v5313_v48, %v4011_v42 }
 0x11d   :  { %2681 = vsinq.f32 %v3946_v3  ;;  %v4044_v26 = vmul.f32 %v964_v44, %v962_v49  ;;  %v1164_v17 = vsub.s32 4294967266, %v4016_v34  ;;  %v4048_v28 = vsub.s32 %v3957_v36, %v1254_v56 }
 0x11e   :  { %vm668_vm7 = vcmp.eq.s32.totalorder %v3897_v7, 0  ;;  %vm671_vm8 = vcmp.eq.s32.totalorder %v3897_v7, 2  ;;  %v1060_v2 = vor.u32 %v1059_v32, %v1058_v40  ;;  %v1064_v41 = vor.u32 4788187, %v1063_v53 }
 0x11f   :  { %v1144_v38 = vadd.s32 %v3696_v33, %v3709_v45  ;;  %v1425_v61 = vor.u32 %v1424_v43, %v1423_v59  ;;  %v4054_v1 = vadd.s32 %v1353_v9, %v1349_v27  ;;  %v1405_v3 = vor.u32 8388608, %v1404_v57 }
 0x120   :  { %v1416_v49 = vor.u32 %v1415_v51, %v1414_v39  ;;  %v1419_v44 = vor.u32 %v1418_v10, %v1417_v14  ;;  %vm774_vm9 = vcmp.eq.s32.totalorder %v3903_v58, 2  ;;  %vm884_vm10 = vcmp.lt.s32.totalorder %v2922_v0, 0 }
 0x121   :  { %v1422_v36 = vor.u32 %v1421_v24, %v1420_v4  ;;  %v1428_v56 = vor.u32 %v1427_v12, %v1426_v46  ;;  %vm1429_vm11 = vcmp.lt.s32.totalorder %v4025_v13, 1  ;;  %vm1432_vm12 = vcmp.lt.s32.totalorder %v4025_v13, 4 }
 0x122   :  { %vm771_vm13 = vcmp.eq.s32.totalorder %v3903_v58, 0  ;;  %v1160_v33 = vsub.s32 32, %v4016_v34  ;;  %v1165_v45 = vadd.s32 127, %v1164_v17  ;;  %v1257_v40 = vsub.s32 0, %v4048_v28 }
 0x123   :  { %vm1431_vm14 = vcmp.lt.s32.totalorder %v4025_v13, 3  ;;  %v772_v32 = vxor.u32 2147483648, %v3972_v6  ;;  %v966_v53 = vxor.u32 2147483648, %v4044_v26  ;;  %v1067_v27 = vcvt.s32.f32 %v1060_v2  ;;  %v4079_v10 = vpop.eup %2679 }
 0x124   :  { %v1438_v57 = vsel %vm1432_vm12, %v1425_v61, 920167782  ;;  %v5363_v39 = vand.u32 2147483647, %v2922_v0  ;;  %v1065_v43 = vand.u32 2147483647, %v1064_v41  ;;  %v1437_v51 = vsel %vm1429_vm11, %v1416_v49, %v1419_v44 }
 0x125   :  { %vm1430_vm15 = vcmp.lt.s32.totalorder %v4025_v13, 2  ;;  %v4077_v14 = vshll.u32 %v1405_v3, 8  ;;  %v1355_v4 = vadd.s32 536870912, %v4054_v1  ;;  %v1439_v9 = vsel %vm1431_vm14, %v1422_v36, %v1438_v57 }
 0x126   :  { %vm4070_vm6 = vcmp.le.f32.partialorder %v5363_v39, 0.7853982  ;;  %v1441_v24 = vsel %vm1429_vm11, %v1419_v44, %v1422_v36  ;;  %v1442_v46 = vsel %vm1432_vm12, %v1428_v56, 1326507024  ;;  %vm667_vm0 = vcmp.lt.s32.totalorder %v3897_v7, 2  ;;  %v5366_v39 = vld [vmem:[#allocation15_spill] sm:$0xff] }
 0x127   :  { %v1161_v12 = vshll.u32 %v3894_v11, %v4016_v34  ;;  %v1162_v17 = vshrl.u32 %v1144_v38, %v1160_v33  ;;  %v1166_v2 = vshll.u32 %v1165_v45, 23  ;;  %v2495_v41 = vmin.u32 %v1257_v40, %v4048_v28 }
 0x128   :  { %vm987_vm1 = vcmp.lt.s32.totalorder %v2924_v21, 0  ;;  %v1413_v3 = vshrl.u32 %v5320_v63, %v4011_v42  ;;  %v1440_v57 = vsel %vm1430_vm15, %v1437_v51, %v1439_v9  ;;  %v1443_v56 = vsel %vm1431_vm14, %v1425_v61, %v1442_v46 }
 0x129   :  { %v1503_v62 = vand.u32 2139095040, %v5366_v39  ;;  %vm770_vm2 = vcmp.lt.s32.totalorder %v3903_v58, 2  ;;  %v1434_v11 = vsel %vm1432_vm12, %v1422_v36, 2102212464  ;;  %v1444_v34 = vsel %vm1430_vm15, %v1441_v24, %v1443_v56 }
 0x12a   :  { %v4106_v38 = vmul.u32.u64.low %v4077_v14, %v1440_v57  ;;  %v4107_v33 = vmul.u32.u64.high %v4077_v14, %v1440_v57, %v4106_v38  ;;  %vm874_vm3 = vcmp.eq.s32.totalorder %v3905_v19, 0  ;;  %v4111_v42 = vshrl.u32 %v1355_v4, 30  ;;  %v2682_v46 = vpop.eup %2681 }
 0x12b   :  { %v4114_v61 = vmul.u32.u64.low %v4077_v14, %v1444_v34  ;;  %v4115_v45 = vmul.u32.u64.high %v4077_v14, %v1444_v34, %v4114_v61  ;;  %v1504_v40 = vshrl.u32 %v1503_v62, 23  ;;  %v670_v36 = vsel %vm668_vm7, %v3940_v23, %v669_v18 }
 0x12c   :  { %v5367_v51 = vxor.u32 2147483648, %v3940_v23  ;;  %vm877_vm5 = vcmp.eq.s32.totalorder %v3905_v19, 2  ;;  %v5368_v9 = vand.u32 2147483647, %v2924_v21  ;;  %v1068_v24 = vmul.f32 %v1067_v27, %v1065_v43 }
 0x12d   :  { %vm768_vm4 = vweird.f32 %v5341_v37  ;;  %v1259_v57 = vclz %v2495_v41  ;;  %v1433_v18 = vsel %vm1429_vm11, %v1413_v3, %v1416_v49  ;;  %v1435_v23 = vsel %vm1431_vm14, %v1419_v44, %v1434_v11  ;;  %v5376_v37 = vld [vmem:[#allocation16_spill] sm:$0xff] }
 0x12e   :  { %v673_v4 = vsel %vm671_vm8, %v5367_v51, %v3955_v8  ;;  %vm4131_vm12 = vcmp.le.f32.partialorder %v5368_v9, 0.7853982  ;;  %v2506_v8 = vadd.s32 4294967169, %v1504_v40  ;;  %v5371_v56 = vxor.u32 2147483648, %v3964_v30 }
 0x12f   :  { %vm873_vm7 = vcmp.lt.s32.totalorder %v3905_v19, 2  ;;  %v967_v27 = vsel %vm884_vm10, %v966_v53, %v4044_v26  ;;  %v1163_v43 = vor.u32 %v1162_v17, %v1161_v12  ;;  %v1167_v41 = vor.u32 4788187, %v1166_v2 }
 0x130   :  { %v776_v34 = vsel %vm774_vm9, %v5371_v56, %v3972_v6  ;;  %v773_v49 = vsel %vm771_vm13, %v3964_v30, %v772_v32  ;;  %v968_v44 = vsub.s32 4, %v3657_v50  ;;  %v1357_v3 = vshll.u32 %v4111_v42, 30 }
 0x131   :  { %v1510_v11 = vadd.s32 1, %v2506_v8  ;;  %v878_v61 = vxor.u32 2147483648, %v4079_v10  ;;  %v1069_v6 = vxor.u32 2147483648, %v1068_v24  ;;  %v1436_v40 = vsel %vm1430_vm15, %v1433_v18, %v1435_v23 }
 0x132   :  { %v1455_v51 = vadd.s32 1, %v4107_v33  ;;  %v970_v26 = vsel %vm4070_vm6, %v2922_v0, %v967_v27  ;;  %v2496_v53 = vadd.s32 4294967294, %v1259_v57  ;;  %vm1454_vm8 = vc.u32 %v4115_v45, %v4106_v38 }
 0x133   :  { %vm1511_vm9 = vcmp.gt.s32.totalorder %v1510_v11, 0  ;;  %v875_v30 = vxor.u32 2147483648, %v2682_v46  ;;  %v1168_v32 = vand.u32 2147483647, %v1167_v41  ;;  %v1170_v12 = vcvt.s32.f32 %v1163_v43 }
 0x134   :  { %v1512_v17 = vsel %vm1511_vm9, %v1510_v11, 0  ;;  %v674_v2 = vsel %vm667_vm0, %v670_v36, %v673_v4  ;;  %v969_v13 = vsel %vm884_vm10, %v968_v44, %v3657_v50  ;;  %v4169_v9 = vsub.s32 %v4054_v1, %v1357_v3 }
 0x135   :  { %v1452_v57 = vmul.u32 %v4077_v14, %v1436_v40  ;;  %2683 = vcosq.f32 %v970_v26  ;;  %v1070_v18 = vsel %vm987_vm1, %v1069_v6, %v1068_v24  ;;  %v1456_v23 = vsel %vm1454_vm8, %v1455_v51, %v4107_v33 }
 0x136   :  { %v1514_v8 = vand.u32 31, %v1512_v17  ;;  %v777_v7 = vsel %vm770_vm2, %v773_v49, %v776_v34  ;;  %2685 = vsinq.f32 %v970_v26  ;;  %v1071_v36 = vsub.s32 4, %v3747_v47 }
 0x137   :  { %vm2497_vm11 = vcmp.lt.s32.totalorder %v2496_v53, 0  ;;  %v876_v50 = vsel %vm874_vm3, %v4079_v10, %v875_v30  ;;  %v879_v1 = vsel %vm877_vm5, %v878_v61, %v2682_v46  ;;  %v971_v14 = vsel %vm4070_vm6, 0, %v969_v13  ;;  %v5375_v46 = vld [vmem:[#allocation12_spill] sm:$0xff] }
 0x138   :  { %v1171_v4 = vmul.f32 %v1170_v12, %v1168_v32  ;;  %vm5372_vm10 = vweird.f32 %v2842_v54  ;;  %v1073_v58 = vsel %vm4131_vm12, %v2924_v21, %v1070_v18  ;;  %v1360_v24 = vsub.s32 0, %v4169_v9 }
 0x139   :  { %v4187_v33 = vsel %vm5372_vm10, nan, %v674_v2  ;;  %v4193_v56 = vadd.s32 %v1456_v23, %v1452_v57  ;;  %v4197_v10 = vsel %vm768_vm4, nan, %v777_v7  ;;  %vm1090_vm13 = vcmp.lt.s32.totalorder %v5375_v46, 0 }
 0x13a   :  { %5373 = vst [vmem:[#allocation14_spill] sm:$0xff] %v4187_v33  ;;  %5374 = vst [vmem:[#allocation15_spill] sm:$0xff] %v4197_v10  ;;  %v4200_v59 = vsel %vm2497_vm11, 0, %v2496_v53  ;;  %v4202_v34 = vsub.s32 32, %v1514_v8  ;;  %v4206_v54 = vsel %vm873_vm7, %v876_v50, %v879_v1  ;;  %v4208_v27 = vand.u32 3, %v971_v14 }
 0x13b   :  { %v4213_v43 = vsel %vm987_vm1, %v1071_v36, %v3747_v47  ;;  %v1606_v41 = vand.u32 2139095040, %v5376_v37  ;;  %2687 = vcosq.f32 %v1073_v58  ;;  %v1172_v49 = vxor.u32 2147483648, %v1171_v4 }
 0x13c   :  { %v1247_v44 = vadd.s32 %v3880_v25, %v3877_v55  ;;  %v5286_v3 = vand.u32 2147483647, %v5366_v39  ;;  %v5377_v19 = vand.u32 2147483647, %v5375_v46  ;;  %v1267_v61 = vsub.s32 4294967266, %v4200_v59 }
 0x13d   :  { %v2499_v47 = vmin.u32 %v1360_v24, %v4169_v9  ;;  %v1458_v6 = vadd.s32 536870912, %v4193_v56  ;;  %v1526_v40 = vshll.u32 %v5311_v29, %v1514_v8  ;;  %v4229_v51 = vshrl.u32 %v1512_v17, 5 }
 0x13e   :  { %vm4221_vm14 = vcmp.le.f32.partialorder %v5377_v19, 0.7853982  ;;  %v1527_v55 = vshrl.u32 %v5312_v20, %v4202_v34  ;;  %v1529_v25 = vshll.u32 %v5312_v20, %v1514_v8  ;;  %v1530_v26 = vshrl.u32 %v5313_v48, %v4202_v34 }
 0x13f   :  { %v1263_v53 = vsub.s32 32, %v4200_v59  ;;  %v1517_v30 = vshll.u32 %v5320_v63, %v1514_v8  ;;  %v1520_v32 = vshll.u32 %v5314_v16, %v1514_v8  ;;  %v1607_v12 = vshrl.u32 %v1606_v41, 23 }
 0x140   :  { %vm871_vm6 = vweird.f32 %v5355_v31  ;;  %v1518_v17 = vshrl.u32 %v5314_v16, %v4202_v34  ;;  %v1521_v2 = vshrl.u32 %v5315_v60, %v4202_v34  ;;  %v1523_v13 = vshll.u32 %v5315_v60, %v1514_v8 }
 0x141   :  { %v1524_v57 = vshrl.u32 %v5311_v29, %v4202_v34  ;;  %vm977_vm15 = vcmp.eq.s32.totalorder %v4208_v27, 0  ;;  %vm980_vm0 = vcmp.eq.s32.totalorder %v4208_v27, 2  ;;  %2689 = vsinq.f32 %v1073_v58 }
 0x142   :  { %v1268_v18 = vadd.s32 127, %v1267_v61  ;;  %v1362_v23 = vclz %v2499_v47  ;;  %v1528_v7 = vor.u32 %v1527_v55, %v1526_v40  ;;  %v4249_v36 = vshrl.u32 %v1458_v6, 30  ;;  %v2684_v8 = vpop.eup %2683 }
 0x143   :  { %v1507_v50 = vand.u32 8388607, %v5286_v3  ;;  %v1531_v1 = vor.u32 %v1530_v26, %v1529_v25  ;;  %vm1535_vm1 = vcmp.lt.s32.totalorder %v4229_v51, 4  ;;  %v1074_v14 = vsel %vm4131_vm12, 0, %v4213_v43  ;;  %v2686_v19 = vpop.eup %2685  ;;  %v5380_v25 = vld [vmem:[#allocation39_spill] sm:$0xff] }
 0x144   :  { %v1173_v24 = vsel %vm1090_vm13, %v1172_v49, %v1171_v4  ;;  %v1264_v58 = vshll.u32 %v4048_v28, %v4200_v59  ;;  %v2510_v41 = vadd.s32 4294967169, %v1607_v12  ;;  %v1265_v61 = vshrl.u32 %v1247_v44, %v1263_v53 }
 0x145   :  { %v4261_v47 = vor.u32 %v1518_v17, %v1517_v30  ;;  %v4263_v6 = vor.u32 %v1521_v2, %v1520_v32  ;;  %v1525_v40 = vor.u32 %v1524_v57, %v1523_v13  ;;  %v1269_v55 = vshll.u32 %v1268_v18, 23 }
 0x146   :  { %vm1532_vm2 = vcmp.lt.s32.totalorder %v4229_v51, 1  ;;  %vm1534_vm3 = vcmp.lt.s32.totalorder %v4229_v51, 3  ;;  %v1541_v62 = vsel %vm1535_vm1, %v1528_v7, 920167782  ;;  %vm976_vm4 = vcmp.lt.s32.totalorder %v4208_v27, 2 }
 0x147   :  { %vm1193_vm5 = vcmp.lt.s32.totalorder %v2929_v22, 0  ;;  %v2500_v28 = vadd.s32 4294967294, %v1362_v23  ;;  %v1460_v4 = vshll.u32 %v4249_v36, 30  ;;  %v1508_v59 = vor.u32 8388608, %v1507_v50 }
 0x148   :  { %v1545_v43 = vsel %vm1535_vm1, %v1531_v1, 1326507024  ;;  %v978_v49 = vxor.u32 2147483648, %v2686_v19  ;;  %v981_v44 = vxor.u32 2147483648, %v2684_v8  ;;  %v1174_v26 = vsub.s32 4, %v5380_v25  ;;  %v2688_v17 = vpop.eup %2687 }
 0x149   :  { %v1613_v53 = vadd.s32 1, %v2510_v41  ;;  %v1176_v30 = vsel %vm4221_vm14, %v5375_v46, %v1173_v24  ;;  %vm1533_vm12 = vcmp.lt.s32.totalorder %v4229_v51, 2  ;;  %v1540_v32 = vsel %vm1532_vm2, %v4261_v47, %v4263_v6 }
 0x14a   :  { %v1542_v12 = vsel %vm1534_vm3, %v1525_v40, %v1541_v62  ;;  %vm974_vm7 = vweird.f32 %v2922_v0  ;;  %v5381_v2 = vand.u32 2147483647, %v2929_v22  ;;  %v1266_v57 = vor.u32 %v1265_v61, %v1264_v58 }
 0x14b   :  { %v1270_v18 = vor.u32 4788187, %v1269_v55  ;;  %v1544_v23 = vsel %vm1532_vm2, %v4263_v6, %v1525_v40  ;;  %v1546_v50 = vsel %vm1534_vm3, %v1528_v7, %v1545_v43  ;;  %vm2501_vm9 = vcmp.lt.s32.totalorder %v2500_v28, 0 }
 0x14c   :  { %vm4288_vm8 = vcmp.le.f32.partialorder %v5381_v2, 0.7853982  ;;  %v4298_v1 = vsub.s32 %v4193_v56, %v1460_v4  ;;  %v4300_v24 = vshll.u32 %v1508_v59, 8  ;;  %vm1614_vm11 = vcmp.gt.s32.totalorder %v1613_v53, 0 }
 0x14d   :  { %v4305_v41 = vsel %vm871_vm6, nan, %v4206_v54  ;;  %v4307_v58 = vand.u32 3, %v1074_v14  ;;  %v1277_v61 = vsub.s32 4, %v4004_v15  ;;  %v1543_v55 = vsel %vm1533_vm12, %v1540_v32, %v1542_v12 }
 0x14e   :  { %5384 = vst [vmem:[#allocation12_spill] sm:$0xff] %v4305_v41  ;;  %v979_v7 = vsel %vm977_vm15, %v2684_v8, %v978_v49  ;;  %v982_v56 = vsel %vm980_vm0, %v981_v44, %v2686_v19  ;;  %2691 = vcosq.f32 %v1176_v30  ;;  %v1547_v62 = vsel %vm1533_vm12, %v1544_v23, %v1546_v50  ;;  %v2690_v59 = vpop.eup %2689 }
 0x14f   :  { %v1175_v31 = vsel %vm1090_vm13, %v1174_v26, %v5380_v25  ;;  %v1273_v54 = vcvt.s32.f32 %v1266_v57  ;;  %v4321_v14 = vsel %vm2501_vm9, 0, %v2500_v28  ;;  %v1615_v4 = vsel %vm1614_vm11, %v1613_v53, 0 }
 0x150   :  { %v1271_v43 = vand.u32 2147483647, %v1270_v18  ;;  %v1463_v32 = vsub.s32 0, %v4298_v1  ;;  %v4325_v8 = vmul.u32.u64.low %v4300_v24, %v1543_v55  ;;  %v4326_v49 = vmul.u32.u64.high %v4300_v24, %v1543_v55, %v4325_v8 }
 0x151   :  { %v1278_v19 = vsel %vm1193_vm5, %v1277_v61, %v4004_v15  ;;  %v1516_v44 = vshrl.u32 %v5320_v63, %v4202_v34  ;;  %v4335_v28 = vmul.u32.u64.low %v4300_v24, %v1547_v62  ;;  %v4336_v25 = vmul.u32.u64.high %v4300_v24, %v1547_v62, %v4335_v28 }
 0x152   :  { %vm1080_vm10 = vcmp.eq.s32.totalorder %v4307_v58, 0  ;;  %v1370_v26 = vsub.s32 4294967266, %v4321_v14  ;;  %v1537_v53 = vsel %vm1535_vm1, %v1525_v40, 2102212464  ;;  %v1617_v12 = vand.u32 31, %v1615_v4 }
 0x153   :  { %v983_v2 = vsel %vm976_vm4, %v979_v7, %v982_v56  ;;  %v1081_v57 = vxor.u32 2147483648, %v2690_v59  ;;  %v1084_v15 = vxor.u32 2147483648, %v2688_v17  ;;  %v1177_v34 = vsel %vm4221_vm14, 0, %v1175_v31 }
 0x154   :  { %vm1083_vm13 = vcmp.eq.s32.totalorder %v4307_v58, 2  ;;  %v1274_v18 = vmul.f32 %v1273_v54, %v1271_v43  ;;  %v1280_v23 = vsel %vm4288_vm8, 0, %v1278_v19  ;;  %v2503_v50 = vmin.u32 %v1463_v32, %v4298_v1 }
 0x155   :  { %v1350_v40 = vadd.s32 %v3992_v52, %v3989_v5  ;;  %v1366_v61 = vsub.s32 32, %v4321_v14  ;;  %v1536_v27 = vsel %vm1532_vm2, %v1516_v44, %v4261_v47  ;;  %v1538_v11 = vsel %vm1534_vm3, %v4263_v6, %v1537_v53  ;;  %v5386_v44 = vld [vmem:[#allocation17_spill] sm:$0xff] }
 0x156   :  { %v4361_v55 = vsel %vm974_vm7, nan, %v983_v2  ;;  %v4363_v7 = vand.u32 3, %v1177_v34  ;;  %v1371_v56 = vadd.s32 127, %v1370_v26  ;;  %v4365_v62 = vsub.s32 32, %v1617_v12 }
 0x157   :  { %5385 = vst [vmem:[#allocation16_spill] sm:$0xff] %v4361_v55  ;;  %v4369_v5 = vsel %vm1080_vm10, %v2688_v17, %v1081_v57  ;;  %v4371_v52 = vsel %vm1083_vm13, %v1084_v15, %v2690_v59  ;;  %2693 = vsinq.f32 %v1176_v30  ;;  %v4373_v47 = vand.u32 3, %v1280_v23 }
 0x158   :  { %v1275_v31 = vxor.u32 2147483648, %v1274_v18  ;;  %v1465_v6 = vclz %v2503_v50  ;;  %v1539_v0 = vsel %vm1533_vm12, %v1536_v27, %v1538_v11  ;;  %v1558_v54 = vadd.s32 1, %v4326_v49 }
 0x159   :  { %v1367_v43 = vshll.u32 %v4169_v9, %v4321_v14  ;;  %v1368_v32 = vshrl.u32 %v1350_v40, %v1366_v61  ;;  %vm1557_vm14 = vc.u32 %v4336_v25, %v4325_v8  ;;  %v5288_v17 = vand.u32 2147483647, %v5376_v37 }
 0x15a   :  { %v1372_v59 = vshll.u32 %v1371_v56, 23  ;;  %v1629_v30 = vshll.u32 %v5311_v29, %v1617_v12  ;;  %v1630_v19 = vshrl.u32 %v5312_v20, %v4365_v62  ;;  %v1709_v51 = vand.u32 2139095040, %v5386_v44 }
 0x15b   :  { %v4387_v28 = vpop.eup %2691  ;;  %v1555_v26 = vmul.u32 %v4300_v24, %v1539_v0  ;;  %v4390_v53 = vshrl.u32 %v1615_v4, 5  ;;  %v1632_v9 = vshll.u32 %v5312_v20, %v1617_v12  ;;  %v1633_v14 = vshrl.u32 %v5313_v48, %v4365_v62 }
 0x15c   :  { %vm1186_vm6 = vcmp.eq.s32.totalorder %v4363_v7, 2  ;;  %v2504_v2 = vadd.s32 4294967294, %v1465_v6  ;;  %v1559_v57 = vsel %vm1557_vm14, %v1558_v54, %v4326_v49  ;;  %v1620_v15 = vshll.u32 %v5320_v63, %v1617_v12 }
 0x15d   :  { %v1623_v34 = vshll.u32 %v5314_v16, %v1617_v12  ;;  %v1621_v23 = vshrl.u32 %v5314_v16, %v4365_v62  ;;  %v1624_v24 = vshrl.u32 %v5315_v60, %v4365_v62  ;;  %v1626_v4 = vshll.u32 %v5315_v60, %v1617_v12 }
 0x15e   :  { %v1627_v50 = vshrl.u32 %v5311_v29, %v4365_v62  ;;  %v1187_v40 = vxor.u32 2147483648, %v4387_v28  ;;  %v1276_v49 = vsel %vm1193_vm5, %v1275_v31, %v1274_v18  ;;  %v1631_v61 = vor.u32 %v1630_v19, %v1629_v30 }
 0x15f   :  { %v1710_v27 = vshrl.u32 %v1709_v51, 23  ;;  %v4409_v11 = vadd.s32 %v1559_v57, %v1555_v26  ;;  %v1610_v56 = vand.u32 8388607, %v5288_v17  ;;  %v1634_v6 = vor.u32 %v1633_v14, %v1632_v9 }
 0x160   :  { %vm1638_vm15 = vcmp.lt.s32.totalorder %v4390_v53, 4  ;;  %v1369_v0 = vor.u32 %v1368_v32, %v1367_v43  ;;  %v1373_v12 = vor.u32 4788187, %v1372_v59  ;;  %vm2505_vm0 = vcmp.lt.s32.totalorder %v2504_v2, 0 }
 0x161   :  { %v2514_v54 = vadd.s32 4294967169, %v1710_v27  ;;  %v1279_v3 = vsel %vm4288_vm8, %v2929_v22, %v1276_v49  ;;  %v1622_v55 = vor.u32 %v1621_v23, %v1620_v15  ;;  %v1625_v18 = vor.u32 %v1624_v24, %v1623_v34 }
 0x162   :  { %v1628_v31 = vor.u32 %v1627_v50, %v1626_v4  ;;  %vm1635_vm1 = vcmp.lt.s32.totalorder %v4390_v53, 1  ;;  %vm1637_vm2 = vcmp.lt.s32.totalorder %v4390_v53, 3  ;;  %v1644_v30 = vsel %vm1638_vm15, %v1631_v61, 920167782 }
 0x163   :  { %v1716_v19 = vadd.s32 1, %v2514_v54  ;;  %v1468_v51 = vsel %vm2505_vm0, 0, %v2504_v2  ;;  %v1561_v43 = vadd.s32 536870912, %v4409_v11  ;;  %v1611_v32 = vor.u32 8388608, %v1610_v56 }
 0x164   :  { %v1648_v59 = vsel %vm1638_vm15, %v1634_v6, 1326507024  ;;  %v4424_v13 = vpop.eup %2693  ;;  %v1374_v26 = vand.u32 2147483647, %v1373_v12  ;;  %v1376_v9 = vcvt.s32.f32 %v1369_v0  ;;  %v1453_v14 = vadd.s32 %v4106_v38, %v4115_v45 }
 0x165   :  { %vm1717_vm3 = vcmp.gt.s32.totalorder %v1716_v19, 0  ;;  %v1469_v57 = vsub.s32 32, %v1468_v51  ;;  %vm1636_vm4 = vcmp.lt.s32.totalorder %v4390_v53, 2  ;;  %v1643_v2 = vsel %vm1635_vm1, %v1622_v55, %v1625_v18 }
 0x166   :  { %v1645_v15 = vsel %vm1637_vm2, %v1628_v31, %v1644_v30  ;;  %v1473_v34 = vsub.s32 4294967266, %v1468_v51  ;;  %v1647_v23 = vsel %vm1635_vm1, %v1625_v18, %v1628_v31  ;;  %v1649_v24 = vsel %vm1637_vm2, %v1631_v61, %v1648_v59 }
 0x167   :  { %v1718_v4 = vsel %vm1717_vm3, %v1716_v19, 0  ;;  %v4441_v45 = vsel %vm1186_vm6, %v1187_v40, %v4424_v13  ;;  %v4443_v50 = vshrl.u32 %v1561_v43, 30  ;;  %v4445_v49 = vshll.u32 %v1611_v32, 8 }
 0x168   :  { %2695 = vcosq.f32 %v1279_v3  ;;  %v1646_v27 = vsel %vm1636_vm4, %v1643_v2, %v1645_v15  ;;  %v5287_v56 = vand.u32 2147483647, %v5386_v44  ;;  %v1720_v6 = vand.u32 31, %v1718_v4 }
 0x169   :  { %2697 = vsinq.f32 %v1279_v3  ;;  %v4450_v61 = vmul.f32 %v1376_v9, %v1374_v26  ;;  %v1380_v0 = vsub.s32 4, %v4111_v42  ;;  %v1650_v40 = vsel %vm1636_vm4, %v1647_v23, %v1649_v24  ;;  %v5388_v24 = vld [vmem:[#allocation18_spill] sm:$0xff] }
 0x16a   :  { %v1470_v12 = vshll.u32 %v4298_v1, %v1468_v51  ;;  %v1471_v54 = vshrl.u32 %v1453_v14, %v1469_v57  ;;  %v1474_v30 = vadd.s32 127, %v1473_v34  ;;  %v4456_v19 = vsub.s32 32, %v1720_v6  ;;  %v5387_v14 = vld [vmem:[#allocation13_spill] sm:$0xff] }
 0x16b   :  { %v1563_v43 = vshll.u32 %v4443_v50, 30  ;;  %v1619_v32 = vshrl.u32 %v5320_v63, %v4365_v62  ;;  %v4462_v3 = vmul.u32.u64.low %v4445_v49, %v1646_v27  ;;  %v4463_v59 = vmul.u32.u64.high %v4445_v49, %v1646_v27, %v4462_v3 }
 0x16c   :  { %v1640_v26 = vsel %vm1638_vm15, %v1628_v31, 2102212464  ;;  %v4469_v9 = vmul.u32.u64.low %v4445_v49, %v1650_v40  ;;  %v4470_v1 = vmul.u32.u64.high %v4445_v49, %v1650_v40, %v4469_v9  ;;  %v1713_v51 = vand.u32 8388607, %v5287_v56 }
 0x16d   :  { %vm1296_vm5 = vcmp.lt.s32.totalorder %v5387_v14, 0  ;;  %v1723_v57 = vshll.u32 %v5320_v63, %v1720_v6  ;;  %v1724_v62 = vshrl.u32 %v5314_v16, %v4456_v19  ;;  %v1726_v2 = vshll.u32 %v5314_v16, %v1720_v6 }
 0x16e   :  { %v1727_v15 = vshrl.u32 %v5315_v60, %v4456_v19  ;;  %v4481_v31 = vshrl.u32 %v1718_v4, 5  ;;  %v1729_v34 = vshll.u32 %v5315_v60, %v1720_v6  ;;  %v1730_v23 = vshrl.u32 %v5311_v29, %v4456_v19 }
 0x16f   :  { %v1812_v27 = vand.u32 2139095040, %v5388_v24  ;;  %v1378_v40 = vxor.u32 2147483648, %v4450_v61  ;;  %v4488_v9 = vor.u32 %v1471_v54, %v1470_v12  ;;  %v1475_v56 = vshll.u32 %v1474_v30, 23 }
 0x170   :  { %v1732_v17 = vshll.u32 %v5311_v29, %v1720_v6  ;;  %vm1183_vm12 = vcmp.eq.s32.totalorder %v4363_v7, 0  ;;  %v4493_v38 = vsub.s32 %v4409_v11, %v1563_v43  ;;  %v1639_v4 = vsel %vm1635_vm1, %v1619_v32, %v1622_v55 }
 0x171   :  { %v1641_v41 = vsel %vm1637_vm2, %v1625_v18, %v1640_v26  ;;  %v1733_v10 = vshrl.u32 %v5312_v20, %v4456_v19  ;;  %v1725_v33 = vor.u32 %v1724_v62, %v1723_v57  ;;  %v1728_v12 = vor.u32 %v1727_v15, %v1726_v2 }
 0x172   :  { %v1735_v54 = vshll.u32 %v5312_v20, %v1720_v6  ;;  %v1736_v30 = vshrl.u32 %v5313_v48, %v4456_v19  ;;  %v5389_v44 = vand.u32 2147483647, %v5387_v14  ;;  %v1714_v55 = vor.u32 8388608, %v1713_v51 }
 0x173   :  { %v1731_v43 = vor.u32 %v1730_v23, %v1729_v34  ;;  %vm1738_vm8 = vcmp.lt.s32.totalorder %v4481_v31, 1  ;;  %v1813_v18 = vshrl.u32 %v1812_v27, 23  ;;  %v1476_v32 = vor.u32 4788187, %v1475_v56 }
 0x174   :  { %vm4506_vm7 = vcmp.le.f32.partialorder %v5389_v44, 0.7853982  ;;  %v1734_v26 = vor.u32 %v1733_v10, %v1732_v17  ;;  %v1737_v57 = vor.u32 %v1736_v30, %v1735_v54  ;;  %vm1740_vm9 = vcmp.lt.s32.totalorder %v4481_v31, 3 }
 0x175   :  { %vm1079_vm11 = vcmp.lt.s32.totalorder %v4307_v58, 2  ;;  %vm1182_vm10 = vcmp.lt.s32.totalorder %v4363_v7, 2  ;;  %v1642_v44 = vsel %vm1636_vm4, %v1639_v4, %v1641_v41  ;;  %v1661_v6 = vadd.s32 1, %v4463_v59  ;;  %v2696_v51 = vpop.eup %2695 }
 0x176   :  { %vm1739_vm13 = vcmp.lt.s32.totalorder %v4481_v31, 2  ;;  %vm1741_vm14 = vcmp.lt.s32.totalorder %v4481_v31, 4  ;;  %v1566_v56 = vsub.s32 0, %v4493_v38  ;;  %vm1660_vm6 = vc.u32 %v4470_v1, %v4462_v3  ;;  %v2698_v53 = vpop.eup %2697 }
 0x177   :  { %v1746_v10 = vsel %vm1738_vm8, %v1725_v33, %v1728_v12  ;;  %v1747_v17 = vsel %vm1741_vm14, %v1734_v26, 920167782  ;;  %vm1286_vm15 = vcmp.eq.s32.totalorder %v4373_v47, 0  ;;  %vm1289_vm0 = vcmp.eq.s32.totalorder %v4373_v47, 2 }
 0x178   :  { %v1381_v41 = vsel %vm1296_vm5, %v1380_v0, %v4111_v42  ;;  %v1748_v62 = vsel %vm1740_vm9, %v1731_v43, %v1747_v17  ;;  %v4533_v2 = vshll.u32 %v1714_v55, 8  ;;  %v2518_v15 = vadd.s32 4294967169, %v1813_v18 }
 0x179   :  { %v1658_v34 = vmul.u32 %v4445_v49, %v1642_v44  ;;  %v1749_v23 = vsel %vm1739_vm13, %v1746_v10, %v1748_v62  ;;  %v1750_v27 = vsel %vm1738_vm8, %v1728_v12, %v1731_v43  ;;  %v1751_v4 = vsel %vm1741_vm14, %v1737_v57, 1326507024 }
 0x17a   :  { %v1379_v42 = vsel %vm1296_vm5, %v1378_v40, %v4450_v61  ;;  %v1479_v0 = vcvt.s32.f32 %v4488_v9  ;;  %v1662_v49 = vsel %vm1660_vm6, %v1661_v6, %v4463_v59  ;;  %v1752_v54 = vsel %vm1740_vm9, %v1734_v26, %v1751_v4 }
 0x17b   :  { %v1477_v30 = vand.u32 2147483647, %v1476_v32  ;;  %v2507_v55 = vmin.u32 %v1566_v56, %v4493_v38  ;;  %v1722_v18 = vshrl.u32 %v5320_v63, %v4456_v19  ;;  %v1753_v57 = vsel %vm1739_vm13, %v1750_v27, %v1752_v54 }
 0x17c   :  { %v1743_v61 = vsel %vm1741_vm14, %v1731_v43, 2102212464  ;;  %v4560_v40 = vmul.u32.u64.low %v4533_v2, %v1749_v23  ;;  %v4561_v9 = vmul.u32.u64.high %v4533_v2, %v1749_v23, %v4560_v40  ;;  %v1819_v59 = vadd.s32 1, %v2518_v15 }
 0x17d   :  { %v5392_v26 = vxor.u32 2147483648, %v4424_v13  ;;  %v4569_v44 = vadd.s32 %v1662_v49, %v1658_v34  ;;  %v4572_v19 = vmul.u32.u64.low %v4533_v2, %v1753_v57  ;;  %v4573_v6 = vmul.u32.u64.high %v4533_v2, %v1753_v57, %v4572_v19 }
 0x17e   :  { %v1287_v56 = vxor.u32 2147483648, %v2698_v53  ;;  %v1290_v43 = vxor.u32 2147483648, %v2696_v51  ;;  %v1383_v10 = vsel %vm4506_vm7, 0, %v1381_v41  ;;  %vm1399_vm1 = vcmp.lt.s32.totalorder %v5362_v35, 0 }
 0x17f   :  { %v1185_v32 = vsel %vm1183_vm12, %v4387_v28, %v5392_v26  ;;  %vm1820_vm2 = vcmp.gt.s32.totalorder %v1819_v59, 0  ;;  %v1382_v13 = vsel %vm4506_vm7, %v5387_v14, %v1379_v42  ;;  %v1742_v28 = vsel %vm1738_vm8, %v1722_v18, %v1725_v33 }
 0x180   :  { %v1744_v17 = vsel %vm1740_vm9, %v1728_v12, %v1743_v61  ;;  %v1821_v62 = vsel %vm1820_vm2, %v1819_v59, 0  ;;  %v1480_v15 = vmul.f32 %v1479_v0, %v1477_v30  ;;  %v1568_v34 = vclz %v2507_v55 }
 0x181   :  { %v5292_v23 = vand.u32 2147483647, %v5388_v24  ;;  %v1823_v27 = vand.u32 31, %v1821_v62  ;;  %v4590_v41 = vsel %vm1079_vm11, %v4369_v5, %v4371_v52  ;;  %v4595_v11 = vsel %vm1182_vm10, %v1185_v32, %v4441_v45 }
 0x182   :  { %v5393_v33 = vand.u32 2147483647, %v5362_v35  ;;  %v1664_v4 = vadd.s32 536870912, %v4569_v44  ;;  %2699 = vcosq.f32 %v1382_v13  ;;  %v4604_v42 = vand.u32 3, %v1383_v10  ;;  %v5396_v10 = vld [vmem:[#allocation19_spill] sm:$0xff] }
 0x183   :  { %v1745_v58 = vsel %vm1739_vm13, %v1742_v28, %v1744_v17  ;;  %v1824_v5 = vsub.s32 32, %v1823_v27  ;;  %v4610_v7 = vsel %vm1286_vm15, %v2696_v51, %v1287_v56  ;;  %v4614_v52 = vsel %vm1289_vm0, %v1290_v43, %v2698_v53 }
 0x184   :  { %vm4599_vm3 = vcmp.le.f32.partialorder %v5393_v33, 0.7853982  ;;  %2701 = vsinq.f32 %v1382_v13  ;;  %v1483_v45 = vsub.s32 4, %v4249_v36  ;;  %v1481_v0 = vxor.u32 2147483648, %v1480_v15 }
 0x185   :  { %v2508_v49 = vadd.s32 4294967294, %v1568_v34  ;;  %v1764_v54 = vadd.s32 1, %v4561_v9  ;;  %v1816_v31 = vand.u32 8388607, %v5292_v23  ;;  %v4620_v30 = vshrl.u32 %v1664_v4, 30 }
 0x186   :  { %v1761_v55 = vmul.u32 %v4533_v2, %v1745_v58  ;;  %vm1763_vm4 = vc.u32 %v4573_v6, %v4560_v40  ;;  %v1826_v51 = vshll.u32 %v5320_v63, %v1823_v27  ;;  %v1827_v53 = vshrl.u32 %v5314_v16, %v1824_v5 }
 0x187   :  { %v1829_v18 = vshll.u32 %v5314_v16, %v1823_v27  ;;  %v1830_v57 = vshrl.u32 %v5315_v60, %v1824_v5  ;;  %v1835_v61 = vshll.u32 %v5311_v29, %v1823_v27  ;;  %v1822_v59 = vshrl.u32 %v1821_v62, 5 }
 0x188   :  { %v1832_v26 = vshll.u32 %v5315_v60, %v1823_v27  ;;  %v1833_v32 = vshrl.u32 %v5311_v29, %v1824_v5  ;;  %v1836_v2 = vshrl.u32 %v5312_v20, %v1824_v5  ;;  %v1765_v19 = vsel %vm1763_vm4, %v1764_v54, %v4561_v9 }
 0x189   :  { %v1838_v56 = vshll.u32 %v5312_v20, %v1823_v27  ;;  %v1839_v43 = vshrl.u32 %v5313_v48, %v1824_v5  ;;  %v1915_v13 = vand.u32 2139095040, %v5396_v10  ;;  %v1482_v28 = vsel %vm1399_vm1, %v1481_v0, %v1480_v15 }
 0x18a   :  { %v1484_v17 = vsel %vm1399_vm1, %v1483_v45, %v4249_v36  ;;  %v1666_v62 = vshll.u32 %v4620_v30, 30  ;;  %v1817_v34 = vor.u32 8388608, %v1816_v31  ;;  %vm1285_vm5 = vcmp.lt.s32.totalorder %v4373_v47, 2 }
 0x18b   :  { %vm2509_vm12 = vcmp.lt.s32.totalorder %v2508_v49, 0  ;;  %v1828_v9 = vor.u32 %v1827_v53, %v1826_v51  ;;  %v1831_v33 = vor.u32 %v1830_v57, %v1829_v18  ;;  %v1837_v27 = vor.u32 %v1836_v2, %v1835_v61 }
 0x18c   :  { %v4644_v4 = vadd.s32 %v1765_v19, %v1761_v55  ;;  %v1825_v58 = vshrl.u32 %v5320_v63, %v1824_v5  ;;  %v1834_v54 = vor.u32 %v1833_v32, %v1832_v26  ;;  %vm1841_vm7 = vcmp.lt.s32.totalorder %v1822_v59, 1 }
 0x18d   :  { %v1485_v15 = vsel %vm4599_vm3, %v5362_v35, %v1482_v28  ;;  %v1840_v36 = vor.u32 %v1839_v43, %v1838_v56  ;;  %vm1844_vm8 = vcmp.lt.s32.totalorder %v1822_v59, 4  ;;  %v1916_v45 = vshrl.u32 %v1915_v13, 23 }
 0x18e   :  { %v4650_v0 = vsel %vm2509_vm12, 0, %v2508_v49  ;;  %v4653_v31 = vsub.s32 %v4569_v44, %v1666_v62  ;;  %vm1843_vm9 = vcmp.lt.s32.totalorder %v1822_v59, 3  ;;  %v1857_v51 = vshll.u32 %v1817_v34, 8 }
 0x18f   :  { %vm1842_vm11 = vcmp.lt.s32.totalorder %v1822_v59, 2  ;;  %v1846_v55 = vsel %vm1844_vm8, %v1834_v54, 2102212464  ;;  %v1849_v5 = vsel %vm1841_vm7, %v1828_v9, %v1831_v33  ;;  %v1850_v53 = vsel %vm1844_vm8, %v1837_v27, 920167782  ;;  %v2700_v18 = vpop.eup %2699 }
 0x190   :  { %vm1077_vm10 = vweird.f32 %v2924_v21  ;;  %vm1180_vm13 = vweird.f32 %v5375_v46  ;;  %2703 = vcosq.f32 %v1485_v15  ;;  %v1767_v49 = vadd.s32 536870912, %v4644_v4 }
 0x191   :  { %v1845_v44 = vsel %vm1841_vm7, %v1825_v58, %v1828_v9  ;;  %v1853_v57 = vsel %vm1841_vm7, %v1831_v33, %v1834_v54  ;;  %v2702_v61 = vpop.eup %2701  ;;  %vm1283_vm14 = vweird.f32 %v2929_v22  ;;  %vm1389_vm6 = vcmp.eq.s32.totalorder %v4604_v42, 0 }
 0x192   :  { %vm1392_vm15 = vcmp.eq.s32.totalorder %v4604_v42, 2  ;;  %v1847_v26 = vsel %vm1843_vm9, %v1831_v33, %v1846_v55  ;;  %v1851_v32 = vsel %vm1843_vm9, %v1834_v54, %v1850_v53  ;;  %v1854_v2 = vsel %vm1844_vm8, %v1840_v36, 1326507024 }
 0x193   :  { %v2522_v19 = vadd.s32 4294967169, %v1916_v45  ;;  %v1576_v56 = vsub.s32 4294967266, %v4650_v0  ;;  %v1669_v43 = vsub.s32 0, %v4653_v31  ;;  %v1852_v13 = vsel %vm1842_vm11, %v1849_v5, %v1851_v32 }
 0x194   :  { %v1855_v28 = vsel %vm1843_vm9, %v1837_v27, %v1854_v2  ;;  %v1486_v62 = vsel %vm4599_vm3, 0, %v1484_v17  ;;  %v4676_v9 = vmul.u32.u64.low %v1857_v51, %v1852_v13  ;;  %v4677_v33 = vmul.u32.u64.high %v1857_v51, %v1852_v13, %v4676_v9 }
 0x195   :  { %v1856_v34 = vsel %vm1842_vm11, %v1853_v57, %v1855_v28  ;;  %v1848_v58 = vsel %vm1842_vm11, %v1845_v44, %v1847_v26  ;;  %v1922_v45 = vadd.s32 1, %v2522_v19  ;;  %2705 = vsinq.f32 %v1485_v15 }
 0x196   :  { %v4681_v54 = vmul.u32.u64.low %v1857_v51, %v1856_v34  ;;  %v4682_v36 = vmul.u32.u64.high %v1857_v51, %v1856_v34, %v4681_v54  ;;  %v1556_v55 = vadd.s32 %v4325_v8, %v4336_v25  ;;  %v1572_v27 = vsub.s32 32, %v4650_v0 }
 0x197   :  { %v4687_v12 = vshrl.u32 %v1767_v49, 30  ;;  %v1292_v17 = vsel %vm1285_vm5, %v4610_v7, %v4614_v52  ;;  %v1577_v5 = vadd.s32 127, %v1576_v56  ;;  %v2511_v59 = vmin.u32 %v1669_v43, %v4653_v31 }
 0x198   :  { %vm1923_vm0 = vcmp.gt.s32.totalorder %v1922_v45, 0  ;;  %v4694_v53 = vand.u32 3, %v1486_v62  ;;  %v1864_v44 = vmul.u32 %v1857_v51, %v1848_v58  ;;  %v1867_v15 = vadd.s32 1, %v4677_v33 }
 0x199   :  { %v1924_v57 = vsel %vm1923_vm0, %v1922_v45, 0  ;;  %v1390_v8 = vxor.u32 2147483648, %v2702_v61  ;;  %v1393_v25 = vxor.u32 2147483648, %v2700_v18  ;;  %v1573_v49 = vshll.u32 %v4493_v38, %v4650_v0 }
 0x19a   :  { %v1586_v26 = vsub.s32 4, %v4443_v50  ;;  %v1574_v32 = vshrl.u32 %v1556_v55, %v1572_v27  ;;  %v1769_v47 = vshll.u32 %v4687_v12, 30  ;;  %vm1866_vm1 = vc.u32 %v4682_v36, %v4676_v9 }
 0x19b   :  { %v1926_v7 = vand.u32 31, %v1924_v57  ;;  %v1578_v52 = vshll.u32 %v1577_v5, 23  ;;  %v1671_v2 = vclz %v2511_v59  ;;  %v1868_v51 = vsel %vm1866_vm1, %v1867_v15, %v4677_v33 }
 0x19c   :  { %v5290_v19 = vand.u32 2147483647, %v5396_v10  ;;  %v4708_v56 = vsel %vm1077_vm10, nan, %v4590_v41  ;;  %v4713_v38 = vsel %vm1180_vm13, nan, %v4595_v11  ;;  %v4715_v0 = vadd.s32 %v1868_v51, %v1864_v44 }
 0x19d   :  { %v1927_v43 = vsub.s32 32, %v1926_v7  ;;  %v4719_v13 = vsel %vm1283_vm14, nan, %v1292_v17  ;;  %v4723_v28 = vsel %vm1389_vm6, %v2700_v18, %v1390_v8  ;;  %v4727_v21 = vsel %vm1392_vm15, %v1393_v25, %v2702_v61  ;;  %v4730_v46 = vpop.eup %2703 }
 0x19e   :  { %vm1502_vm2 = vcmp.lt.s32.totalorder %v5366_v39, 0  ;;  %vm1495_vm3 = vcmp.eq.s32.totalorder %v4694_v53, 2  ;;  %v1575_v41 = vor.u32 %v1574_v32, %v1573_v49  ;;  %v4740_v11 = vadd.s32 %v4462_v3, %v4470_v1 }
 0x19f   :  { %v4736_v22 = vsel %vm1502_vm2, %v1586_v26, %v4443_v50  ;;  %v4743_v18 = vsub.s32 %v4644_v4, %v1769_v47  ;;  %v1579_v61 = vor.u32 4788187, %v1578_v52  ;;  %v2512_v62 = vadd.s32 4294967294, %v1671_v2  ;;  %v5397_v2 = vld [vmem:[#allocation20_spill] sm:$0xff] }
 0x1a0   :  { %v1919_v34 = vand.u32 8388607, %v5290_v19  ;;  %v1929_v33 = vshll.u32 %v5320_v63, %v1926_v7  ;;  %v1870_v58 = vadd.s32 536870912, %v4715_v0  ;;  %v1930_v54 = vshrl.u32 %v5314_v16, %v1927_v43 }
 0x1a1   :  { %v1932_v50 = vshll.u32 %v5314_v16, %v1926_v7  ;;  %v1933_v45 = vshrl.u32 %v5315_v60, %v1927_v43  ;;  %v1496_v3 = vxor.u32 2147483648, %v4730_v46  ;;  %v1925_v1 = vshrl.u32 %v1924_v57, 5 }
 0x1a2   :  { %v1935_v4 = vshll.u32 %v5315_v60, %v1926_v7  ;;  %v1936_v55 = vshrl.u32 %v5311_v29, %v1927_v43  ;;  %v1582_v27 = vcvt.s32.f32 %v1575_v41  ;;  %v1772_v17 = vsub.s32 0, %v4743_v18  ;;  %v2706_v44 = vpop.eup %2705 }
 0x1a3   :  { %v1938_v5 = vshll.u32 %v5311_v29, %v1926_v7  ;;  %v1939_v59 = vshrl.u32 %v5312_v20, %v1927_v43  ;;  %v1580_v15 = vand.u32 2147483647, %v1579_v61  ;;  %vm2513_vm4 = vcmp.lt.s32.totalorder %v2512_v62, 0 }
 0x1a4   :  { %v1941_v8 = vshll.u32 %v5312_v20, %v1926_v7  ;;  %v1942_v25 = vshrl.u32 %v5313_v48, %v1927_v43  ;;  %vm1492_vm5 = vcmp.eq.s32.totalorder %v4694_v53, 0  ;;  %v4761_v57 = vshrl.u32 %v1870_v58, 30 }
 0x1a5   :  { %v1920_v49 = vor.u32 8388608, %v1919_v34  ;;  %v1931_v26 = vor.u32 %v1930_v54, %v1929_v33  ;;  %v1934_v32 = vor.u32 %v1933_v45, %v1932_v50  ;;  %vm1388_vm12 = vcmp.lt.s32.totalorder %v4604_v42, 2 }
 0x1a6   :  { %v1937_v47 = vor.u32 %v1936_v55, %v1935_v4  ;;  %v1940_v52 = vor.u32 %v1939_v59, %v1938_v5  ;;  %vm1944_vm7 = vcmp.lt.s32.totalorder %v1925_v1, 1  ;;  %v2018_v51 = vand.u32 2139095040, %v5397_v2 }
 0x1a7   :  { %v1493_v41 = vxor.u32 2147483648, %v2706_v44  ;;  %v2515_v61 = vmin.u32 %v1772_v17, %v4743_v18  ;;  %v1928_v7 = vshrl.u32 %v5320_v63, %v1927_v43  ;;  %vm1947_vm8 = vcmp.lt.s32.totalorder %v1925_v1, 4 }
 0x1a8   :  { %vm1491_vm9 = vcmp.lt.s32.totalorder %v4694_v53, 2  ;;  %v4769_v58 = vsel %vm2513_vm4, 0, %v2512_v62  ;;  %v1943_v34 = vor.u32 %v1942_v25, %v1941_v8  ;;  %vm1946_vm11 = vcmp.lt.s32.totalorder %v1925_v1, 3 }
 0x1a9   :  { %v1949_v33 = vsel %vm1947_vm8, %v1937_v47, 2102212464  ;;  %v5398_v54 = vand.u32 2147483647, %v5366_v39  ;;  %v1872_v45 = vshll.u32 %v4761_v57, 30  ;;  %vm1945_vm13 = vcmp.lt.s32.totalorder %v1925_v1, 2 }
 0x1aa   :  { %v1952_v43 = vsel %vm1944_vm7, %v1931_v26, %v1934_v32  ;;  %v1960_v4 = vshll.u32 %v1920_v49, 8  ;;  %vm1386_vm14 = vweird.f32 %v5387_v14  ;;  %v1497_v62 = vsel %vm1495_vm3, %v1496_v3, %v2706_v44 }
 0x1ab   :  { %vm4774_vm10 = vcmp.le.f32.partialorder %v5398_v54, 0.7853982  ;;  %v1583_v55 = vmul.f32 %v1582_v27, %v1580_v15  ;;  %vm1605_vm6 = vcmp.lt.s32.totalorder %v5376_v37, 0  ;;  %v1953_v17 = vsel %vm1947_vm8, %v1940_v52, 920167782 }
 0x1ac   :  { %v2019_v5 = vshrl.u32 %v2018_v51, 23  ;;  %v1774_v59 = vclz %v2515_v61  ;;  %v1948_v8 = vsel %vm1944_vm7, %v1928_v7, %v1931_v26  ;;  %v1950_v25 = vsel %vm1946_vm11, %v1934_v32, %v1949_v33 }
 0x1ad   :  { %v1954_v54 = vsel %vm1946_vm11, %v1937_v47, %v1953_v17  ;;  %vm1489_vm15 = vweird.f32 %v5362_v35  ;;  %v1679_v49 = vsub.s32 4294967266, %v4769_v58  ;;  %v1956_v3 = vsel %vm1944_vm7, %v1934_v32, %v1937_v47 }
 0x1ae   :  { %v1955_v19 = vsel %vm1945_vm13, %v1952_v43, %v1954_v54  ;;  %v1957_v27 = vsel %vm1947_vm8, %v1943_v34, 1326507024  ;;  %v4794_v44 = vsub.s32 %v4715_v0, %v1872_v45  ;;  %v5401_v61 = vand.u32 2147483647, %v5376_v37 }
 0x1af   :  { %v1958_v15 = vsel %vm1946_vm11, %v1940_v52, %v1957_v27  ;;  %v4797_v26 = vmul.u32.u64.low %v1960_v4, %v1955_v19  ;;  %v4798_v51 = vmul.u32.u64.high %v1960_v4, %v1955_v19, %v4797_v26  ;;  %v1675_v33 = vsub.s32 32, %v4769_v58 }
 0x1b0   :  { %vm4803_vm0 = vcmp.le.f32.partialorder %v5401_v61, 0.7853982  ;;  %v1951_v32 = vsel %vm1945_vm13, %v1948_v8, %v1950_v25  ;;  %v1959_v47 = vsel %vm1945_vm13, %v1956_v3, %v1958_v15  ;;  %v2526_v0 = vadd.s32 4294967169, %v2019_v5 }
 0x1b1   :  { %v1689_v34 = vsub.s32 4, %v4620_v30  ;;  %v2516_v52 = vadd.s32 4294967294, %v1774_v59  ;;  %v4811_v45 = vmul.u32.u64.low %v1960_v4, %v1959_v47  ;;  %v4812_v19 = vmul.u32.u64.high %v1960_v4, %v1959_v47, %v4811_v45 }
 0x1b2   :  { %v1494_v43 = vsel %vm1492_vm5, %v4730_v46, %v1493_v41  ;;  %v1584_v17 = vxor.u32 2147483648, %v1583_v55  ;;  %v1680_v54 = vadd.s32 127, %v1679_v49  ;;  %v2025_v27 = vadd.s32 1, %v2526_v0 }
 0x1b3   :  { %v1395_v1 = vsel %vm1388_vm12, %v4723_v28, %v4727_v21  ;;  %v1875_v5 = vsub.s32 0, %v4794_v44  ;;  %v1967_v8 = vmul.u32 %v1960_v4, %v1951_v32  ;;  %v1970_v59 = vadd.s32 1, %v4798_v51 }
 0x1b4   :  { %v1589_v25 = vsel %vm4774_vm10, 0, %v4736_v22  ;;  %v1676_v46 = vshll.u32 %v4653_v31, %v4769_v58  ;;  %v1677_v41 = vshrl.u32 %v4740_v11, %v1675_v33  ;;  %vm2026_vm1 = vcmp.gt.s32.totalorder %v2025_v27, 0 }
 0x1b5   :  { %v1498_v49 = vsel %vm1491_vm9, %v1494_v43, %v1497_v62  ;;  %v4834_v42 = vsel %vm1605_vm6, %v1689_v34, %v4620_v30  ;;  %vm2517_vm3 = vcmp.lt.s32.totalorder %v2516_v52, 0  ;;  %vm1969_vm4 = vc.u32 %v4812_v19, %v4797_v26 }
 0x1b6   :  { %v1585_v28 = vsel %vm1502_vm2, %v1584_v17, %v1583_v55  ;;  %v1681_v21 = vshll.u32 %v1680_v54, 23  ;;  %v1971_v31 = vsel %vm1969_vm4, %v1970_v59, %v4798_v51  ;;  %v2027_v22 = vsel %vm2026_vm1, %v2025_v27, 0  ;;  %v5404_v54 = vld [vmem:[#allocation21_spill] sm:$0xff] }
 0x1b7   :  { %v4843_v53 = vsel %vm1386_vm14, nan, %v1395_v1  ;;  %v2519_v11 = vmin.u32 %v1875_v5, %v4794_v44  ;;  %v1972_v58 = vadd.s32 %v1971_v31, %v1967_v8  ;;  %v5291_v30 = vand.u32 2147483647, %v5397_v2 }
 0x1b8   :  { %v4847_v4 = vand.u32 3, %v1589_v25  ;;  %v4849_v62 = vor.u32 %v1677_v41, %v1676_v46  ;;  %v4851_v3 = vsel %vm2517_vm3, 0, %v2516_v52  ;;  %v2029_v55 = vand.u32 31, %v2027_v22 }
 0x1b9   :  { %v4855_v15 = vsel %vm1489_vm15, nan, %v1498_v49  ;;  %v4860_v14 = vsel %vm4774_vm10, %v5366_v39, %v1585_v28  ;;  %v1973_v61 = vadd.s32 536870912, %v1972_v58  ;;  %v4865_v33 = vor.u32 4788187, %v1681_v21 }
 0x1ba   :  { %v1762_v32 = vadd.s32 %v4560_v40, %v4573_v6  ;;  %v1778_v47 = vsub.s32 32, %v4851_v3  ;;  %v2030_v35 = vsub.s32 32, %v2029_v55  ;;  %v1782_v0 = vsub.s32 4294967266, %v4851_v3 }
 0x1bb   :  { %v1877_v34 = vclz %v2519_v11  ;;  %v4871_v52 = vshrl.u32 %v1973_v61, 30  ;;  %v2022_v50 = vand.u32 8388607, %v5291_v30  ;;  %v1685_v45 = vcvt.s32.f32 %v4849_v62 }
 0x1bc   :  { %v1779_v43 = vshll.u32 %v4743_v18, %v4851_v3  ;;  %v2032_v17 = vshll.u32 %v5320_v63, %v2029_v55  ;;  %v2121_v40 = vand.u32 2139095040, %v5404_v54  ;;  %v2033_v27 = vshrl.u32 %v5314_v16, %v2030_v35 }
 0x1bd   :  { %v1975_v6 = vshll.u32 %v4871_v52, 30  ;;  %v2035_v1 = vshll.u32 %v5314_v16, %v2029_v55  ;;  %v2036_v5 = vshrl.u32 %v5315_v60, %v2030_v35  ;;  %v1780_v8 = vshrl.u32 %v1762_v32, %v1778_v47 }
 0x1be   :  { %v2028_v59 = vshrl.u32 %v2027_v22, 5  ;;  %v2038_v25 = vshll.u32 %v5315_v60, %v2029_v55  ;;  %v2039_v46 = vshrl.u32 %v5311_v29, %v2030_v35  ;;  %v1783_v41 = vadd.s32 127, %v1782_v0 }
 0x1bf   :  { %v2520_v18 = vadd.s32 4294967294, %v1877_v34  ;;  %v4886_v49 = vsub.s32 %v1972_v58, %v1975_v6  ;;  %v2023_v28 = vor.u32 8388608, %v2022_v50  ;;  %v2031_v21 = vshrl.u32 %v5320_v63, %v2030_v35 }
 0x1c0   :  { %v2041_v31 = vshll.u32 %v5311_v29, %v2029_v55  ;;  %v2042_v11 = vshrl.u32 %v5312_v20, %v2030_v35  ;;  %v2122_v3 = vshrl.u32 %v2121_v40, 23  ;;  %v2034_v32 = vor.u32 %v2033_v27, %v2032_v17 }
 0x1c1   :  { %v1978_v61 = vsub.s32 0, %v4886_v49  ;;  %v2037_v22 = vor.u32 %v2036_v5, %v2035_v1  ;;  %v2044_v47 = vshll.u32 %v5312_v20, %v2029_v55  ;;  %v2040_v30 = vor.u32 %v2039_v46, %v2038_v25 }
 0x1c2   :  { %v2043_v23 = vor.u32 %v2042_v11, %v2041_v31  ;;  %v2045_v0 = vshrl.u32 %v5313_v48, %v2030_v35  ;;  %vm2047_vm2 = vcmp.lt.s32.totalorder %v2028_v59, 1  ;;  %v1784_v58 = vshll.u32 %v1783_v41, 23 }
 0x1c3   :  { %vm2521_vm5 = vcmp.lt.s32.totalorder %v2520_v18, 0  ;;  %v2523_v34 = vmin.u32 %v1978_v61, %v4886_v49  ;;  %v2063_v50 = vshll.u32 %v2023_v28, 8  ;;  %vm2048_vm12 = vcmp.lt.s32.totalorder %v2028_v59, 2 }
 0x1c4   :  { %v2046_v6 = vor.u32 %v2045_v0, %v2044_v47  ;;  %vm2049_vm7 = vcmp.lt.s32.totalorder %v2028_v59, 3  ;;  %v2530_v40 = vadd.s32 4294967169, %v2122_v3  ;;  %vm2050_vm8 = vcmp.lt.s32.totalorder %v2028_v59, 4 }
 0x1c5   :  { %v1980_v51 = vclz %v2523_v34  ;;  %v2051_v17 = vsel %vm2047_vm2, %v2031_v21, %v2034_v32  ;;  %v2055_v27 = vsel %vm2047_vm2, %v2034_v32, %v2037_v22  ;;  %v2052_v1 = vsel %vm2050_vm8, %v2040_v30, 2102212464 }
 0x1c6   :  { %v2056_v55 = vsel %vm2050_vm8, %v2043_v23, 920167782  ;;  %v2059_v5 = vsel %vm2047_vm2, %v2037_v22, %v2040_v30  ;;  %v2060_v25 = vsel %vm2050_vm8, %v2046_v6, 1326507024  ;;  %v2053_v35 = vsel %vm2049_vm7, %v2037_v22, %v2052_v1 }
 0x1c7   :  { %v2524_v46 = vadd.s32 4294967294, %v1980_v51  ;;  %v2057_v31 = vsel %vm2049_vm7, %v2040_v30, %v2056_v55  ;;  %v2061_v41 = vsel %vm2049_vm7, %v2043_v23, %v2060_v25  ;;  %v1683_v11 = vand.u32 2147483647, %v4865_v33 }
 0x1c8   :  { %v2058_v28 = vsel %vm2048_vm12, %v2055_v27, %v2057_v31  ;;  %v2062_v61 = vsel %vm2048_vm12, %v2059_v5, %v2061_v41  ;;  %v2128_v47 = vadd.s32 1, %v2530_v40  ;;  %v1880_v3 = vsel %vm2521_vm5, 0, %v2520_v18 }
 0x1c9   :  { %v2054_v21 = vsel %vm2048_vm12, %v2051_v17, %v2053_v35  ;;  %v4900_v32 = vmul.u32.u64.low %v2063_v50, %v2062_v61  ;;  %v4901_v0 = vmul.u32.u64.high %v2063_v50, %v2062_v61, %v4900_v32  ;;  %vm2525_vm9 = vcmp.lt.s32.totalorder %v2524_v46, 0 }
 0x1ca   :  { %v4903_v34 = vmul.u32.u64.low %v2063_v50, %v2058_v28  ;;  %v4904_v51 = vmul.u32.u64.high %v2063_v50, %v2058_v28, %v4903_v34  ;;  %vm2129_vm11 = vcmp.gt.s32.totalorder %v2128_v47, 0  ;;  %v4907_v23 = vor.u32 %v1780_v8, %v1779_v43 }
 0x1cb   :  { %v4909_v30 = vor.u32 4788187, %v1784_v58  ;;  %v2118_v33 = vand.u32 2147483647, %v5404_v54  ;;  %v2130_v22 = vsel %vm2129_vm11, %v2128_v47, 0  ;;  %v1865_v59 = vadd.s32 %v4676_v9, %v4682_v36 }
 0x1cc   :  { %v1881_v18 = vsub.s32 32, %v1880_v3  ;;  %v1885_v6 = vsub.s32 4294967266, %v1880_v3  ;;  %v2132_v40 = vand.u32 31, %v2130_v22  ;;  %2707 = vcosq.f32 %v4860_v14 }
 0x1cd   :  { %v1983_v17 = vsel %vm2525_vm9, 0, %v2524_v46  ;;  %v2070_v27 = vmul.u32 %v2063_v50, %v2054_v21  ;;  %vm2072_vm10 = vc.u32 %v4901_v0, %v4903_v34  ;;  %2709 = vsinq.f32 %v4860_v14 }
 0x1ce   :  { %v4920_v43 = vmul.f32 %v1685_v45, %v1683_v11  ;;  %v2073_v8 = vadd.s32 1, %v4904_v51  ;;  %v2133_v58 = vsub.s32 32, %v2132_v40  ;;  %v1786_v9 = vand.u32 2147483647, %v4909_v30 }
 0x1cf   :  { %v1788_v36 = vcvt.s32.f32 %v4907_v23  ;;  %v1882_v1 = vshll.u32 %v4794_v44, %v1880_v3  ;;  %v2125_v50 = vand.u32 8388607, %v2118_v33  ;;  %v1883_v55 = vshrl.u32 %v1865_v59, %v1881_v18 }
 0x1d0   :  { %v1886_v5 = vadd.s32 127, %v1885_v6  ;;  %v1988_v25 = vsub.s32 4294967266, %v1983_v17  ;;  %v2074_v14 = vsel %vm2072_vm10, %v2073_v8, %v4904_v51  ;;  %v1968_v62 = vadd.s32 %v4797_v26, %v4812_v19 }
 0x1d1   :  { %v1984_v45 = vsub.s32 32, %v1983_v17  ;;  %v2075_v46 = vadd.s32 %v2074_v14, %v2070_v27  ;;  %v2135_v35 = vshll.u32 %v5320_v63, %v2132_v40  ;;  %v2136_v31 = vshrl.u32 %v5314_v16, %v2133_v58 }
 0x1d2   :  { %v2138_v41 = vshll.u32 %v5314_v16, %v2132_v40  ;;  %v2141_v44 = vshll.u32 %v5315_v60, %v2132_v40  ;;  %v2144_v11 = vshll.u32 %v5311_v29, %v2132_v40  ;;  %v2139_v61 = vshrl.u32 %v5315_v60, %v2133_v58 }
 0x1d3   :  { %v2076_v28 = vadd.s32 536870912, %v2075_v46  ;;  %v2142_v47 = vshrl.u32 %v5311_v29, %v2133_v58  ;;  %v2145_v3 = vshrl.u32 %v5312_v20, %v2133_v58  ;;  %v1989_v26 = vadd.s32 127, %v1988_v25 }
 0x1d4   :  { %v2131_v19 = vshrl.u32 %v2130_v22, 5  ;;  %v2147_v21 = vshll.u32 %v5312_v20, %v2132_v40  ;;  %v2148_v32 = vshrl.u32 %v5313_v48, %v2133_v58  ;;  %v1884_v51 = vor.u32 %v1883_v55, %v1882_v1  ;;  %v5405_v55 = vld [vmem:[#allocation17_spill] sm:$0xff] }
 0x1d5   :  { %v1887_v23 = vshll.u32 %v1886_v5, 23  ;;  %v4941_v16 = vshrl.u32 %v2076_v28, 30  ;;  %v2126_v30 = vor.u32 8388608, %v2125_v50  ;;  %v1985_v59 = vshll.u32 %v4886_v49, %v1983_v17 }
 0x1d6   :  { %v1986_v18 = vshrl.u32 %v1968_v62, %v1984_v45  ;;  %v2134_v60 = vshrl.u32 %v5320_v63, %v2133_v58  ;;  %v2146_v6 = vor.u32 %v2145_v3, %v2144_v11  ;;  %v2137_v27 = vor.u32 %v2136_v31, %v2135_v35 }
 0x1d7   :  { %v2078_v29 = vshll.u32 %v4941_v16, 30  ;;  %v2140_v8 = vor.u32 %v2139_v61, %v2138_v41  ;;  %v2143_v22 = vor.u32 %v2142_v47, %v2141_v44  ;;  %v1990_v25 = vshll.u32 %v1989_v26, 23 }
 0x1d8   :  { %v2149_v20 = vor.u32 %v2148_v32, %v2147_v21  ;;  %vm2150_vm13 = vcmp.lt.s32.totalorder %v2131_v19, 1  ;;  %vm2153_vm14 = vcmp.lt.s32.totalorder %v2131_v19, 4  ;;  %vm2152_vm15 = vcmp.lt.s32.totalorder %v2131_v19, 3 }
 0x1d9   :  { %v4946_v48 = vsub.s32 %v2075_v46, %v2078_v29  ;;  %v2155_v40 = vsel %vm2153_vm14, %v2143_v22, 2102212464  ;;  %v4949_v1 = vshll.u32 %v2126_v30, 8  ;;  %v4951_v49 = vpop.eup %2707  ;;  %v1888_v63 = vor.u32 4788187, %v1887_v23 }
 0x1da   :  { %v1987_v17 = vor.u32 %v1986_v18, %v1985_v59  ;;  %vm2151_vm1 = vcmp.lt.s32.totalorder %v2131_v19, 2  ;;  %v2159_v58 = vsel %vm2153_vm14, %v2146_v6, 920167782  ;;  %v2710_v50 = vpop.eup %2709  ;;  %vm1598_vm3 = vcmp.eq.s32.totalorder %v4847_v4, 2 }
 0x1db   :  { %vm1708_vm4 = vcmp.lt.s32.totalorder %v5405_v55, 0  ;;  %v2081_v5 = vsub.s32 0, %v4946_v48  ;;  %v2154_v14 = vsel %vm2150_vm13, %v2134_v60, %v2137_v27  ;;  %v2156_v62 = vsel %vm2152_vm15, %v2140_v8, %v2155_v40 }
 0x1dc   :  { %v2158_v45 = vsel %vm2150_vm13, %v2137_v27, %v2140_v8  ;;  %vm1595_vm2 = vcmp.eq.s32.totalorder %v4847_v4, 0  ;;  %v1991_v46 = vor.u32 4788187, %v1990_v25  ;;  %v2160_v35 = vsel %vm2152_vm15, %v2143_v22, %v2159_v58 }
 0x1dd   :  { %v2162_v31 = vsel %vm2150_vm13, %v2140_v8, %v2143_v22  ;;  %v2163_v41 = vsel %vm2153_vm14, %v2149_v20, 1326507024  ;;  %v1687_v44 = vxor.u32 2147483648, %v4920_v43  ;;  %v1789_v11 = vmul.f32 %v1788_v36, %v1786_v9 }
 0x1de   :  { %v1891_v28 = vcvt.s32.f32 %v1884_v51  ;;  %v2527_v61 = vmin.u32 %v2081_v5, %v4946_v48  ;;  %v5406_v47 = vand.u32 2147483647, %v5405_v55  ;;  %v1889_v26 = vand.u32 2147483647, %v1888_v63 }
 0x1df   :  { %v2157_v21 = vsel %vm2151_vm1, %v2154_v14, %v2156_v62  ;;  %v2161_v32 = vsel %vm2151_vm1, %v2158_v45, %v2160_v35  ;;  %v2164_v23 = vsel %vm2152_vm15, %v2146_v6, %v2163_v41  ;;  %vm1811_vm12 = vcmp.lt.s32.totalorder %v5388_v24, 0 }
 0x1e0   :  { %vm4968_vm5 = vcmp.le.f32.partialorder %v5406_v47, 0.7853982  ;;  %v2083_v30 = vclz %v2527_v61  ;;  %v2165_v9 = vsel %vm2151_vm1, %v2162_v31, %v2164_v23  ;;  %v1992_v59 = vand.u32 2147483647, %v1991_v46 }
 0x1e1   :  { %v4978_v36 = vmul.u32.u64.low %v4949_v1, %v2161_v32  ;;  %v4979_v51 = vmul.u32.u64.high %v4949_v1, %v2161_v32, %v4978_v36  ;;  %v1994_v18 = vcvt.s32.f32 %v1987_v17  ;;  %v1599_v27 = vxor.u32 2147483648, %v4951_v49 }
 0x1e2   :  { %v4983_v60 = vmul.u32.u64.low %v4949_v1, %v2165_v9  ;;  %v4984_v29 = vmul.u32.u64.high %v4949_v1, %v2165_v9, %v4983_v60  ;;  %v1688_v6 = vsel %vm1605_vm6, %v1687_v44, %v4920_v43  ;;  %v5409_v19 = vsel %vm4803_vm0, 0, %v4834_v42  ;;  %v5416_v9 = vld [vmem:[#allocation27_spill] sm:$0xff] }
 0x1e3   :  { %v4994_v8 = vand.u32 3, %v5409_v19  ;;  %v2528_v22 = vadd.s32 4294967294, %v2083_v30  ;;  %v1596_v25 = vxor.u32 2147483648, %v2710_v50  ;;  %v1790_v20 = vxor.u32 2147483648, %v1789_v11  ;;  %v5420_v19 = vld [vmem:[#allocation29_spill] sm:$0xff] }
 0x1e4   :  { %v1892_v40 = vmul.f32 %v1891_v28, %v1889_v26  ;;  %vm1914_vm7 = vcmp.lt.s32.totalorder %v5396_v10, 0  ;;  %v2173_v63 = vmul.u32 %v4949_v1, %v2157_v21  ;;  %v1792_v17 = vsub.s32 4, %v4687_v12 }
 0x1e5   :  { %v5410_v58 = vand.u32 2147483647, %v5388_v24  ;;  %v2071_v42 = vadd.s32 %v4903_v34, %v4901_v0  ;;  %vm2529_vm6 = vcmp.lt.s32.totalorder %v2528_v22, 0  ;;  %v2176_v5 = vadd.s32 1, %v4979_v51 }
 0x1e6   :  { %v1691_v14 = vsel %vm4803_vm0, %v5376_v37, %v1688_v6  ;;  %v1995_v62 = vmul.f32 %v1994_v18, %v1992_v59  ;;  %v2086_v1 = vsel %vm2529_vm6, 0, %v2528_v22  ;;  %vm2175_vm9 = vc.u32 %v4984_v29, %v4978_v36  ;;  %v5419_v18 = vld [vmem:[#allocation15_spill] sm:$0xff]  ;;  %v5421_v22 = vld [vmem:[#allocation12_spill] sm:$0xff] }
 0x1e7   :  { %vm5001_vm8 = vcmp.le.f32.partialorder %v5410_v58, 0.7853982  ;;  %v5413_v45 = vand.u32 2147483647, %v5396_v10  ;;  %v2087_v35 = vsub.s32 32, %v2086_v1  ;;  %v2088_v0 = vshll.u32 %v4946_v48, %v2086_v1 }
 0x1e8   :  { %v2091_v34 = vsub.s32 4294967266, %v2086_v1  ;;  %v2177_v31 = vsel %vm2175_vm9, %v2176_v5, %v4979_v51  ;;  %v5023_v7 = vsel %vm1598_vm3, %v1599_v27, %v2710_v50  ;;  %v1791_v41 = vsel %vm1708_vm4, %v1790_v20, %v1789_v11  ;;  %v5417_v51 = vld [vmem:[#allocation14_spill] sm:$0xff]  ;;  %v5425_v5 = vld [vmem:[#allocation32_spill] sm:$0xff] }
 0x1e9   :  { %vm5015_vm11 = vcmp.le.f32.partialorder %v5413_v45, 0.7853982  ;;  %v1893_v44 = vxor.u32 2147483648, %v1892_v40  ;;  %v2178_v28 = vadd.s32 %v2177_v31, %v2173_v63  ;;  %v5030_v61 = vsel %vm1595_vm2, %v4951_v49, %v1596_v25  ;;  %v5422_v20 = vld [vmem:[#allocation30_spill] sm:$0xff]  ;;  %v5423_v63 = vld [vmem:[#allocation16_spill] sm:$0xff] }
 0x1ea   :  { %2711 = vcosq.f32 %v1691_v14  ;;  %v2089_v47 = vshrl.u32 %v2071_v42, %v2087_v35  ;;  %v2092_v48 = vadd.s32 127, %v2091_v34  ;;  %v5035_v26 = vsel %vm1708_vm4, %v1792_v17, %v4687_v12  ;;  %v5418_v12 = vld [vmem:[#allocation28_spill] sm:$0xff]  ;;  %v5426_v35 = vld [vmem:[#allocation33_spill] sm:$0xff]  ;;  %v5427_v34 = vld [vmem:[#allocation34_spill] sm:$0xff] }
 0x1eb   :  { %2713 = vsinq.f32 %v1691_v14  ;;  %vm2017_vm0 = vcmp.lt.s32.totalorder %v5397_v2, 0  ;;  %v2179_v50 = vadd.s32 536870912, %v2178_v28  ;;  %v1794_v11 = vsel %vm4968_vm5, %v5405_v55, %v1791_v41 }
 0x1ec   :  { %v1996_v21 = vxor.u32 2147483648, %v1995_v62  ;;  %v2090_v32 = vor.u32 %v2089_v47, %v2088_v0  ;;  %v2093_v49 = vshll.u32 %v2092_v48, 23  ;;  %v1894_v23 = vsel %vm1811_vm12, %v1893_v44, %v1892_v40  ;;  %v5424_v40 = vld [vmem:[#allocation31_spill] sm:$0xff] }
 0x1ed   :  { %v5043_v30 = vshrl.u32 %v2179_v50, 30  ;;  %v2221_v59 = vmul.f32 %v5417_v51, %v5416_v9  ;;  %v2222_v60 = vmul.f32 %v5419_v18, %v5418_v12  ;;  %v2223_v25 = vmul.f32 %v5421_v22, %v5420_v19 }
 0x1ee   :  { %v2094_v27 = vor.u32 4788187, %v2093_v49  ;;  %v2097_v6 = vcvt.s32.f32 %v2090_v32  ;;  %v2224_v17 = vmul.f32 %v5423_v63, %v5422_v20  ;;  %2715 = vcosq.f32 %v1794_v11 }
 0x1ef   :  { %v2181_v58 = vshll.u32 %v5043_v30, 30  ;;  %v2225_v42 = vmul.f32 %v4708_v56, %v5424_v40  ;;  %v2226_v14 = vmul.f32 %v4713_v38, %v5425_v5  ;;  %v1997_v1 = vsel %vm1914_vm7, %v1996_v21, %v1995_v62 }
 0x1f0   :  { %v2095_v45 = vand.u32 2147483647, %v2094_v27  ;;  %v2227_v0 = vmul.f32 %v4719_v13, %v5426_v35  ;;  %v2228_v31 = vmul.f32 %v4843_v53, %v5427_v34  ;;  %2717 = vsinq.f32 %v1794_v11 }
 0x1f1   :  { %v1897_v41 = vsel %vm5001_vm8, %v5388_v24, %v1894_v23  ;;  %v5067_v44 = vsub.s32 %v2178_v28, %v2181_v58  ;;  %v2237_v56 = vmul.f32 0.1, %v2221_v59  ;;  %v2238_v38 = vmul.f32 0.1, %v2222_v60 }
 0x1f2   :  { %v2098_v47 = vmul.f32 %v2097_v6, %v2095_v45  ;;  %v2239_v48 = vmul.f32 0.1, %v2223_v25  ;;  %v2240_v50 = vmul.f32 0.1, %v2224_v17  ;;  %v2000_v62 = vsel %vm5015_vm11, %v5396_v10, %v1997_v1 }
 0x1f3   :  { %v2184_v13 = vsub.s32 0, %v5067_v44  ;;  %v2241_v21 = vmul.f32 0.1, %v2225_v42  ;;  %v2242_v53 = vmul.f32 0.1, %v2226_v14  ;;  %2719 = vcosq.f32 %v1897_v41 }
 0x1f4   :  { %v2099_v11 = vxor.u32 2147483648, %v2098_v47  ;;  %v2243_v32 = vmul.f32 0.1, %v2227_v0  ;;  %v2244_v49 = vmul.f32 0.1, %v2228_v31  ;;  %v1895_v28 = vsub.s32 4, %v4761_v57 }
 0x1f5   :  { %2721 = vsinq.f32 %v1897_v41  ;;  %v5428_v23 = vand.u32 2147483647, %v5397_v2  ;;  %v2531_v51 = vmin.u32 %v2184_v13, %v5067_v44  ;;  %v2253_v12 = vadd.f32 1.0, %v2237_v56 }
 0x1f6   :  { %2723 = vcosq.f32 %v2000_v62  ;;  %v2100_v59 = vsel %vm2017_vm0, %v2099_v11, %v2098_v47  ;;  %v2254_v18 = vadd.f32 1.0, %v2238_v38  ;;  %v2255_v6 = vadd.f32 1.0, %v2239_v48 }
 0x1f7   :  { %vm5076_vm10 = vcmp.le.f32.partialorder %v5428_v23, 0.7853982  ;;  %v5083_v60 = vpop.eup %2711  ;;  %v2186_v27 = vclz %v2531_v51  ;;  %v2256_v19 = vadd.f32 1.0, %v2240_v50  ;;  %v2257_v22 = vadd.f32 1.0, %v2241_v21 }
 0x1f8   :  { %v5085_v25 = vpop.eup %2713  ;;  %v2258_v20 = vadd.f32 1.0, %v2242_v53  ;;  %v2259_v63 = vadd.f32 1.0, %v2243_v32  ;;  %v2260_v17 = vadd.f32 1.0, %v2244_v49  ;;  %vm1701_vm13 = vcmp.eq.s32.totalorder %v4994_v8, 2 }
 0x1f9   :  { %2725 = vsinq.f32 %v2000_v62  ;;  %v2103_v58 = vsel %vm5076_vm10, %v5397_v2, %v2100_v59  ;;  %v2532_v40 = vadd.s32 4294967294, %v2186_v27  ;;  %v2786_v42 = vmov 1966171168  }
 0x1fa   :  { %v2292_v5 = vunpack.c.l.s4 %v2786_v42  ;;  %vm1698_vm14 = vcmp.eq.s32.totalorder %v4994_v8, 0  ;;  %v1795_v14 = vsel %vm4968_vm5, 0, %v5035_v26  ;;  %v1896_v1 = vsel %vm1811_vm12, %v1895_v28, %v4761_v57  ;;  %v5431_v57 = vld [vmem:[#allocation9_spill] sm:$0xff] }
 0x1fb   :  { %v1998_v45 = vsub.s32 4, %v4871_v52  ;;  %v2174_v35 = vadd.s32 %v4978_v36, %v4984_v29  ;;  %vm2533_vm15 = vcmp.lt.s32.totalorder %v2532_v40, 0  ;;  %v2287_v0 = vcombine.low %v2253_v12, %v2254_v18  ;;  %v5101_v41 = vpop.eup %2715 }
 0x1fc   :  { %v2288_v34 = vcombine.low %v2255_v6, %v2256_v19  ;;  %v2293_v31 = vunpack.c.0.s8 %v2292_v5  ;;  %2727 = vcosq.f32 %v2103_v58  ;;  %v2189_v56 = vsel %vm2533_vm15, 0, %v2532_v40 }
 0x1fd   :  { %v2289_v47 = vcombine.low %v2257_v22, %v2258_v20  ;;  %v2290_v3 = vcombine.low %v2259_v63, %v2260_v17  ;;  %v2190_v26 = vsub.s32 32, %v2189_v56  ;;  %v2191_v38 = vshll.u32 %v5067_v44, %v2189_v56  ;;  %v2718_v62 = vpop.eup %2717 }
 0x1fe   :  { %v2194_v48 = vsub.s32 4294967266, %v2189_v56  ;;  %v5105_v50 = vsub.s32 %v2293_v31, %v5431_v57  ;;  %v1702_v36 = vxor.u32 2147483648, %v5083_v60  ;;  %v5108_v29 = vand.u32 3, %v1795_v14  ;;  %v5436_v57 = vld [vmem:[#allocation24_spill] sm:$0xff] }
 0x1ff   :  { %v1898_v13 = vsel %vm5001_vm8, 0, %v1896_v1  ;;  %2729 = vsinq.f32 %v2103_v58  ;;  %vm1594_vm1 = vcmp.lt.s32.totalorder %v4847_v4, 2  ;;  %v2192_v21 = vshrl.u32 %v2174_v35, %v2190_v26  ;;  %v5432_v35 = vld [vmem:[#allocation22_spill] sm:$0xff] }
 0x200   :  { %v2195_v53 = vadd.s32 127, %v2194_v48  ;;  %v2297_v11 = vrot.slane %v2287_v0, %v5105_v50  ;;  %v2304_v44 = vrot.slane %v2288_v34, %v5105_v50  ;;  %v1699_v32 = vxor.u32 2147483648, %v5085_v25  ;;  %v2720_v23 = vpop.eup %2719 }
 0x201   :  { %v1999_v49 = vsel %vm1914_vm7, %v1998_v45, %v4871_v52  ;;  %v2311_v28 = vrot.slane %v2289_v47, %v5105_v50  ;;  %v2318_v43 = vrot.slane %v2290_v3, %v5105_v50  ;;  %vm1697_vm3 = vcmp.lt.s32.totalorder %v4994_v8, 2  ;;  %v2269_v45 = vld [vmem:[#allocation3] sm:$0xff]  ;;  %v5433_v47 = vld [vmem:[#allocation23_spill] sm:$0xff] }
 0x202   :  { %v2101_v51 = vsub.s32 4, %v4941_v16  ;;  %v2193_v59 = vor.u32 %v2192_v21, %v2191_v38  ;;  %v2196_v12 = vshll.u32 %v2195_v53, 23  ;;  %v2319_v18 = vcombine.low %v2297_v11, %v2304_v44  ;;  %v2722_v27 = vpop.eup %2721 }
 0x203   :  { %vm1800_vm4 = vcmp.lt.s32.totalorder %v5108_v29, 2  ;;  %vm1801_vm2 = vcmp.eq.s32.totalorder %v5108_v29, 0  ;;  %v1902_v6 = vand.u32 3, %v1898_v13  ;;  %v2320_v19 = vcombine.low %v2311_v28, %v2318_v43  ;;  %v2724_v52 = vpop.eup %2723 }
 0x204   :  { %v2001_v22 = vsel %vm5015_vm11, 0, %v1999_v49  ;;  %v2197_v20 = vor.u32 4788187, %v2196_v12  ;;  %v2200_v63 = vcvt.s32.f32 %v2193_v59  ;;  %v2327_v17 = vrot.slane %v2319_v18, %v5105_v50 }
 0x205   :  { %vm1592_vm5 = vweird.f32 %v5366_v39  ;;  %vm1695_vm12 = vweird.f32 %v5376_v37  ;;  %v1703_v58 = vsel %vm1701_vm13, %v1702_v36, %v5085_v25  ;;  %vm1804_vm7 = vcmp.eq.s32.totalorder %v5108_v29, 2 }
 0x206   :  { %v1805_v40 = vxor.u32 2147483648, %v5101_v41  ;;  %v2334_v42 = vrot.slane %v2320_v19, %v5105_v50  ;;  %v1700_v46 = vsel %vm1698_vm14, %v5083_v60, %v1699_v32  ;;  %vm1798_vm8 = vweird.f32 %v5405_v55  ;;  %v2726_v25 = vpop.eup %2725  ;;  %v5440_v19 = vld [vmem:[#allocation35_spill] sm:$0xff] }
 0x207   :  { %v1802_v5 = vxor.u32 2147483648, %v2718_v62  ;;  %v2102_v14 = vsel %vm2017_vm0, %v2101_v51, %v4941_v16  ;;  %v2198_v1 = vand.u32 2147483647, %v2197_v20  ;;  %vm533_vm6 = vcmp.eq.f32.partialorder %v5432_v35, 0.0 }
 0x208   :  { %vm1904_vm11 = vcmp.eq.s32.totalorder %v1902_v6, 0  ;;  %vm1907_vm13 = vcmp.eq.s32.totalorder %v1902_v6, 2  ;;  %v2005_v0 = vand.u32 3, %v2001_v22  ;;  %v2335_v34 = vcombine.low %v2327_v17, %v2334_v42  ;;  %v5441_v22 = vld [vmem:[#allocation36_spill] sm:$0xff] }
 0x209   :  { %v1905_v31 = vxor.u32 2147483648, %v2722_v27  ;;  %v1908_v60 = vxor.u32 2147483648, %v2720_v23  ;;  %vm2120_vm14 = vcmp.lt.s32.totalorder %v5404_v54, 0  ;;  %v2201_v56 = vmul.f32 %v2200_v63, %v2198_v1  ;;  %v2728_v48 = vpop.eup %2727  ;;  %v5442_v63 = vld [vmem:[#allocation38_spill] sm:$0xff] }
 0x20a   :  { %v1806_v16 = vsel %vm1804_vm7, %v1805_v40, %v2718_v62  ;;  %v2104_v3 = vsel %vm5076_vm10, 0, %v2102_v14  ;;  %vm5153_vm0 = vcmp.le.f32.partialorder %v2118_v33, 0.7853982  ;;  %v2387_v38 = vmul.f32 %v2335_v34, %v2269_v45  ;;  %v5447_v14 = vld [vmem:[#allocation11_spill] sm:$0xff]  ;;  %v5448_v45 = vld [vmem:[#allocation25_spill] sm:$0xff] }
 0x20b   :  { %vm545_vm9 = vcmp.eq.f32.partialorder %v5436_v57, inf  ;;  %v1803_v36 = vsel %vm1801_vm2, %v5101_v41, %v1802_v5  ;;  %v2008_v13 = vxor.u32 2147483648, %v2726_v25  ;;  %v2011_v21 = vxor.u32 2147483648, %v2724_v52 }
 0x20c   :  { %v2202_v62 = vxor.u32 2147483648, %v2201_v56  ;;  %v1601_v9 = vsel %vm1594_vm1, %v5030_v61, %v5023_v7  ;;  %vm1903_vm10 = vcmp.lt.s32.totalorder %v1902_v6, 2  ;;  %vm2007_vm7 = vcmp.eq.s32.totalorder %v2005_v0, 0  ;;  %2389 = vst [vmem:[#allocation6] sm:$0xff] %v2387_v38  ;;  %v2730_v33 = vpop.eup %2729 }
 0x20d   :  { %vm2010_vm15 = vcmp.eq.s32.totalorder %v2005_v0, 2  ;;  %v1906_v53 = vsel %vm1904_vm11, %v2720_v23, %v1905_v31  ;;  %v1909_v11 = vsel %vm1907_vm13, %v1908_v60, %v2722_v27  ;;  %v2108_v44 = vand.u32 3, %v2104_v3  ;;  %v5437_v27 = vld [vmem:[#allocation26_spill] sm:$0xff] }
 0x20e   :  { %v2203_v41 = vsel %vm2120_vm14, %v2202_v62, %v2201_v56  ;;  %v1704_v32 = vsel %vm1697_vm3, %v1700_v46, %v1703_v58  ;;  %v1807_v4 = vsel %vm1800_vm4, %v1803_v36, %v1806_v16  ;;  %v2204_v7 = vsub.s32 4, %v5043_v30  ;;  %v5446_v46 = vld [vmem:[#allocation10_spill] sm:$0xff] }
 0x20f   :  { %v2206_v61 = vsel %vm5153_vm0, %v5404_v54, %v2203_v41  ;;  %vm547_vm1 = vcmp.eq.f32.partialorder %v5436_v57, 0.0  ;;  %vm2006_vm2 = vcmp.lt.s32.totalorder %v2005_v0, 2  ;;  %v2009_v49 = vsel %vm2007_vm7, %v2724_v52, %v2008_v13 }
 0x210   :  { %v2012_v28 = vsel %vm2010_vm15, %v2011_v21, %v2726_v25  ;;  %2731 = vcosq.f32 %v2206_v61  ;;  %v1910_v43 = vsel %vm1903_vm10, %v1906_v53, %v1909_v11  ;;  %v2111_v23 = vxor.u32 2147483648, %v2730_v33  ;;  %v5449_v25 = vld [vmem:[#allocation37_spill] sm:$0xff] }
 0x211   :  { %v2114_v8 = vxor.u32 2147483648, %v2728_v48  ;;  %2733 = vsinq.f32 %v2206_v61  ;;  %v1602_v29 = vsel %vm1592_vm5, nan, %v1601_v9  ;;  %v1705_v51 = vsel %vm1695_vm12, nan, %v1704_v32 }
 0x212   :  { %vm2110_vm3 = vcmp.eq.s32.totalorder %v2108_v44, 0  ;;  %vm2113_vm4 = vcmp.eq.s32.totalorder %v2108_v44, 2  ;;  %v1808_v59 = vsel %vm1798_vm8, nan, %v1807_v4  ;;  %vm2004_vm11 = vweird.f32 %v5396_v10 }
 0x213   :  { %v2013_v12 = vsel %vm2006_vm2, %v2009_v49, %v2012_v28  ;;  %v2205_v18 = vsel %vm2120_vm14, %v2204_v7, %v5043_v30  ;;  %v5438_v6 = vand.u32 2147483648, %v5432_v35  ;;  %vm5439_vm5 = vweird.f32 %v5388_v24  ;;  %v5443_v30 = vld [vmem:[#allocation40_spill] sm:$0xff] }
 0x214   :  { %v1911_v37 = vsel %vm5439_vm5, nan, %v1910_v43  ;;  %vm2109_vm12 = vcmp.lt.s32.totalorder %v2108_v44, 2  ;;  %v2229_v55 = vmul.f32 %v4855_v15, %v5440_v19  ;;  %v2112_v52 = vsel %vm2110_vm3, %v2728_v48, %v2111_v23 }
 0x215   :  { %v535_v39 = vsel %vm533_vm6, %v5438_v6, %v5437_v27  ;;  %v2115_v10 = vsel %vm2113_vm4, %v2114_v8, %v2730_v33  ;;  %v2230_v20 = vmul.f32 %v1602_v29, %v5441_v22  ;;  %v2231_v17 = vmul.f32 %v1705_v51, %v5442_v63 }
 0x216   :  { %v5444_v58 = vand.u32 2147483648, %v5433_v47  ;;  %vm5445_vm8 = vcmp.eq.f32.partialorder %v5433_v47, 0.0  ;;  %v2014_v42 = vsel %vm2004_vm11, nan, %v2013_v12  ;;  %v2207_v24 = vsel %vm5153_vm0, 0, %v2205_v18 }
 0x217   :  { %v2232_v5 = vmul.f32 %v1808_v59, %v5446_v46  ;;  %v546_v15 = vsel %vm545_vm9, %v5436_v57, %v5447_v14  ;;  %v548_v1 = vand.u32 2147483648, %v5436_v57  ;;  %v551_v35 = vmul.f32 %v5449_v25, %v5448_v45 }
 0x218   :  { %v542_v40 = vsel %vm5445_vm8, %v5444_v58, %v5443_v30  ;;  %vm552_vm6 = vcmp.eq.f32.partialorder %v5448_v45, inf  ;;  %vm2107_vm13 = vweird.f32 %v5397_v2  ;;  %v2116_v0 = vsel %vm2109_vm12, %v2112_v52, %v2115_v10 }
 0x219   :  { %v2233_v34 = vmul.f32 %v1911_v37, %v535_v39  ;;  %v2245_v31 = vmul.f32 0.1, %v2229_v55  ;;  %v2211_v60 = vand.u32 3, %v2207_v24  ;;  %v2234_v56 = vmul.f32 %v2014_v42, %v542_v40 }
 0x21a   :  { %v2246_v47 = vmul.f32 0.1, %v2230_v20  ;;  %v2247_v16 = vmul.f32 0.1, %v2231_v17  ;;  %v2248_v3 = vmul.f32 0.1, %v2232_v5  ;;  %v549_v26 = vsel %vm547_vm1, %v548_v1, %v546_v15 }
 0x21b   :  { %vm554_vm9 = vcmp.eq.f32.partialorder %v5448_v45, 0.0  ;;  %v2117_v38 = vsel %vm2107_vm13, nan, %v2116_v0  ;;  %v553_v48 = vsel %vm552_vm6, %v5448_v45, %v551_v35  ;;  %v555_v36 = vand.u32 2147483648, %v5448_v45  ;;  %v2270_v20 = vld [vmem:[#allocation3 + $0x8] sm:$0xff] }
 0x21c   :  { %v2249_v13 = vmul.f32 0.1, %v2233_v34  ;;  %v2261_v2 = vadd.f32 1.0, %v2245_v31  ;;  %vm2216_vm14 = vcmp.eq.s32.totalorder %v2211_v60, 2  ;;  %v2250_v62 = vmul.f32 0.1, %v2234_v56 }
 0x21d   :  { %v2732_v21 = vpop.eup %2731  ;;  %v2262_v9 = vadd.f32 1.0, %v2246_v47  ;;  %v2263_v33 = vadd.f32 1.0, %v2247_v16  ;;  %vm2213_vm15 = vcmp.eq.s32.totalorder %v2211_v60, 0  ;;  %v2235_v44 = vmul.f32 %v2117_v38, %v549_v26 }
 0x21e   :  { %v2734_v53 = vpop.eup %2733  ;;  %v2217_v11 = vxor.u32 2147483648, %v2732_v21  ;;  %v2264_v57 = vadd.f32 1.0, %v2248_v3  ;;  %vm2212_vm0 = vcmp.lt.s32.totalorder %v2211_v60, 2  ;;  %vm2210_vm10 = vweird.f32 %v5404_v54 }
 0x21f   :  { %v2214_v41 = vxor.u32 2147483648, %v2734_v53  ;;  %v556_v4 = vsel %vm554_vm9, %v555_v36, %v553_v48  ;;  %v2265_v61 = vadd.f32 1.0, %v2249_v13  ;;  %v2266_v49 = vadd.f32 1.0, %v2250_v62 }
 0x220   :  { %v2218_v32 = vsel %vm2216_vm14, %v2217_v11, %v2734_v53  ;;  %v2251_v43 = vmul.f32 0.1, %v2235_v44  ;;  %v2336_v23 = vcombine.low %v2261_v2, %v2262_v9  ;;  %v2337_v8 = vcombine.low %v2263_v33, %v2264_v57 }
 0x221   :  { %v2215_v7 = vsel %vm2213_vm15, %v2732_v21, %v2214_v41  ;;  %v2338_v59 = vcombine.low %v2265_v61, %v2266_v49 }
 0x222   :  { %v2219_v28 = vsel %vm2212_vm0, %v2215_v7, %v2218_v32  ;;  %v2267_v18 = vadd.f32 1.0, %v2251_v43  ;;  %v2346_v27 = vrot.slane %v2336_v23, %v5105_v50  ;;  %v2353_v54 = vrot.slane %v2337_v8, %v5105_v50 }
 0x223   :  { %v2220_v29 = vsel %vm2210_vm10, nan, %v2219_v28  ;;  %v2360_v37 = vrot.slane %v2338_v59, %v5105_v50 }
 0x224   :  { %v2236_v51 = vmul.f32 %v2220_v29, %v556_v4  ;;  %v2368_v19 = vcombine.low %v2346_v27, %v2353_v54 }
 0x226   :  { %v2252_v12 = vmul.f32 0.1, %v2236_v51  ;;  %v2376_v10 = vrot.slane %v2368_v19, %v5105_v50 }
 0x228   :  { %v2268_v6 = vadd.f32 1.0, %v2252_v12 }
 0x22a   :  { %v2339_v39 = vcombine.low %v2267_v18, %v2268_v6 }
 0x22c   :  { %v2367_v55 = vrot.slane %v2339_v39, %v5105_v50 }
 0x22e   :  { %v2369_v52 = vcombine.low %v2360_v37, %v2367_v55 }
 0x230   :  { %v2383_v22 = vrot.slane %v2369_v52, %v5105_v50 }
 0x232   :  { %v2384_v63 = vcombine.low %v2376_v10, %v2383_v22 }
 0x234   :  { %v2388_v17 = vmul.f32 %v2384_v63, %v2270_v20 }
 0x236   :  { %2390 = vst [vmem:[#allocation6 + $0x8] sm:$0xff] %v2388_v17 }
 0x237   :  { %2766 = shalt.err (!%p2763_p9)
}
 0x238   :  { %2400 = dma.vmem_to_hbm [thread:$0]  %s2398_s28, 256, %s5236_s2, [#allocation5]  }
 0x239   :  { %2777 = dma.done.wait [#allocation5], 256  }
 0x23a   :  { %2778 = vsyncadd [#allocation5], 4294967040 }
 0x23b   :  { %2404 = vsyncpa [#allocation4], 1 }
 0x23c   :  { %2405 = vsyncpa [#allocation5], 1 }

</bundles_post_ra>
